<compile_context>
chip_gen: v7x
topology: tpu7x:2x2x1
jax: 0.10.0
libtpu: 0.0.40
codegen_flags: <defaults>
</compile_context>

<pallas_src>
import functools

import jax
import jax.numpy as jnp
from jax import lax
from jax.experimental import pallas as pl
from jax.experimental.pallas import tpu as pltpu

BN_EPS = 1e-5
NUM_OPS = 6   # [none, max_pool_3x3, avg_pool_3x3, skip_connect, sep_conv_3x3, dil_conv_3x3]
NEG = -3.0e38  # additive "-inf" for max-pool padding (f32)


# ------------------------------ fused kernel ---------------------------------
def _mixed_kernel(w_ref, xz_ref, mneg_ref, icnt_ref,
                  sdw1_ref, spw1_ref, sdw2_ref, spw2_ref,
                  ddw_ref, dpw_ref, fold_ref,
                  out_ref,
                  y1_s, z_s, y2_s, base_s, tp_s,
                  *, B, H, W, C):
    WC = W * C
    inv_n = 1.0 / float(B * H * W)

    w_max, w_avg, w_skip = w_ref[1], w_ref[2], w_ref[3]
    w_sep, w_dil = w_ref[4], w_ref[5]

    # ---- phase A: pools + skip (finalized) and sep-stage-1 / dil conv (pre-BN)
    sy1 = qy1 = sz = qz = None
    for b in range(B):
        xz = xz_ref[b]                        # (H+4, (W+4)*C), zero padded by 2
        xr = jnp.maximum(xz, 0.0)             # ReLU commutes with zero padding
        x = xz[2:2 + H, 2 * C:2 * C + WC]     # original input (skip_connect)

        mp = ap = dw1 = dl = None
        # fused 9-tap loop: max pool, avg pool (sum), sep dw1, dil dw
        for ky in range(3):
            for kx in range(3):
                r0, c0 = 1 + ky, (1 + kx) * C                 # pad-1 window
                sl = xz[r0:r0 + H, c0:c0 + WC]
                mt = sl + mneg_ref[r0:r0 + H, c0:c0 + WC]     # -BIG in the pad
                mp = mt if mp is None else jnp.maximum(mp, mt)
                ap = sl if ap is None else ap + sl
                t1 = xr[r0:r0 + H, c0:c0 + WC] * sdw1_ref[ky, kx]
                dw1 = t1 if dw1 is None else dw1 + t1
                rd, cd = 2 * ky, 2 * kx * C                   # dilation-2 window
                t2 = xr[rd:rd + H, cd:cd + WC] * ddw_ref[ky, kx]
                dl = t2 if dl is None else dl + t2

        # ops that need no BN: accumulate immediately ('none' contributes 0)
        base_s[b] = (w_max * mp
                     + w_avg * (ap * icnt_ref[...])   # count_include_pad=False
                     + w_skip * x)

        # 1x1 convs on the MXU (block-diagonal expanded weights)
        y1 = jnp.dot(dw1, spw1_ref[...], preferred_element_type=jnp.float32)
        z = jnp.dot(dl, dpw_ref[...], preferred_element_type=jnp.float32)
        y1_s[b] = y1
        z_s[b] = z

        s1 = jnp.sum(y1, axis=0, keepdims=True)
        q1 = jnp.sum(y1 * y1, axis=0, keepdims=True)
        s2 = jnp.sum(z, axis=0, keepdims=True)
        q2 = jnp.sum(z * z, axis=0, keepdims=True)
        sy1 = s1 if sy1 is None else sy1 + s1
        qy1 = q1 if qy1 is None else qy1 + q1
        sz = s2 if sz is None else sz + s2
        qz = q2 if qz is None else qz + q2

    # batch-global BN stats: fold the per-(w,c) sums over W and broadcast back
    # in one small MXU matmul with the tile(eye(C), (W,W)) matrix.
    stats1 = jnp.concatenate([sy1, qy1, sz, qz], axis=0)            # (4, WC)
    fold1 = jnp.dot(stats1, fold_ref[...],
                    preferred_element_type=jnp.float32) * inv_n
    m1, e1, mz, ez = fold1[0:1], fold1[1:2], fold1[2:3], fold1[3:4]
    i1 = lax.rsqrt(jnp.maximum(e1 - m1 * m1, 0.0) + BN_EPS)
    iz = lax.rsqrt(jnp.maximum(ez - mz * mz, 0.0) + BN_EPS)

    # ---- phase B: sep_conv stage 2: BN -> ReLU -> dw3x3 -> pw1x1 (pre-BN) ----
    # zero the re-pad scratch ONCE; only its interior is rewritten below, so
    # the 1-pixel border stays zero for every batch item.
    tp_s[...] = jnp.zeros(tp_s.shape, tp_s.dtype)
    sy2 = qy2 = None
    for b in range(B):
        t = jnp.maximum((y1_s[b] - m1) * i1, 0.0)                   # BN + ReLU
        tp_s[1:1 + H, C:C + WC] = t

        acc = None
        for ky in range(3):
            for kx in range(3):
                term = tp_s[ky:ky + H, kx * C:kx * C + WC] * sdw2_ref[ky, kx]
                acc = term if acc is None else acc + term

        y2 = jnp.dot(acc, spw2_ref[...], preferred_element_type=jnp.float32)
        y2_s[b] = y2
        s = jnp.sum(y2, axis=0, keepdims=True)
        q = jnp.sum(y2 * y2, axis=0, keepdims=True)
        sy2 = s if sy2 is None else sy2 + s
        qy2 = q if qy2 is None else qy2 + q

    stats2 = jnp.concatenate([sy2, qy2], axis=0)                    # (2, WC)
    fold2 = jnp.dot(stats2, fold_ref[...],
                    preferred_element_type=jnp.float32) * inv_n
    m2, e2 = fold2[0:1], fold2[1:2]
    i2 = lax.rsqrt(jnp.maximum(e2 - m2 * m2, 0.0) + BN_EPS)

    # ---- phase C: final combine: base + w_dil * BN(z) + w_sep * BN(y2) ------
    for b in range(B):
        out_ref[b] = (base_s[b]
                      + w_dil * ((z_s[b] - mz) * iz)
                      + w_sep * ((y2_s[b] - m2) * i2))


# --------------------------------- wrapper -----------------------------------
def mixed_op_forward(x_nchw, weights, params):
    """x_nchw: (B, C, H, W) float32 (PyTorch layout); weights: (NUM_OPS,)."""
    x = jnp.transpose(x_nchw, (0, 2, 3, 1)).astype(jnp.float32)   # NHWC
    B, H, W, C = x.shape
    WC = W * C
    WP = (W + 4) * C
    w = weights.astype(jnp.float32)

    # single zero-padded copy (pad 2 for the dilated conv), flattened so the
    # last (lane) dim is (W+4)*C
    xz = jnp.pad(x, ((0, 0), (2, 2), (2, 2), (0, 0))).reshape(B, H + 4, WP)

    # additive "-inf" mask for max pool (0 inside the image, -BIG in the pad)
    hh = jnp.arange(H + 4)[:, None]
    ww = (jnp.arange(WP) // C)[None, :]
    valid = (hh >= 2) & (hh < H + 2) & (ww >= 2) & (ww < W + 2)
    mneg = jnp.where(valid, 0.0, NEG).astype(jnp.float32)

    # avg-pool reciprocal valid counts (count_include_pad=False), flattened
    ones = jnp.pad(jnp.ones((H, W), jnp.float32), ((1, 1), (1, 1)))
    cnt = sum(ones[ky:ky + H, kx:kx + W] for ky in range(3) for kx in range(3))
    inv_cnt = jnp.repeat(1.0 / cnt, C, axis=1)                     # (H, W*C)

    # fold-and-broadcast-over-W matrix for per-channel BN stats
    fold = jnp.tile(jnp.eye(C, dtype=jnp.float32), (W, W))         # (WC, WC)

    def dw_flat(k):                       # (3, 3, C) -> (3, 3, W*C)
        return jnp.tile(k.astype(jnp.float32), (1, 1, W))

    def pw_block(k):                      # (Cin, Cout) -> block-diag (W*C, W*C)
        return jnp.kron(jnp.eye(W, dtype=jnp.float32), k.astype(jnp.float32))

    def vspec(shape):                     # full-array VMEM block
        nd = len(shape)
        return pl.BlockSpec(shape, lambda i: (0,) * nd)

    smem = pl.BlockSpec(memory_space=pltpu.MemorySpace.SMEM)

    out_flat = pl.pallas_call(
        functools.partial(_mixed_kernel, B=B, H=H, W=W, C=C),
        grid=(1,),
        in_specs=[smem,                      # arch weights
                  vspec((B, H + 4, WP)),     # zero-padded input
                  vspec((H + 4, WP)),        # max-pool additive mask
                  vspec((H, WC)),            # avg-pool 1/count
                  vspec((3, 3, WC)), vspec((WC, WC)),   # sep dw1 / pw1
                  vspec((3, 3, WC)), vspec((WC, WC)),   # sep dw2 / pw2
                  vspec((3, 3, WC)), vspec((WC, WC)),   # dil dw  / pw
                  vspec((WC, WC))],          # BN fold matrix
        out_specs=vspec((B, H, WC)),
        out_shape=jax.ShapeDtypeStruct((B, H, WC), jnp.float32),
        scratch_shapes=[pltpu.VMEM((B, H, WC), jnp.float32),       # y1
                        pltpu.VMEM((B, H, WC), jnp.float32),       # z (dil pre-BN)
                        pltpu.VMEM((B, H, WC), jnp.float32),       # y2
                        pltpu.VMEM((B, H, WC), jnp.float32),       # base
                        pltpu.VMEM((H + 2, (W + 2) * C), jnp.float32)],  # re-pad
        compiler_params=pltpu.CompilerParams(
            dimension_semantics=("arbitrary",)),
    )(w, xz, mneg, inv_cnt,
      dw_flat(params['sep_dw1']), pw_block(params['sep_pw1']),
      dw_flat(params['sep_dw2']), pw_block(params['sep_pw2']),
      dw_flat(params['dil_dw']), pw_block(params['dil_pw']),
      fold)

    return jnp.transpose(out_flat.reshape(B, H, W, C), (0, 3, 1, 2))   # NCHW


# ----------------------------- pure-JAX reference -----------------------------
def _bn_ref(y):
    m = jnp.mean(y, axis=(0, 1, 2), keepdims=True)
    v = jnp.mean((y - m) ** 2, axis=(0, 1, 2), keepdims=True)
    return (y - m) * lax.rsqrt(v + BN_EPS)


def mixed_op_reference(x_nchw, weights, params):
    x = jnp.transpose(x_nchw, (0, 2, 3, 1)).astype(jnp.float32)   # NHWC
    B, H, W, C = x.shape
    hp = lax.Precision.HIGHEST
    dn = lax.conv_dimension_numbers(x.shape, (3, 3, 1, C), ('NHWC', 'HWIO', 'NHWC'))

    def dwconv(t, k, dil):                # depthwise 3x3 (groups=C), pad=dil
        return lax.conv_general_dilated(
            t, k[:, :, None, :], (1, 1), [(dil, dil), (dil, dil)],
            rhs_dilation=(dil, dil), dimension_numbers=dn,
            feature_group_count=C, precision=hp)

    def pwconv(t, k):                     # 1x1 conv
        dnp = lax.conv_dimension_numbers(t.shape, (1, 1, C, C), ('NHWC', 'HWIO', 'NHWC'))
        return lax.conv_general_dilated(
            t, k[None, None, :, :], (1, 1), 'VALID',
            dimension_numbers=dnp, precision=hp)

    pad = [(0, 0), (1, 1), (1, 1), (0, 0)]
    neg = jnp.array(-jnp.inf, jnp.float32)
    zero = jnp.array(0.0, jnp.float32)
    mp = lax.reduce_window(x, neg, lax.max, (1, 3, 3, 1), (1, 1, 1, 1), pad)
    sm = lax.reduce_window(x, zero, lax.add, (1, 3, 3, 1), (1, 1, 1, 1), pad)
    ct = lax.reduce_window(jnp.ones_like(x), zero, lax.add, (1, 3, 3, 1), (1, 1, 1, 1), pad)
    ap = sm / ct

    xr = jnp.maximum(x, 0.0)
    y1 = _bn_ref(pwconv(dwconv(xr, params['sep_dw1'], 1), params['sep_pw1']))
    sep = _bn_ref(pwconv(dwconv(jnp.maximum(y1, 0.0), params['sep_dw2'], 1),
                         params['sep_pw2']))
    dil = _bn_ref(pwconv(dwconv(xr, params['dil_dw'], 2), params['dil_pw']))

    out = (weights[1] * mp + weights[2] * ap + weights[3] * x
           + weights[4] * sep + weights[5] * dil)
    return jnp.transpose(out, (0, 3, 1, 2))


# ----------------------------------- main -------------------------------------
if __name__ == "__main__":
    key = jax.random.PRNGKey(0)
    B, C, H, W = 2, 4, 16, 16
    ks = jax.random.split(key, 8)

    x = jax.random.normal(ks[0], (B, C, H, W), jnp.float32)
    arch_weights = jax.nn.softmax(jax.random.normal(ks[1], (NUM_OPS,), jnp.float32))

    scale = 0.3
    params = {
        # depthwise kernels stored as (3, 3, C); pointwise as (C_in, C_out)
        'sep_dw1': scale * jax.random.normal(ks[2], (3, 3, C), jnp.float32),
        'sep_pw1': scale * jax.random.normal(ks[3], (C, C), jnp.float32),
        'sep_dw2': scale * jax.random.normal(ks[4], (3, 3, C), jnp.float32),
        'sep_pw2': scale * jax.random.normal(ks[5], (C, C), jnp.float32),
        'dil_dw':  scale * jax.random.normal(ks[6], (3, 3, C), jnp.float32),
        'dil_pw':  scale * jax.random.normal(ks[7], (C, C), jnp.float32),
    }

    fwd = jax.jit(mixed_op_forward)
    out = jax.block_until_ready(fwd(x, arch_weights, params))

    assert out.shape == (B, C, H, W), out.shape
    assert bool(jnp.all(jnp.isfinite(out)))

    ref = mixed_op_reference(x, arch_weights, params)
    err = float(jnp.max(jnp.abs(out - ref)))
    assert err < 5e-2, f"max abs err vs reference: {err}"

    print("KERNEL_OK")
</pallas_src>

<mosaic_0001>
module attributes {stable_mosaic.version = 11 : i64} {
  func.func @_mixed_kernel(%arg0: i32, %arg1: memref<6xf32, #tpu.memory_space<smem>>, %arg2: memref<2x20x80xf32, #tpu.memory_space<vmem>>, %arg3: memref<20x80xf32, #tpu.memory_space<vmem>>, %arg4: memref<16x64xf32, #tpu.memory_space<vmem>>, %arg5: memref<3x3x64xf32, #tpu.memory_space<vmem>>, %arg6: memref<64x64xf32, #tpu.memory_space<vmem>>, %arg7: memref<3x3x64xf32, #tpu.memory_space<vmem>>, %arg8: memref<64x64xf32, #tpu.memory_space<vmem>>, %arg9: memref<3x3x64xf32, #tpu.memory_space<vmem>>, %arg10: memref<64x64xf32, #tpu.memory_space<vmem>>, %arg11: memref<64x64xf32, #tpu.memory_space<vmem>>, %arg12: memref<2x16x64xf32, #tpu.memory_space<vmem>>, %arg13: memref<2x16x64xf32, #tpu.memory_space<vmem>>, %arg14: memref<2x16x64xf32, #tpu.memory_space<vmem>>, %arg15: memref<2x16x64xf32, #tpu.memory_space<vmem>>, %arg16: memref<2x16x64xf32, #tpu.memory_space<vmem>>, %arg17: memref<18x72xf32, #tpu.memory_space<vmem>>) attributes {dimension_semantics = [#tpu.dimension_semantics<arbitrary>], iteration_bounds = array<i64: 1>, scalar_prefetch = 0 : i64, scratch_operands = 5 : i64, tpu.core_type = #tpu.core_type<tc>, window_params = [{transform_indices = @transform_0, window_bounds = array<i64: 6>}, {pipeline_mode = #tpu.pipeline_mode<synchronous>, transform_indices = @transform_1, window_bounds = array<i64: 2, 20, 80>}, {pipeline_mode = #tpu.pipeline_mode<synchronous>, transform_indices = @transform_2, window_bounds = array<i64: 20, 80>}, {pipeline_mode = #tpu.pipeline_mode<synchronous>, transform_indices = @transform_3, window_bounds = array<i64: 16, 64>}, {pipeline_mode = #tpu.pipeline_mode<synchronous>, transform_indices = @transform_4, window_bounds = array<i64: 3, 3, 64>}, {pipeline_mode = #tpu.pipeline_mode<synchronous>, transform_indices = @transform_5, window_bounds = array<i64: 64, 64>}, {pipeline_mode = #tpu.pipeline_mode<synchronous>, transform_indices = @transform_6, window_bounds = array<i64: 3, 3, 64>}, {pipeline_mode = #tpu.pipeline_mode<synchronous>, transform_indices = @transform_7, window_bounds = array<i64: 64, 64>}, {pipeline_mode = #tpu.pipeline_mode<synchronous>, transform_indices = @transform_8, window_bounds = array<i64: 3, 3, 64>}, {pipeline_mode = #tpu.pipeline_mode<synchronous>, transform_indices = @transform_9, window_bounds = array<i64: 64, 64>}, {pipeline_mode = #tpu.pipeline_mode<synchronous>, transform_indices = @transform_10, window_bounds = array<i64: 64, 64>}, {pipeline_mode = #tpu.pipeline_mode<synchronous>, transform_indices = @transform_11, window_bounds = array<i64: 2, 16, 64>}]} {
    %c1 = arith.constant 1 : index
    %0 = memref.load %arg1[%c1] : memref<6xf32, #tpu.memory_space<smem>>
    %c2 = arith.constant 2 : index
    %1 = memref.load %arg1[%c2] : memref<6xf32, #tpu.memory_space<smem>>
    %c3 = arith.constant 3 : index
    %2 = memref.load %arg1[%c3] : memref<6xf32, #tpu.memory_space<smem>>
    %c4 = arith.constant 4 : index
    %3 = memref.load %arg1[%c4] : memref<6xf32, #tpu.memory_space<smem>>
    %c5 = arith.constant 5 : index
    %4 = memref.load %arg1[%c5] : memref<6xf32, #tpu.memory_space<smem>>
    %c0 = arith.constant 0 : index
    %c0_0 = arith.constant 0 : index
    %c0_1 = arith.constant 0 : index
    %5 = vector.load %arg2[%c0, %c0_0, %c0_1] : memref<2x20x80xf32, #tpu.memory_space<vmem>>, vector<1x20x80xf32>
    %6 = vector.shape_cast %5 : vector<1x20x80xf32> to vector<20x80xf32>
    %cst = arith.constant 0.000000e+00 : f32
    %7 = vector.broadcast %cst : f32 to vector<20x80xf32>
    %8 = arith.maximumf %6, %7 : vector<20x80xf32>
    %9 = vector.extract_strided_slice %6 {offsets = [2, 8], sizes = [16, 64], strides = [1, 1]} : vector<20x80xf32> to vector<16x64xf32>
    %10 = vector.extract_strided_slice %6 {offsets = [1, 4], sizes = [16, 64], strides = [1, 1]} : vector<20x80xf32> to vector<16x64xf32>
    %c1_2 = arith.constant 1 : index
    %c4_3 = arith.constant 4 : index
    %11 = vector.load %arg3[%c1_2, %c4_3] : memref<20x80xf32, #tpu.memory_space<vmem>>, vector<16x64xf32>
    %12 = arith.addf %10, %11 : vector<16x64xf32>
    %13 = vector.extract_strided_slice %8 {offsets = [1, 4], sizes = [16, 64], strides = [1, 1]} : vector<20x80xf32> to vector<16x64xf32>
    %c0_4 = arith.constant 0 : index
    %c0_5 = arith.constant 0 : index
    %c0_6 = arith.constant 0 : index
    %14 = vector.load %arg5[%c0_4, %c0_5, %c0_6] : memref<3x3x64xf32, #tpu.memory_space<vmem>>, vector<1x1x64xf32>
    %15 = vector.shape_cast %14 : vector<1x1x64xf32> to vector<64xf32>
    %16 = vector.shape_cast %15 : vector<64xf32> to vector<1x64xf32>
    %17 = vector.broadcast %16 : vector<1x64xf32> to vector<16x64xf32>
    %18 = arith.mulf %13, %17 : vector<16x64xf32>
    %19 = vector.extract_strided_slice %8 {offsets = [0, 0], sizes = [16, 64], strides = [1, 1]} : vector<20x80xf32> to vector<16x64xf32>
    %c0_7 = arith.constant 0 : index
    %c0_8 = arith.constant 0 : index
    %c0_9 = arith.constant 0 : index
    %20 = vector.load %arg9[%c0_7, %c0_8, %c0_9] : memref<3x3x64xf32, #tpu.memory_space<vmem>>, vector<1x1x64xf32>
    %21 = vector.shape_cast %20 : vector<1x1x64xf32> to vector<64xf32>
    %22 = vector.shape_cast %21 : vector<64xf32> to vector<1x64xf32>
    %23 = vector.broadcast %22 : vector<1x64xf32> to vector<16x64xf32>
    %24 = arith.mulf %19, %23 : vector<16x64xf32>
    %25 = vector.extract_strided_slice %6 {offsets = [1, 8], sizes = [16, 64], strides = [1, 1]} : vector<20x80xf32> to vector<16x64xf32>
    %c1_10 = arith.constant 1 : index
    %c8 = arith.constant 8 : index
    %26 = vector.load %arg3[%c1_10, %c8] : memref<20x80xf32, #tpu.memory_space<vmem>>, vector<16x64xf32>
    %27 = arith.addf %25, %26 : vector<16x64xf32>
    %28 = arith.maximumf %12, %27 : vector<16x64xf32>
    %29 = arith.addf %10, %25 : vector<16x64xf32>
    %30 = vector.extract_strided_slice %8 {offsets = [1, 8], sizes = [16, 64], strides = [1, 1]} : vector<20x80xf32> to vector<16x64xf32>
    %c0_11 = arith.constant 0 : index
    %c1_12 = arith.constant 1 : index
    %c0_13 = arith.constant 0 : index
    %31 = vector.load %arg5[%c0_11, %c1_12, %c0_13] : memref<3x3x64xf32, #tpu.memory_space<vmem>>, vector<1x1x64xf32>
    %32 = vector.shape_cast %31 : vector<1x1x64xf32> to vector<64xf32>
    %33 = vector.shape_cast %32 : vector<64xf32> to vector<1x64xf32>
    %34 = vector.broadcast %33 : vector<1x64xf32> to vector<16x64xf32>
    %35 = arith.mulf %30, %34 : vector<16x64xf32>
    %36 = arith.addf %18, %35 : vector<16x64xf32>
    %37 = vector.extract_strided_slice %8 {offsets = [0, 8], sizes = [16, 64], strides = [1, 1]} : vector<20x80xf32> to vector<16x64xf32>
    %c0_14 = arith.constant 0 : index
    %c1_15 = arith.constant 1 : index
    %c0_16 = arith.constant 0 : index
    %38 = vector.load %arg9[%c0_14, %c1_15, %c0_16] : memref<3x3x64xf32, #tpu.memory_space<vmem>>, vector<1x1x64xf32>
    %39 = vector.shape_cast %38 : vector<1x1x64xf32> to vector<64xf32>
    %40 = vector.shape_cast %39 : vector<64xf32> to vector<1x64xf32>
    %41 = vector.broadcast %40 : vector<1x64xf32> to vector<16x64xf32>
    %42 = arith.mulf %37, %41 : vector<16x64xf32>
    %43 = arith.addf %24, %42 : vector<16x64xf32>
    %44 = vector.extract_strided_slice %6 {offsets = [1, 12], sizes = [16, 64], strides = [1, 1]} : vector<20x80xf32> to vector<16x64xf32>
    %c1_17 = arith.constant 1 : index
    %c12 = arith.constant 12 : index
    %45 = vector.load %arg3[%c1_17, %c12] : memref<20x80xf32, #tpu.memory_space<vmem>>, vector<16x64xf32>
    %46 = arith.addf %44, %45 : vector<16x64xf32>
    %47 = arith.maximumf %28, %46 : vector<16x64xf32>
    %48 = arith.addf %29, %44 : vector<16x64xf32>
    %49 = vector.extract_strided_slice %8 {offsets = [1, 12], sizes = [16, 64], strides = [1, 1]} : vector<20x80xf32> to vector<16x64xf32>
    %c0_18 = arith.constant 0 : index
    %c2_19 = arith.constant 2 : index
    %c0_20 = arith.constant 0 : index
    %50 = vector.load %arg5[%c0_18, %c2_19, %c0_20] : memref<3x3x64xf32, #tpu.memory_space<vmem>>, vector<1x1x64xf32>
    %51 = vector.shape_cast %50 : vector<1x1x64xf32> to vector<64xf32>
    %52 = vector.shape_cast %51 : vector<64xf32> to vector<1x64xf32>
    %53 = vector.broadcast %52 : vector<1x64xf32> to vector<16x64xf32>
    %54 = arith.mulf %49, %53 : vector<16x64xf32>
    %55 = arith.addf %36, %54 : vector<16x64xf32>
    %56 = vector.extract_strided_slice %8 {offsets = [0, 16], sizes = [16, 64], strides = [1, 1]} : vector<20x80xf32> to vector<16x64xf32>
    %c0_21 = arith.constant 0 : index
    %c2_22 = arith.constant 2 : index
    %c0_23 = arith.constant 0 : index
    %57 = vector.load %arg9[%c0_21, %c2_22, %c0_23] : memref<3x3x64xf32, #tpu.memory_space<vmem>>, vector<1x1x64xf32>
    %58 = vector.shape_cast %57 : vector<1x1x64xf32> to vector<64xf32>
    %59 = vector.shape_cast %58 : vector<64xf32> to vector<1x64xf32>
    %60 = vector.broadcast %59 : vector<1x64xf32> to vector<16x64xf32>
    %61 = arith.mulf %56, %60 : vector<16x64xf32>
    %62 = arith.addf %43, %61 : vector<16x64xf32>
    %63 = vector.extract_strided_slice %6 {offsets = [2, 4], sizes = [16, 64], strides = [1, 1]} : vector<20x80xf32> to vector<16x64xf32>
    %c2_24 = arith.constant 2 : index
    %c4_25 = arith.constant 4 : index
    %64 = vector.load %arg3[%c2_24, %c4_25] : memref<20x80xf32, #tpu.memory_space<vmem>>, vector<16x64xf32>
    %65 = arith.addf %63, %64 : vector<16x64xf32>
    %66 = arith.maximumf %47, %65 : vector<16x64xf32>
    %67 = arith.addf %48, %63 : vector<16x64xf32>
    %68 = vector.extract_strided_slice %8 {offsets = [2, 4], sizes = [16, 64], strides = [1, 1]} : vector<20x80xf32> to vector<16x64xf32>
    %c1_26 = arith.constant 1 : index
    %c0_27 = arith.constant 0 : index
    %c0_28 = arith.constant 0 : index
    %69 = vector.load %arg5[%c1_26, %c0_27, %c0_28] : memref<3x3x64xf32, #tpu.memory_space<vmem>>, vector<1x1x64xf32>
    %70 = vector.shape_cast %69 : vector<1x1x64xf32> to vector<64xf32>
    %71 = vector.shape_cast %70 : vector<64xf32> to vector<1x64xf32>
    %72 = vector.broadcast %71 : vector<1x64xf32> to vector<16x64xf32>
    %73 = arith.mulf %68, %72 : vector<16x64xf32>
    %74 = arith.addf %55, %73 : vector<16x64xf32>
    %75 = vector.extract_strided_slice %8 {offsets = [2, 0], sizes = [16, 64], strides = [1, 1]} : vector<20x80xf32> to vector<16x64xf32>
    %c1_29 = arith.constant 1 : index
    %c0_30 = arith.constant 0 : index
    %c0_31 = arith.constant 0 : index
    %76 = vector.load %arg9[%c1_29, %c0_30, %c0_31] : memref<3x3x64xf32, #tpu.memory_space<vmem>>, vector<1x1x64xf32>
    %77 = vector.shape_cast %76 : vector<1x1x64xf32> to vector<64xf32>
    %78 = vector.shape_cast %77 : vector<64xf32> to vector<1x64xf32>
    %79 = vector.broadcast %78 : vector<1x64xf32> to vector<16x64xf32>
    %80 = arith.mulf %75, %79 : vector<16x64xf32>
    %81 = arith.addf %62, %80 : vector<16x64xf32>
    %82 = vector.extract_strided_slice %6 {offsets = [2, 8], sizes = [16, 64], strides = [1, 1]} : vector<20x80xf32> to vector<16x64xf32>
    %c2_32 = arith.constant 2 : index
    %c8_33 = arith.constant 8 : index
    %83 = vector.load %arg3[%c2_32, %c8_33] : memref<20x80xf32, #tpu.memory_space<vmem>>, vector<16x64xf32>
    %84 = arith.addf %82, %83 : vector<16x64xf32>
    %85 = arith.maximumf %66, %84 : vector<16x64xf32>
    %86 = arith.addf %67, %82 : vector<16x64xf32>
    %87 = vector.extract_strided_slice %8 {offsets = [2, 8], sizes = [16, 64], strides = [1, 1]} : vector<20x80xf32> to vector<16x64xf32>
    %c1_34 = arith.constant 1 : index
    %c1_35 = arith.constant 1 : index
    %c0_36 = arith.constant 0 : index
    %88 = vector.load %arg5[%c1_34, %c1_35, %c0_36] : memref<3x3x64xf32, #tpu.memory_space<vmem>>, vector<1x1x64xf32>
    %89 = vector.shape_cast %88 : vector<1x1x64xf32> to vector<64xf32>
    %90 = vector.shape_cast %89 : vector<64xf32> to vector<1x64xf32>
    %91 = vector.broadcast %90 : vector<1x64xf32> to vector<16x64xf32>
    %92 = arith.mulf %87, %91 : vector<16x64xf32>
    %93 = arith.addf %74, %92 : vector<16x64xf32>
    %94 = vector.extract_strided_slice %8 {offsets = [2, 8], sizes = [16, 64], strides = [1, 1]} : vector<20x80xf32> to vector<16x64xf32>
    %c1_37 = arith.constant 1 : index
    %c1_38 = arith.constant 1 : index
    %c0_39 = arith.constant 0 : index
    %95 = vector.load %arg9[%c1_37, %c1_38, %c0_39] : memref<3x3x64xf32, #tpu.memory_space<vmem>>, vector<1x1x64xf32>
    %96 = vector.shape_cast %95 : vector<1x1x64xf32> to vector<64xf32>
    %97 = vector.shape_cast %96 : vector<64xf32> to vector<1x64xf32>
    %98 = vector.broadcast %97 : vector<1x64xf32> to vector<16x64xf32>
    %99 = arith.mulf %94, %98 : vector<16x64xf32>
    %100 = arith.addf %81, %99 : vector<16x64xf32>
    %101 = vector.extract_strided_slice %6 {offsets = [2, 12], sizes = [16, 64], strides = [1, 1]} : vector<20x80xf32> to vector<16x64xf32>
    %c2_40 = arith.constant 2 : index
    %c12_41 = arith.constant 12 : index
    %102 = vector.load %arg3[%c2_40, %c12_41] : memref<20x80xf32, #tpu.memory_space<vmem>>, vector<16x64xf32>
    %103 = arith.addf %101, %102 : vector<16x64xf32>
    %104 = arith.maximumf %85, %103 : vector<16x64xf32>
    %105 = arith.addf %86, %101 : vector<16x64xf32>
    %106 = vector.extract_strided_slice %8 {offsets = [2, 12], sizes = [16, 64], strides = [1, 1]} : vector<20x80xf32> to vector<16x64xf32>
    %c1_42 = arith.constant 1 : index
    %c2_43 = arith.constant 2 : index
    %c0_44 = arith.constant 0 : index
    %107 = vector.load %arg5[%c1_42, %c2_43, %c0_44] : memref<3x3x64xf32, #tpu.memory_space<vmem>>, vector<1x1x64xf32>
    %108 = vector.shape_cast %107 : vector<1x1x64xf32> to vector<64xf32>
    %109 = vector.shape_cast %108 : vector<64xf32> to vector<1x64xf32>
    %110 = vector.broadcast %109 : vector<1x64xf32> to vector<16x64xf32>
    %111 = arith.mulf %106, %110 : vector<16x64xf32>
    %112 = arith.addf %93, %111 : vector<16x64xf32>
    %113 = vector.extract_strided_slice %8 {offsets = [2, 16], sizes = [16, 64], strides = [1, 1]} : vector<20x80xf32> to vector<16x64xf32>
    %c1_45 = arith.constant 1 : index
    %c2_46 = arith.constant 2 : index
    %c0_47 = arith.constant 0 : index
    %114 = vector.load %arg9[%c1_45, %c2_46, %c0_47] : memref<3x3x64xf32, #tpu.memory_space<vmem>>, vector<1x1x64xf32>
    %115 = vector.shape_cast %114 : vector<1x1x64xf32> to vector<64xf32>
    %116 = vector.shape_cast %115 : vector<64xf32> to vector<1x64xf32>
    %117 = vector.broadcast %116 : vector<1x64xf32> to vector<16x64xf32>
    %118 = arith.mulf %113, %117 : vector<16x64xf32>
    %119 = arith.addf %100, %118 : vector<16x64xf32>
    %120 = vector.extract_strided_slice %6 {offsets = [3, 4], sizes = [16, 64], strides = [1, 1]} : vector<20x80xf32> to vector<16x64xf32>
    %c3_48 = arith.constant 3 : index
    %c4_49 = arith.constant 4 : index
    %121 = vector.load %arg3[%c3_48, %c4_49] : memref<20x80xf32, #tpu.memory_space<vmem>>, vector<16x64xf32>
    %122 = arith.addf %120, %121 : vector<16x64xf32>
    %123 = arith.maximumf %104, %122 : vector<16x64xf32>
    %124 = arith.addf %105, %120 : vector<16x64xf32>
    %125 = vector.extract_strided_slice %8 {offsets = [3, 4], sizes = [16, 64], strides = [1, 1]} : vector<20x80xf32> to vector<16x64xf32>
    %c2_50 = arith.constant 2 : index
    %c0_51 = arith.constant 0 : index
    %c0_52 = arith.constant 0 : index
    %126 = vector.load %arg5[%c2_50, %c0_51, %c0_52] : memref<3x3x64xf32, #tpu.memory_space<vmem>>, vector<1x1x64xf32>
    %127 = vector.shape_cast %126 : vector<1x1x64xf32> to vector<64xf32>
    %128 = vector.shape_cast %127 : vector<64xf32> to vector<1x64xf32>
    %129 = vector.broadcast %128 : vector<1x64xf32> to vector<16x64xf32>
    %130 = arith.mulf %125, %129 : vector<16x64xf32>
    %131 = arith.addf %112, %130 : vector<16x64xf32>
    %132 = vector.extract_strided_slice %8 {offsets = [4, 0], sizes = [16, 64], strides = [1, 1]} : vector<20x80xf32> to vector<16x64xf32>
    %c2_53 = arith.constant 2 : index
    %c0_54 = arith.constant 0 : index
    %c0_55 = arith.constant 0 : index
    %133 = vector.load %arg9[%c2_53, %c0_54, %c0_55] : memref<3x3x64xf32, #tpu.memory_space<vmem>>, vector<1x1x64xf32>
    %134 = vector.shape_cast %133 : vector<1x1x64xf32> to vector<64xf32>
    %135 = vector.shape_cast %134 : vector<64xf32> to vector<1x64xf32>
    %136 = vector.broadcast %135 : vector<1x64xf32> to vector<16x64xf32>
    %137 = arith.mulf %132, %136 : vector<16x64xf32>
    %138 = arith.addf %119, %137 : vector<16x64xf32>
    %139 = vector.extract_strided_slice %6 {offsets = [3, 8], sizes = [16, 64], strides = [1, 1]} : vector<20x80xf32> to vector<16x64xf32>
    %c3_56 = arith.constant 3 : index
    %c8_57 = arith.constant 8 : index
    %140 = vector.load %arg3[%c3_56, %c8_57] : memref<20x80xf32, #tpu.memory_space<vmem>>, vector<16x64xf32>
    %141 = arith.addf %139, %140 : vector<16x64xf32>
    %142 = arith.maximumf %123, %141 : vector<16x64xf32>
    %143 = arith.addf %124, %139 : vector<16x64xf32>
    %144 = vector.extract_strided_slice %8 {offsets = [3, 8], sizes = [16, 64], strides = [1, 1]} : vector<20x80xf32> to vector<16x64xf32>
    %c2_58 = arith.constant 2 : index
    %c1_59 = arith.constant 1 : index
    %c0_60 = arith.constant 0 : index
    %145 = vector.load %arg5[%c2_58, %c1_59, %c0_60] : memref<3x3x64xf32, #tpu.memory_space<vmem>>, vector<1x1x64xf32>
    %146 = vector.shape_cast %145 : vector<1x1x64xf32> to vector<64xf32>
    %147 = vector.shape_cast %146 : vector<64xf32> to vector<1x64xf32>
    %148 = vector.broadcast %147 : vector<1x64xf32> to vector<16x64xf32>
    %149 = arith.mulf %144, %148 : vector<16x64xf32>
    %150 = arith.addf %131, %149 : vector<16x64xf32>
    %151 = vector.extract_strided_slice %8 {offsets = [4, 8], sizes = [16, 64], strides = [1, 1]} : vector<20x80xf32> to vector<16x64xf32>
    %c2_61 = arith.constant 2 : index
    %c1_62 = arith.constant 1 : index
    %c0_63 = arith.constant 0 : index
    %152 = vector.load %arg9[%c2_61, %c1_62, %c0_63] : memref<3x3x64xf32, #tpu.memory_space<vmem>>, vector<1x1x64xf32>
    %153 = vector.shape_cast %152 : vector<1x1x64xf32> to vector<64xf32>
    %154 = vector.shape_cast %153 : vector<64xf32> to vector<1x64xf32>
    %155 = vector.broadcast %154 : vector<1x64xf32> to vector<16x64xf32>
    %156 = arith.mulf %151, %155 : vector<16x64xf32>
    %157 = arith.addf %138, %156 : vector<16x64xf32>
    %158 = vector.extract_strided_slice %6 {offsets = [3, 12], sizes = [16, 64], strides = [1, 1]} : vector<20x80xf32> to vector<16x64xf32>
    %c3_64 = arith.constant 3 : index
    %c12_65 = arith.constant 12 : index
    %159 = vector.load %arg3[%c3_64, %c12_65] : memref<20x80xf32, #tpu.memory_space<vmem>>, vector<16x64xf32>
    %160 = arith.addf %158, %159 : vector<16x64xf32>
    %161 = arith.maximumf %142, %160 : vector<16x64xf32>
    %162 = arith.addf %143, %158 : vector<16x64xf32>
    %163 = vector.extract_strided_slice %8 {offsets = [3, 12], sizes = [16, 64], strides = [1, 1]} : vector<20x80xf32> to vector<16x64xf32>
    %c2_66 = arith.constant 2 : index
    %c2_67 = arith.constant 2 : index
    %c0_68 = arith.constant 0 : index
    %164 = vector.load %arg5[%c2_66, %c2_67, %c0_68] : memref<3x3x64xf32, #tpu.memory_space<vmem>>, vector<1x1x64xf32>
    %165 = vector.shape_cast %164 : vector<1x1x64xf32> to vector<64xf32>
    %166 = vector.shape_cast %165 : vector<64xf32> to vector<1x64xf32>
    %167 = vector.broadcast %166 : vector<1x64xf32> to vector<16x64xf32>
    %168 = arith.mulf %163, %167 : vector<16x64xf32>
    %169 = arith.addf %150, %168 : vector<16x64xf32>
    %170 = vector.extract_strided_slice %8 {offsets = [4, 16], sizes = [16, 64], strides = [1, 1]} : vector<20x80xf32> to vector<16x64xf32>
    %c2_69 = arith.constant 2 : index
    %c2_70 = arith.constant 2 : index
    %c0_71 = arith.constant 0 : index
    %171 = vector.load %arg9[%c2_69, %c2_70, %c0_71] : memref<3x3x64xf32, #tpu.memory_space<vmem>>, vector<1x1x64xf32>
    %172 = vector.shape_cast %171 : vector<1x1x64xf32> to vector<64xf32>
    %173 = vector.shape_cast %172 : vector<64xf32> to vector<1x64xf32>
    %174 = vector.broadcast %173 : vector<1x64xf32> to vector<16x64xf32>
    %175 = arith.mulf %170, %174 : vector<16x64xf32>
    %176 = arith.addf %157, %175 : vector<16x64xf32>
    %177 = vector.broadcast %0 : f32 to vector<16x64xf32>
    %178 = arith.mulf %177, %161 : vector<16x64xf32>
    %c0_72 = arith.constant 0 : index
    %c0_73 = arith.constant 0 : index
    %179 = vector.load %arg4[%c0_72, %c0_73] : memref<16x64xf32, #tpu.memory_space<vmem>>, vector<16x64xf32>
    %180 = arith.mulf %162, %179 : vector<16x64xf32>
    %181 = vector.broadcast %1 : f32 to vector<16x64xf32>
    %182 = arith.mulf %181, %180 : vector<16x64xf32>
    %183 = arith.addf %178, %182 : vector<16x64xf32>
    %184 = vector.broadcast %2 : f32 to vector<16x64xf32>
    %185 = arith.mulf %184, %9 : vector<16x64xf32>
    %186 = arith.addf %183, %185 : vector<16x64xf32>
    %c0_74 = arith.constant 0 : index
    %c0_75 = arith.constant 0 : index
    %c0_76 = arith.constant 0 : index
    %187 = vector.load %arg16[%c0_74, %c0_75, %c0_76] : memref<2x16x64xf32, #tpu.memory_space<vmem>>, vector<1x16x64xf32>
    %188 = vector.shape_cast %187 : vector<1x16x64xf32> to vector<16x64xf32>
    %189 = vector.shape_cast %186 : vector<16x64xf32> to vector<1x16x64xf32>
    tpu.vector_store %arg16[%c0_74, %c0_75, %c0_76], %189 {strides = array<i32>} : memref<2x16x64xf32, #tpu.memory_space<vmem>>, vector<1x16x64xf32>,
    %c0_77 = arith.constant 0 : index
    %c0_78 = arith.constant 0 : index
    %190 = vector.load %arg6[%c0_77, %c0_78] : memref<64x64xf32, #tpu.memory_space<vmem>>, vector<64x64xf32>
    %cst_79 = arith.constant dense<0.000000e+00> : vector<16x64xf32>
    %191 = tpu.matmul %169, %190, %cst_79 {dimension_numbers = #tpu.dot_dimension_numbers<[1], [0], [0], [1], [0, 0, 1, 1], [], []>} : vector<16x64xf32>, vector<64x64xf32>, vector<16x64xf32> -> vector<16x64xf32>
    %c0_80 = arith.constant 0 : index
    %c0_81 = arith.constant 0 : index
    %192 = vector.load %arg10[%c0_80, %c0_81] : memref<64x64xf32, #tpu.memory_space<vmem>>, vector<64x64xf32>
    %cst_82 = arith.constant dense<0.000000e+00> : vector<16x64xf32>
    %193 = tpu.matmul %176, %192, %cst_82 {dimension_numbers = #tpu.dot_dimension_numbers<[1], [0], [0], [1], [0, 0, 1, 1], [], []>} : vector<16x64xf32>, vector<64x64xf32>, vector<16x64xf32> -> vector<16x64xf32>
    %c0_83 = arith.constant 0 : index
    %c0_84 = arith.constant 0 : index
    %c0_85 = arith.constant 0 : index
    %194 = vector.load %arg13[%c0_83, %c0_84, %c0_85] : memref<2x16x64xf32, #tpu.memory_space<vmem>>, vector<1x16x64xf32>
    %195 = vector.shape_cast %194 : vector<1x16x64xf32> to vector<16x64xf32>
    %196 = vector.shape_cast %191 : vector<16x64xf32> to vector<1x16x64xf32>
    tpu.vector_store %arg13[%c0_83, %c0_84, %c0_85], %196 {strides = array<i32>} : memref<2x16x64xf32, #tpu.memory_space<vmem>>, vector<1x16x64xf32>,
    %c0_86 = arith.constant 0 : index
    %c0_87 = arith.constant 0 : index
    %c0_88 = arith.constant 0 : index
    %197 = vector.load %arg14[%c0_86, %c0_87, %c0_88] : memref<2x16x64xf32, #tpu.memory_space<vmem>>, vector<1x16x64xf32>
    %198 = vector.shape_cast %197 : vector<1x16x64xf32> to vector<16x64xf32>
    %199 = vector.shape_cast %193 : vector<16x64xf32> to vector<1x16x64xf32>
    tpu.vector_store %arg14[%c0_86, %c0_87, %c0_88], %199 {strides = array<i32>} : memref<2x16x64xf32, #tpu.memory_space<vmem>>, vector<1x16x64xf32>,
    %cst_89 = arith.constant dense<0.000000e+00> : vector<64xf32>
    %200 = vector.multi_reduction <add>, %191, %cst_89 [0] : vector<16x64xf32> to vector<64xf32>
    %201 = vector.shape_cast %200 : vector<64xf32> to vector<1x64xf32>
    %202 = arith.mulf %191, %191 : vector<16x64xf32>
    %cst_90 = arith.constant dense<0.000000e+00> : vector<64xf32>
    %203 = vector.multi_reduction <add>, %202, %cst_90 [0] : vector<16x64xf32> to vector<64xf32>
    %204 = vector.shape_cast %203 : vector<64xf32> to vector<1x64xf32>
    %cst_91 = arith.constant dense<0.000000e+00> : vector<64xf32>
    %205 = vector.multi_reduction <add>, %193, %cst_91 [0] : vector<16x64xf32> to vector<64xf32>
    %206 = vector.shape_cast %205 : vector<64xf32> to vector<1x64xf32>
    %207 = arith.mulf %193, %193 : vector<16x64xf32>
    %cst_92 = arith.constant dense<0.000000e+00> : vector<64xf32>
    %208 = vector.multi_reduction <add>, %207, %cst_92 [0] : vector<16x64xf32> to vector<64xf32>
    %209 = vector.shape_cast %208 : vector<64xf32> to vector<1x64xf32>
    %c1_93 = arith.constant 1 : index
    %c0_94 = arith.constant 0 : index
    %c0_95 = arith.constant 0 : index
    %210 = vector.load %arg2[%c1_93, %c0_94, %c0_95] : memref<2x20x80xf32, #tpu.memory_space<vmem>>, vector<1x20x80xf32>
    %211 = vector.shape_cast %210 : vector<1x20x80xf32> to vector<20x80xf32>
    %cst_96 = arith.constant 0.000000e+00 : f32
    %212 = vector.broadcast %cst_96 : f32 to vector<20x80xf32>
    %213 = arith.maximumf %211, %212 : vector<20x80xf32>
    %214 = vector.extract_strided_slice %211 {offsets = [2, 8], sizes = [16, 64], strides = [1, 1]} : vector<20x80xf32> to vector<16x64xf32>
    %215 = vector.extract_strided_slice %211 {offsets = [1, 4], sizes = [16, 64], strides = [1, 1]} : vector<20x80xf32> to vector<16x64xf32>
    %c1_97 = arith.constant 1 : index
    %c4_98 = arith.constant 4 : index
    %216 = vector.load %arg3[%c1_97, %c4_98] : memref<20x80xf32, #tpu.memory_space<vmem>>, vector<16x64xf32>
    %217 = arith.addf %215, %216 : vector<16x64xf32>
    %218 = vector.extract_strided_slice %213 {offsets = [1, 4], sizes = [16, 64], strides = [1, 1]} : vector<20x80xf32> to vector<16x64xf32>
    %c0_99 = arith.constant 0 : index
    %c0_100 = arith.constant 0 : index
    %c0_101 = arith.constant 0 : index
    %219 = vector.load %arg5[%c0_99, %c0_100, %c0_101] : memref<3x3x64xf32, #tpu.memory_space<vmem>>, vector<1x1x64xf32>
    %220 = vector.shape_cast %219 : vector<1x1x64xf32> to vector<64xf32>
    %221 = vector.shape_cast %220 : vector<64xf32> to vector<1x64xf32>
    %222 = vector.broadcast %221 : vector<1x64xf32> to vector<16x64xf32>
    %223 = arith.mulf %218, %222 : vector<16x64xf32>
    %224 = vector.extract_strided_slice %213 {offsets = [0, 0], sizes = [16, 64], strides = [1, 1]} : vector<20x80xf32> to vector<16x64xf32>
    %c0_102 = arith.constant 0 : index
    %c0_103 = arith.constant 0 : index
    %c0_104 = arith.constant 0 : index
    %225 = vector.load %arg9[%c0_102, %c0_103, %c0_104] : memref<3x3x64xf32, #tpu.memory_space<vmem>>, vector<1x1x64xf32>
    %226 = vector.shape_cast %225 : vector<1x1x64xf32> to vector<64xf32>
    %227 = vector.shape_cast %226 : vector<64xf32> to vector<1x64xf32>
    %228 = vector.broadcast %227 : vector<1x64xf32> to vector<16x64xf32>
    %229 = arith.mulf %224, %228 : vector<16x64xf32>
    %230 = vector.extract_strided_slice %211 {offsets = [1, 8], sizes = [16, 64], strides = [1, 1]} : vector<20x80xf32> to vector<16x64xf32>
    %c1_105 = arith.constant 1 : index
    %c8_106 = arith.constant 8 : index
    %231 = vector.load %arg3[%c1_105, %c8_106] : memref<20x80xf32, #tpu.memory_space<vmem>>, vector<16x64xf32>
    %232 = arith.addf %230, %231 : vector<16x64xf32>
    %233 = arith.maximumf %217, %232 : vector<16x64xf32>
    %234 = arith.addf %215, %230 : vector<16x64xf32>
    %235 = vector.extract_strided_slice %213 {offsets = [1, 8], sizes = [16, 64], strides = [1, 1]} : vector<20x80xf32> to vector<16x64xf32>
    %c0_107 = arith.constant 0 : index
    %c1_108 = arith.constant 1 : index
    %c0_109 = arith.constant 0 : index
    %236 = vector.load %arg5[%c0_107, %c1_108, %c0_109] : memref<3x3x64xf32, #tpu.memory_space<vmem>>, vector<1x1x64xf32>
    %237 = vector.shape_cast %236 : vector<1x1x64xf32> to vector<64xf32>
    %238 = vector.shape_cast %237 : vector<64xf32> to vector<1x64xf32>
    %239 = vector.broadcast %238 : vector<1x64xf32> to vector<16x64xf32>
    %240 = arith.mulf %235, %239 : vector<16x64xf32>
    %241 = arith.addf %223, %240 : vector<16x64xf32>
    %242 = vector.extract_strided_slice %213 {offsets = [0, 8], sizes = [16, 64], strides = [1, 1]} : vector<20x80xf32> to vector<16x64xf32>
    %c0_110 = arith.constant 0 : index
    %c1_111 = arith.constant 1 : index
    %c0_112 = arith.constant 0 : index
    %243 = vector.load %arg9[%c0_110, %c1_111, %c0_112] : memref<3x3x64xf32, #tpu.memory_space<vmem>>, vector<1x1x64xf32>
    %244 = vector.shape_cast %243 : vector<1x1x64xf32> to vector<64xf32>
    %245 = vector.shape_cast %244 : vector<64xf32> to vector<1x64xf32>
    %246 = vector.broadcast %245 : vector<1x64xf32> to vector<16x64xf32>
    %247 = arith.mulf %242, %246 : vector<16x64xf32>
    %248 = arith.addf %229, %247 : vector<16x64xf32>
    %249 = vector.extract_strided_slice %211 {offsets = [1, 12], sizes = [16, 64], strides = [1, 1]} : vector<20x80xf32> to vector<16x64xf32>
    %c1_113 = arith.constant 1 : index
    %c12_114 = arith.constant 12 : index
    %250 = vector.load %arg3[%c1_113, %c12_114] : memref<20x80xf32, #tpu.memory_space<vmem>>, vector<16x64xf32>
    %251 = arith.addf %249, %250 : vector<16x64xf32>
    %252 = arith.maximumf %233, %251 : vector<16x64xf32>
    %253 = arith.addf %234, %249 : vector<16x64xf32>
    %254 = vector.extract_strided_slice %213 {offsets = [1, 12], sizes = [16, 64], strides = [1, 1]} : vector<20x80xf32> to vector<16x64xf32>
    %c0_115 = arith.constant 0 : index
    %c2_116 = arith.constant 2 : index
    %c0_117 = arith.constant 0 : index
    %255 = vector.load %arg5[%c0_115, %c2_116, %c0_117] : memref<3x3x64xf32, #tpu.memory_space<vmem>>, vector<1x1x64xf32>
    %256 = vector.shape_cast %255 : vector<1x1x64xf32> to vector<64xf32>
    %257 = vector.shape_cast %256 : vector<64xf32> to vector<1x64xf32>
    %258 = vector.broadcast %257 : vector<1x64xf32> to vector<16x64xf32>
    %259 = arith.mulf %254, %258 : vector<16x64xf32>
    %260 = arith.addf %241, %259 : vector<16x64xf32>
    %261 = vector.extract_strided_slice %213 {offsets = [0, 16], sizes = [16, 64], strides = [1, 1]} : vector<20x80xf32> to vector<16x64xf32>
    %c0_118 = arith.constant 0 : index
    %c2_119 = arith.constant 2 : index
    %c0_120 = arith.constant 0 : index
    %262 = vector.load %arg9[%c0_118, %c2_119, %c0_120] : memref<3x3x64xf32, #tpu.memory_space<vmem>>, vector<1x1x64xf32>
    %263 = vector.shape_cast %262 : vector<1x1x64xf32> to vector<64xf32>
    %264 = vector.shape_cast %263 : vector<64xf32> to vector<1x64xf32>
    %265 = vector.broadcast %264 : vector<1x64xf32> to vector<16x64xf32>
    %266 = arith.mulf %261, %265 : vector<16x64xf32>
    %267 = arith.addf %248, %266 : vector<16x64xf32>
    %268 = vector.extract_strided_slice %211 {offsets = [2, 4], sizes = [16, 64], strides = [1, 1]} : vector<20x80xf32> to vector<16x64xf32>
    %c2_121 = arith.constant 2 : index
    %c4_122 = arith.constant 4 : index
    %269 = vector.load %arg3[%c2_121, %c4_122] : memref<20x80xf32, #tpu.memory_space<vmem>>, vector<16x64xf32>
    %270 = arith.addf %268, %269 : vector<16x64xf32>
    %271 = arith.maximumf %252, %270 : vector<16x64xf32>
    %272 = arith.addf %253, %268 : vector<16x64xf32>
    %273 = vector.extract_strided_slice %213 {offsets = [2, 4], sizes = [16, 64], strides = [1, 1]} : vector<20x80xf32> to vector<16x64xf32>
    %c1_123 = arith.constant 1 : index
    %c0_124 = arith.constant 0 : index
    %c0_125 = arith.constant 0 : index
    %274 = vector.load %arg5[%c1_123, %c0_124, %c0_125] : memref<3x3x64xf32, #tpu.memory_space<vmem>>, vector<1x1x64xf32>
    %275 = vector.shape_cast %274 : vector<1x1x64xf32> to vector<64xf32>
    %276 = vector.shape_cast %275 : vector<64xf32> to vector<1x64xf32>
    %277 = vector.broadcast %276 : vector<1x64xf32> to vector<16x64xf32>
    %278 = arith.mulf %273, %277 : vector<16x64xf32>
    %279 = arith.addf %260, %278 : vector<16x64xf32>
    %280 = vector.extract_strided_slice %213 {offsets = [2, 0], sizes = [16, 64], strides = [1, 1]} : vector<20x80xf32> to vector<16x64xf32>
    %c1_126 = arith.constant 1 : index
    %c0_127 = arith.constant 0 : index
    %c0_128 = arith.constant 0 : index
    %281 = vector.load %arg9[%c1_126, %c0_127, %c0_128] : memref<3x3x64xf32, #tpu.memory_space<vmem>>, vector<1x1x64xf32>
    %282 = vector.shape_cast %281 : vector<1x1x64xf32> to vector<64xf32>
    %283 = vector.shape_cast %282 : vector<64xf32> to vector<1x64xf32>
    %284 = vector.broadcast %283 : vector<1x64xf32> to vector<16x64xf32>
    %285 = arith.mulf %280, %284 : vector<16x64xf32>
    %286 = arith.addf %267, %285 : vector<16x64xf32>
    %287 = vector.extract_strided_slice %211 {offsets = [2, 8], sizes = [16, 64], strides = [1, 1]} : vector<20x80xf32> to vector<16x64xf32>
    %c2_129 = arith.constant 2 : index
    %c8_130 = arith.constant 8 : index
    %288 = vector.load %arg3[%c2_129, %c8_130] : memref<20x80xf32, #tpu.memory_space<vmem>>, vector<16x64xf32>
    %289 = arith.addf %287, %288 : vector<16x64xf32>
    %290 = arith.maximumf %271, %289 : vector<16x64xf32>
    %291 = arith.addf %272, %287 : vector<16x64xf32>
    %292 = vector.extract_strided_slice %213 {offsets = [2, 8], sizes = [16, 64], strides = [1, 1]} : vector<20x80xf32> to vector<16x64xf32>
    %c1_131 = arith.constant 1 : index
    %c1_132 = arith.constant 1 : index
    %c0_133 = arith.constant 0 : index
    %293 = vector.load %arg5[%c1_131, %c1_132, %c0_133] : memref<3x3x64xf32, #tpu.memory_space<vmem>>, vector<1x1x64xf32>
    %294 = vector.shape_cast %293 : vector<1x1x64xf32> to vector<64xf32>
    %295 = vector.shape_cast %294 : vector<64xf32> to vector<1x64xf32>
    %296 = vector.broadcast %295 : vector<1x64xf32> to vector<16x64xf32>
    %297 = arith.mulf %292, %296 : vector<16x64xf32>
    %298 = arith.addf %279, %297 : vector<16x64xf32>
    %299 = vector.extract_strided_slice %213 {offsets = [2, 8], sizes = [16, 64], strides = [1, 1]} : vector<20x80xf32> to vector<16x64xf32>
    %c1_134 = arith.constant 1 : index
    %c1_135 = arith.constant 1 : index
    %c0_136 = arith.constant 0 : index
    %300 = vector.load %arg9[%c1_134, %c1_135, %c0_136] : memref<3x3x64xf32, #tpu.memory_space<vmem>>, vector<1x1x64xf32>
    %301 = vector.shape_cast %300 : vector<1x1x64xf32> to vector<64xf32>
    %302 = vector.shape_cast %301 : vector<64xf32> to vector<1x64xf32>
    %303 = vector.broadcast %302 : vector<1x64xf32> to vector<16x64xf32>
    %304 = arith.mulf %299, %303 : vector<16x64xf32>
    %305 = arith.addf %286, %304 : vector<16x64xf32>
    %306 = vector.extract_strided_slice %211 {offsets = [2, 12], sizes = [16, 64], strides = [1, 1]} : vector<20x80xf32> to vector<16x64xf32>
    %c2_137 = arith.constant 2 : index
    %c12_138 = arith.constant 12 : index
    %307 = vector.load %arg3[%c2_137, %c12_138] : memref<20x80xf32, #tpu.memory_space<vmem>>, vector<16x64xf32>
    %308 = arith.addf %306, %307 : vector<16x64xf32>
    %309 = arith.maximumf %290, %308 : vector<16x64xf32>
    %310 = arith.addf %291, %306 : vector<16x64xf32>
    %311 = vector.extract_strided_slice %213 {offsets = [2, 12], sizes = [16, 64], strides = [1, 1]} : vector<20x80xf32> to vector<16x64xf32>
    %c1_139 = arith.constant 1 : index
    %c2_140 = arith.constant 2 : index
    %c0_141 = arith.constant 0 : index
    %312 = vector.load %arg5[%c1_139, %c2_140, %c0_141] : memref<3x3x64xf32, #tpu.memory_space<vmem>>, vector<1x1x64xf32>
    %313 = vector.shape_cast %312 : vector<1x1x64xf32> to vector<64xf32>
    %314 = vector.shape_cast %313 : vector<64xf32> to vector<1x64xf32>
    %315 = vector.broadcast %314 : vector<1x64xf32> to vector<16x64xf32>
    %316 = arith.mulf %311, %315 : vector<16x64xf32>
    %317 = arith.addf %298, %316 : vector<16x64xf32>
    %318 = vector.extract_strided_slice %213 {offsets = [2, 16], sizes = [16, 64], strides = [1, 1]} : vector<20x80xf32> to vector<16x64xf32>
    %c1_142 = arith.constant 1 : index
    %c2_143 = arith.constant 2 : index
    %c0_144 = arith.constant 0 : index
    %319 = vector.load %arg9[%c1_142, %c2_143, %c0_144] : memref<3x3x64xf32, #tpu.memory_space<vmem>>, vector<1x1x64xf32>
    %320 = vector.shape_cast %319 : vector<1x1x64xf32> to vector<64xf32>
    %321 = vector.shape_cast %320 : vector<64xf32> to vector<1x64xf32>
    %322 = vector.broadcast %321 : vector<1x64xf32> to vector<16x64xf32>
    %323 = arith.mulf %318, %322 : vector<16x64xf32>
    %324 = arith.addf %305, %323 : vector<16x64xf32>
    %325 = vector.extract_strided_slice %211 {offsets = [3, 4], sizes = [16, 64], strides = [1, 1]} : vector<20x80xf32> to vector<16x64xf32>
    %c3_145 = arith.constant 3 : index
    %c4_146 = arith.constant 4 : index
    %326 = vector.load %arg3[%c3_145, %c4_146] : memref<20x80xf32, #tpu.memory_space<vmem>>, vector<16x64xf32>
    %327 = arith.addf %325, %326 : vector<16x64xf32>
    %328 = arith.maximumf %309, %327 : vector<16x64xf32>
    %329 = arith.addf %310, %325 : vector<16x64xf32>
    %330 = vector.extract_strided_slice %213 {offsets = [3, 4], sizes = [16, 64], strides = [1, 1]} : vector<20x80xf32> to vector<16x64xf32>
    %c2_147 = arith.constant 2 : index
    %c0_148 = arith.constant 0 : index
    %c0_149 = arith.constant 0 : index
    %331 = vector.load %arg5[%c2_147, %c0_148, %c0_149] : memref<3x3x64xf32, #tpu.memory_space<vmem>>, vector<1x1x64xf32>
    %332 = vector.shape_cast %331 : vector<1x1x64xf32> to vector<64xf32>
    %333 = vector.shape_cast %332 : vector<64xf32> to vector<1x64xf32>
    %334 = vector.broadcast %333 : vector<1x64xf32> to vector<16x64xf32>
    %335 = arith.mulf %330, %334 : vector<16x64xf32>
    %336 = arith.addf %317, %335 : vector<16x64xf32>
    %337 = vector.extract_strided_slice %213 {offsets = [4, 0], sizes = [16, 64], strides = [1, 1]} : vector<20x80xf32> to vector<16x64xf32>
    %c2_150 = arith.constant 2 : index
    %c0_151 = arith.constant 0 : index
    %c0_152 = arith.constant 0 : index
    %338 = vector.load %arg9[%c2_150, %c0_151, %c0_152] : memref<3x3x64xf32, #tpu.memory_space<vmem>>, vector<1x1x64xf32>
    %339 = vector.shape_cast %338 : vector<1x1x64xf32> to vector<64xf32>
    %340 = vector.shape_cast %339 : vector<64xf32> to vector<1x64xf32>
    %341 = vector.broadcast %340 : vector<1x64xf32> to vector<16x64xf32>
    %342 = arith.mulf %337, %341 : vector<16x64xf32>
    %343 = arith.addf %324, %342 : vector<16x64xf32>
    %344 = vector.extract_strided_slice %211 {offsets = [3, 8], sizes = [16, 64], strides = [1, 1]} : vector<20x80xf32> to vector<16x64xf32>
    %c3_153 = arith.constant 3 : index
    %c8_154 = arith.constant 8 : index
    %345 = vector.load %arg3[%c3_153, %c8_154] : memref<20x80xf32, #tpu.memory_space<vmem>>, vector<16x64xf32>
    %346 = arith.addf %344, %345 : vector<16x64xf32>
    %347 = arith.maximumf %328, %346 : vector<16x64xf32>
    %348 = arith.addf %329, %344 : vector<16x64xf32>
    %349 = vector.extract_strided_slice %213 {offsets = [3, 8], sizes = [16, 64], strides = [1, 1]} : vector<20x80xf32> to vector<16x64xf32>
    %c2_155 = arith.constant 2 : index
    %c1_156 = arith.constant 1 : index
    %c0_157 = arith.constant 0 : index
    %350 = vector.load %arg5[%c2_155, %c1_156, %c0_157] : memref<3x3x64xf32, #tpu.memory_space<vmem>>, vector<1x1x64xf32>
    %351 = vector.shape_cast %350 : vector<1x1x64xf32> to vector<64xf32>
    %352 = vector.shape_cast %351 : vector<64xf32> to vector<1x64xf32>
    %353 = vector.broadcast %352 : vector<1x64xf32> to vector<16x64xf32>
    %354 = arith.mulf %349, %353 : vector<16x64xf32>
    %355 = arith.addf %336, %354 : vector<16x64xf32>
    %356 = vector.extract_strided_slice %213 {offsets = [4, 8], sizes = [16, 64], strides = [1, 1]} : vector<20x80xf32> to vector<16x64xf32>
    %c2_158 = arith.constant 2 : index
    %c1_159 = arith.constant 1 : index
    %c0_160 = arith.constant 0 : index
    %357 = vector.load %arg9[%c2_158, %c1_159, %c0_160] : memref<3x3x64xf32, #tpu.memory_space<vmem>>, vector<1x1x64xf32>
    %358 = vector.shape_cast %357 : vector<1x1x64xf32> to vector<64xf32>
    %359 = vector.shape_cast %358 : vector<64xf32> to vector<1x64xf32>
    %360 = vector.broadcast %359 : vector<1x64xf32> to vector<16x64xf32>
    %361 = arith.mulf %356, %360 : vector<16x64xf32>
    %362 = arith.addf %343, %361 : vector<16x64xf32>
    %363 = vector.extract_strided_slice %211 {offsets = [3, 12], sizes = [16, 64], strides = [1, 1]} : vector<20x80xf32> to vector<16x64xf32>
    %c3_161 = arith.constant 3 : index
    %c12_162 = arith.constant 12 : index
    %364 = vector.load %arg3[%c3_161, %c12_162] : memref<20x80xf32, #tpu.memory_space<vmem>>, vector<16x64xf32>
    %365 = arith.addf %363, %364 : vector<16x64xf32>
    %366 = arith.maximumf %347, %365 : vector<16x64xf32>
    %367 = arith.addf %348, %363 : vector<16x64xf32>
    %368 = vector.extract_strided_slice %213 {offsets = [3, 12], sizes = [16, 64], strides = [1, 1]} : vector<20x80xf32> to vector<16x64xf32>
    %c2_163 = arith.constant 2 : index
    %c2_164 = arith.constant 2 : index
    %c0_165 = arith.constant 0 : index
    %369 = vector.load %arg5[%c2_163, %c2_164, %c0_165] : memref<3x3x64xf32, #tpu.memory_space<vmem>>, vector<1x1x64xf32>
    %370 = vector.shape_cast %369 : vector<1x1x64xf32> to vector<64xf32>
    %371 = vector.shape_cast %370 : vector<64xf32> to vector<1x64xf32>
    %372 = vector.broadcast %371 : vector<1x64xf32> to vector<16x64xf32>
    %373 = arith.mulf %368, %372 : vector<16x64xf32>
    %374 = arith.addf %355, %373 : vector<16x64xf32>
    %375 = vector.extract_strided_slice %213 {offsets = [4, 16], sizes = [16, 64], strides = [1, 1]} : vector<20x80xf32> to vector<16x64xf32>
    %c2_166 = arith.constant 2 : index
    %c2_167 = arith.constant 2 : index
    %c0_168 = arith.constant 0 : index
    %376 = vector.load %arg9[%c2_166, %c2_167, %c0_168] : memref<3x3x64xf32, #tpu.memory_space<vmem>>, vector<1x1x64xf32>
    %377 = vector.shape_cast %376 : vector<1x1x64xf32> to vector<64xf32>
    %378 = vector.shape_cast %377 : vector<64xf32> to vector<1x64xf32>
    %379 = vector.broadcast %378 : vector<1x64xf32> to vector<16x64xf32>
    %380 = arith.mulf %375, %379 : vector<16x64xf32>
    %381 = arith.addf %362, %380 : vector<16x64xf32>
    %382 = vector.broadcast %0 : f32 to vector<16x64xf32>
    %383 = arith.mulf %382, %366 : vector<16x64xf32>
    %c0_169 = arith.constant 0 : index
    %c0_170 = arith.constant 0 : index
    %384 = vector.load %arg4[%c0_169, %c0_170] : memref<16x64xf32, #tpu.memory_space<vmem>>, vector<16x64xf32>
    %385 = arith.mulf %367, %384 : vector<16x64xf32>
    %386 = vector.broadcast %1 : f32 to vector<16x64xf32>
    %387 = arith.mulf %386, %385 : vector<16x64xf32>
    %388 = arith.addf %383, %387 : vector<16x64xf32>
    %389 = vector.broadcast %2 : f32 to vector<16x64xf32>
    %390 = arith.mulf %389, %214 : vector<16x64xf32>
    %391 = arith.addf %388, %390 : vector<16x64xf32>
    %c1_171 = arith.constant 1 : index
    %c0_172 = arith.constant 0 : index
    %c0_173 = arith.constant 0 : index
    %392 = vector.load %arg16[%c1_171, %c0_172, %c0_173] : memref<2x16x64xf32, #tpu.memory_space<vmem>>, vector<1x16x64xf32>
    %393 = vector.shape_cast %392 : vector<1x16x64xf32> to vector<16x64xf32>
    %394 = vector.shape_cast %391 : vector<16x64xf32> to vector<1x16x64xf32>
    tpu.vector_store %arg16[%c1_171, %c0_172, %c0_173], %394 {strides = array<i32>} : memref<2x16x64xf32, #tpu.memory_space<vmem>>, vector<1x16x64xf32>,
    %c0_174 = arith.constant 0 : index
    %c0_175 = arith.constant 0 : index
    %395 = vector.load %arg6[%c0_174, %c0_175] : memref<64x64xf32, #tpu.memory_space<vmem>>, vector<64x64xf32>
    %cst_176 = arith.constant dense<0.000000e+00> : vector<16x64xf32>
    %396 = tpu.matmul %374, %395, %cst_176 {dimension_numbers = #tpu.dot_dimension_numbers<[1], [0], [0], [1], [0, 0, 1, 1], [], []>} : vector<16x64xf32>, vector<64x64xf32>, vector<16x64xf32> -> vector<16x64xf32>
    %c0_177 = arith.constant 0 : index
    %c0_178 = arith.constant 0 : index
    %397 = vector.load %arg10[%c0_177, %c0_178] : memref<64x64xf32, #tpu.memory_space<vmem>>, vector<64x64xf32>
    %cst_179 = arith.constant dense<0.000000e+00> : vector<16x64xf32>
    %398 = tpu.matmul %381, %397, %cst_179 {dimension_numbers = #tpu.dot_dimension_numbers<[1], [0], [0], [1], [0, 0, 1, 1], [], []>} : vector<16x64xf32>, vector<64x64xf32>, vector<16x64xf32> -> vector<16x64xf32>
    %c1_180 = arith.constant 1 : index
    %c0_181 = arith.constant 0 : index
    %c0_182 = arith.constant 0 : index
    %399 = vector.load %arg13[%c1_180, %c0_181, %c0_182] : memref<2x16x64xf32, #tpu.memory_space<vmem>>, vector<1x16x64xf32>
    %400 = vector.shape_cast %399 : vector<1x16x64xf32> to vector<16x64xf32>
    %401 = vector.shape_cast %396 : vector<16x64xf32> to vector<1x16x64xf32>
    tpu.vector_store %arg13[%c1_180, %c0_181, %c0_182], %401 {strides = array<i32>} : memref<2x16x64xf32, #tpu.memory_space<vmem>>, vector<1x16x64xf32>,
    %c1_183 = arith.constant 1 : index
    %c0_184 = arith.constant 0 : index
    %c0_185 = arith.constant 0 : index
    %402 = vector.load %arg14[%c1_183, %c0_184, %c0_185] : memref<2x16x64xf32, #tpu.memory_space<vmem>>, vector<1x16x64xf32>
    %403 = vector.shape_cast %402 : vector<1x16x64xf32> to vector<16x64xf32>
    %404 = vector.shape_cast %398 : vector<16x64xf32> to vector<1x16x64xf32>
    tpu.vector_store %arg14[%c1_183, %c0_184, %c0_185], %404 {strides = array<i32>} : memref<2x16x64xf32, #tpu.memory_space<vmem>>, vector<1x16x64xf32>,
    %cst_186 = arith.constant dense<0.000000e+00> : vector<64xf32>
    %405 = vector.multi_reduction <add>, %396, %cst_186 [0] : vector<16x64xf32> to vector<64xf32>
    %406 = vector.shape_cast %405 : vector<64xf32> to vector<1x64xf32>
    %407 = arith.mulf %396, %396 : vector<16x64xf32>
    %cst_187 = arith.constant dense<0.000000e+00> : vector<64xf32>
    %408 = vector.multi_reduction <add>, %407, %cst_187 [0] : vector<16x64xf32> to vector<64xf32>
    %409 = vector.shape_cast %408 : vector<64xf32> to vector<1x64xf32>
    %cst_188 = arith.constant dense<0.000000e+00> : vector<64xf32>
    %410 = vector.multi_reduction <add>, %398, %cst_188 [0] : vector<16x64xf32> to vector<64xf32>
    %411 = vector.shape_cast %410 : vector<64xf32> to vector<1x64xf32>
    %412 = arith.mulf %398, %398 : vector<16x64xf32>
    %cst_189 = arith.constant dense<0.000000e+00> : vector<64xf32>
    %413 = vector.multi_reduction <add>, %412, %cst_189 [0] : vector<16x64xf32> to vector<64xf32>
    %414 = vector.shape_cast %413 : vector<64xf32> to vector<1x64xf32>
    %415 = arith.addf %201, %406 : vector<1x64xf32>
    %416 = arith.addf %204, %409 : vector<1x64xf32>
    %417 = arith.addf %206, %411 : vector<1x64xf32>
    %418 = arith.addf %209, %414 : vector<1x64xf32>
    %419 = tpu.concatenate %415, %416, %417, %418 in 0 : vector<1x64xf32>, vector<1x64xf32>, vector<1x64xf32>, vector<1x64xf32> -> vector<4x64xf32>
    %c0_190 = arith.constant 0 : index
    %c0_191 = arith.constant 0 : index
    %420 = vector.load %arg11[%c0_190, %c0_191] : memref<64x64xf32, #tpu.memory_space<vmem>>, vector<64x64xf32>
    %cst_192 = arith.constant dense<0.000000e+00> : vector<4x64xf32>
    %421 = tpu.matmul %419, %420, %cst_192 {dimension_numbers = #tpu.dot_dimension_numbers<[1], [0], [0], [1], [0, 0, 1, 1], [], []>} : vector<4x64xf32>, vector<64x64xf32>, vector<4x64xf32> -> vector<4x64xf32>
    %cst_193 = arith.constant 0.001953125 : f32
    %422 = vector.broadcast %cst_193 : f32 to vector<4x64xf32>
    %423 = arith.mulf %421, %422 : vector<4x64xf32>
    %424 = vector.extract_strided_slice %423 {offsets = [0, 0], sizes = [1, 64], strides = [1, 1]} : vector<4x64xf32> to vector<1x64xf32>
    %425 = vector.extract_strided_slice %423 {offsets = [1, 0], sizes = [1, 64], strides = [1, 1]} : vector<4x64xf32> to vector<1x64xf32>
    %426 = vector.extract_strided_slice %423 {offsets = [2, 0], sizes = [1, 64], strides = [1, 1]} : vector<4x64xf32> to vector<1x64xf32>
    %427 = vector.extract_strided_slice %423 {offsets = [3, 0], sizes = [1, 64], strides = [1, 1]} : vector<4x64xf32> to vector<1x64xf32>
    %428 = arith.mulf %424, %424 : vector<1x64xf32>
    %429 = arith.subf %425, %428 : vector<1x64xf32>
    %cst_194 = arith.constant 0.000000e+00 : f32
    %430 = vector.broadcast %cst_194 : f32 to vector<1x64xf32>
    %431 = arith.maximumf %429, %430 : vector<1x64xf32>
    %cst_195 = arith.constant 9.99999974E-6 : f32
    %432 = vector.broadcast %cst_195 : f32 to vector<1x64xf32>
    %433 = arith.addf %431, %432 : vector<1x64xf32>
    %434 = math.rsqrt %433 : vector<1x64xf32>
    %435 = arith.mulf %426, %426 : vector<1x64xf32>
    %436 = arith.subf %427, %435 : vector<1x64xf32>
    %cst_196 = arith.constant 0.000000e+00 : f32
    %437 = vector.broadcast %cst_196 : f32 to vector<1x64xf32>
    %438 = arith.maximumf %436, %437 : vector<1x64xf32>
    %cst_197 = arith.constant 9.99999974E-6 : f32
    %439 = vector.broadcast %cst_197 : f32 to vector<1x64xf32>
    %440 = arith.addf %438, %439 : vector<1x64xf32>
    %441 = math.rsqrt %440 : vector<1x64xf32>
    %cst_198 = arith.constant 0.000000e+00 : f32
    %442 = vector.broadcast %cst_198 : f32 to vector<18x72xf32>
    %c0_199 = arith.constant 0 : index
    %c0_200 = arith.constant 0 : index
    %443 = vector.load %arg17[%c0_199, %c0_200] : memref<18x72xf32, #tpu.memory_space<vmem>>, vector<18x72xf32>
    tpu.vector_store %arg17[%c0_199, %c0_200], %442 {strides = array<i32>} : memref<18x72xf32, #tpu.memory_space<vmem>>, vector<18x72xf32>,
    %c0_201 = arith.constant 0 : index
    %c0_202 = arith.constant 0 : index
    %c0_203 = arith.constant 0 : index
    %444 = vector.load %arg13[%c0_201, %c0_202, %c0_203] : memref<2x16x64xf32, #tpu.memory_space<vmem>>, vector<1x16x64xf32>
    %445 = vector.shape_cast %444 : vector<1x16x64xf32> to vector<16x64xf32>
    %446 = vector.broadcast %424 : vector<1x64xf32> to vector<16x64xf32>
    %447 = arith.subf %445, %446 : vector<16x64xf32>
    %448 = vector.broadcast %434 : vector<1x64xf32> to vector<16x64xf32>
    %449 = arith.mulf %447, %448 : vector<16x64xf32>
    %cst_204 = arith.constant 0.000000e+00 : f32
    %450 = vector.broadcast %cst_204 : f32 to vector<16x64xf32>
    %451 = arith.maximumf %449, %450 : vector<16x64xf32>
    %c1_205 = arith.constant 1 : index
    %c4_206 = arith.constant 4 : index
    %452 = vector.load %arg17[%c1_205, %c4_206] : memref<18x72xf32, #tpu.memory_space<vmem>>, vector<16x64xf32>
    tpu.vector_store %arg17[%c1_205, %c4_206], %451 {strides = array<i32>} : memref<18x72xf32, #tpu.memory_space<vmem>>, vector<16x64xf32>,
    %c0_207 = arith.constant 0 : index
    %c0_208 = arith.constant 0 : index
    %453 = vector.load %arg17[%c0_207, %c0_208] : memref<18x72xf32, #tpu.memory_space<vmem>>, vector<16x64xf32>
    %c0_209 = arith.constant 0 : index
    %c0_210 = arith.constant 0 : index
    %c0_211 = arith.constant 0 : index
    %454 = vector.load %arg7[%c0_209, %c0_210, %c0_211] : memref<3x3x64xf32, #tpu.memory_space<vmem>>, vector<1x1x64xf32>
    %455 = vector.shape_cast %454 : vector<1x1x64xf32> to vector<64xf32>
    %456 = vector.shape_cast %455 : vector<64xf32> to vector<1x64xf32>
    %457 = vector.broadcast %456 : vector<1x64xf32> to vector<16x64xf32>
    %458 = arith.mulf %453, %457 : vector<16x64xf32>
    %c0_212 = arith.constant 0 : index
    %c4_213 = arith.constant 4 : index
    %459 = vector.load %arg17[%c0_212, %c4_213] : memref<18x72xf32, #tpu.memory_space<vmem>>, vector<16x64xf32>
    %c0_214 = arith.constant 0 : index
    %c1_215 = arith.constant 1 : index
    %c0_216 = arith.constant 0 : index
    %460 = vector.load %arg7[%c0_214, %c1_215, %c0_216] : memref<3x3x64xf32, #tpu.memory_space<vmem>>, vector<1x1x64xf32>
    %461 = vector.shape_cast %460 : vector<1x1x64xf32> to vector<64xf32>
    %462 = vector.shape_cast %461 : vector<64xf32> to vector<1x64xf32>
    %463 = vector.broadcast %462 : vector<1x64xf32> to vector<16x64xf32>
    %464 = arith.mulf %459, %463 : vector<16x64xf32>
    %465 = arith.addf %458, %464 : vector<16x64xf32>
    %c0_217 = arith.constant 0 : index
    %c8_218 = arith.constant 8 : index
    %466 = vector.load %arg17[%c0_217, %c8_218] : memref<18x72xf32, #tpu.memory_space<vmem>>, vector<16x64xf32>
    %c0_219 = arith.constant 0 : index
    %c2_220 = arith.constant 2 : index
    %c0_221 = arith.constant 0 : index
    %467 = vector.load %arg7[%c0_219, %c2_220, %c0_221] : memref<3x3x64xf32, #tpu.memory_space<vmem>>, vector<1x1x64xf32>
    %468 = vector.shape_cast %467 : vector<1x1x64xf32> to vector<64xf32>
    %469 = vector.shape_cast %468 : vector<64xf32> to vector<1x64xf32>
    %470 = vector.broadcast %469 : vector<1x64xf32> to vector<16x64xf32>
    %471 = arith.mulf %466, %470 : vector<16x64xf32>
    %472 = arith.addf %465, %471 : vector<16x64xf32>
    %c1_222 = arith.constant 1 : index
    %c0_223 = arith.constant 0 : index
    %473 = vector.load %arg17[%c1_222, %c0_223] : memref<18x72xf32, #tpu.memory_space<vmem>>, vector<16x64xf32>
    %c1_224 = arith.constant 1 : index
    %c0_225 = arith.constant 0 : index
    %c0_226 = arith.constant 0 : index
    %474 = vector.load %arg7[%c1_224, %c0_225, %c0_226] : memref<3x3x64xf32, #tpu.memory_space<vmem>>, vector<1x1x64xf32>
    %475 = vector.shape_cast %474 : vector<1x1x64xf32> to vector<64xf32>
    %476 = vector.shape_cast %475 : vector<64xf32> to vector<1x64xf32>
    %477 = vector.broadcast %476 : vector<1x64xf32> to vector<16x64xf32>
    %478 = arith.mulf %473, %477 : vector<16x64xf32>
    %479 = arith.addf %472, %478 : vector<16x64xf32>
    %c1_227 = arith.constant 1 : index
    %c4_228 = arith.constant 4 : index
    %480 = vector.load %arg17[%c1_227, %c4_228] : memref<18x72xf32, #tpu.memory_space<vmem>>, vector<16x64xf32>
    %c1_229 = arith.constant 1 : index
    %c1_230 = arith.constant 1 : index
    %c0_231 = arith.constant 0 : index
    %481 = vector.load %arg7[%c1_229, %c1_230, %c0_231] : memref<3x3x64xf32, #tpu.memory_space<vmem>>, vector<1x1x64xf32>
    %482 = vector.shape_cast %481 : vector<1x1x64xf32> to vector<64xf32>
    %483 = vector.shape_cast %482 : vector<64xf32> to vector<1x64xf32>
    %484 = vector.broadcast %483 : vector<1x64xf32> to vector<16x64xf32>
    %485 = arith.mulf %480, %484 : vector<16x64xf32>
    %486 = arith.addf %479, %485 : vector<16x64xf32>
    %c1_232 = arith.constant 1 : index
    %c8_233 = arith.constant 8 : index
    %487 = vector.load %arg17[%c1_232, %c8_233] : memref<18x72xf32, #tpu.memory_space<vmem>>, vector<16x64xf32>
    %c1_234 = arith.constant 1 : index
    %c2_235 = arith.constant 2 : index
    %c0_236 = arith.constant 0 : index
    %488 = vector.load %arg7[%c1_234, %c2_235, %c0_236] : memref<3x3x64xf32, #tpu.memory_space<vmem>>, vector<1x1x64xf32>
    %489 = vector.shape_cast %488 : vector<1x1x64xf32> to vector<64xf32>
    %490 = vector.shape_cast %489 : vector<64xf32> to vector<1x64xf32>
    %491 = vector.broadcast %490 : vector<1x64xf32> to vector<16x64xf32>
    %492 = arith.mulf %487, %491 : vector<16x64xf32>
    %493 = arith.addf %486, %492 : vector<16x64xf32>
    %c2_237 = arith.constant 2 : index
    %c0_238 = arith.constant 0 : index
    %494 = vector.load %arg17[%c2_237, %c0_238] : memref<18x72xf32, #tpu.memory_space<vmem>>, vector<16x64xf32>
    %c2_239 = arith.constant 2 : index
    %c0_240 = arith.constant 0 : index
    %c0_241 = arith.constant 0 : index
    %495 = vector.load %arg7[%c2_239, %c0_240, %c0_241] : memref<3x3x64xf32, #tpu.memory_space<vmem>>, vector<1x1x64xf32>
    %496 = vector.shape_cast %495 : vector<1x1x64xf32> to vector<64xf32>
    %497 = vector.shape_cast %496 : vector<64xf32> to vector<1x64xf32>
    %498 = vector.broadcast %497 : vector<1x64xf32> to vector<16x64xf32>
    %499 = arith.mulf %494, %498 : vector<16x64xf32>
    %500 = arith.addf %493, %499 : vector<16x64xf32>
    %c2_242 = arith.constant 2 : index
    %c4_243 = arith.constant 4 : index
    %501 = vector.load %arg17[%c2_242, %c4_243] : memref<18x72xf32, #tpu.memory_space<vmem>>, vector<16x64xf32>
    %c2_244 = arith.constant 2 : index
    %c1_245 = arith.constant 1 : index
    %c0_246 = arith.constant 0 : index
    %502 = vector.load %arg7[%c2_244, %c1_245, %c0_246] : memref<3x3x64xf32, #tpu.memory_space<vmem>>, vector<1x1x64xf32>
    %503 = vector.shape_cast %502 : vector<1x1x64xf32> to vector<64xf32>
    %504 = vector.shape_cast %503 : vector<64xf32> to vector<1x64xf32>
    %505 = vector.broadcast %504 : vector<1x64xf32> to vector<16x64xf32>
    %506 = arith.mulf %501, %505 : vector<16x64xf32>
    %507 = arith.addf %500, %506 : vector<16x64xf32>
    %c2_247 = arith.constant 2 : index
    %c8_248 = arith.constant 8 : index
    %508 = vector.load %arg17[%c2_247, %c8_248] : memref<18x72xf32, #tpu.memory_space<vmem>>, vector<16x64xf32>
    %c2_249 = arith.constant 2 : index
    %c2_250 = arith.constant 2 : index
    %c0_251 = arith.constant 0 : index
    %509 = vector.load %arg7[%c2_249, %c2_250, %c0_251] : memref<3x3x64xf32, #tpu.memory_space<vmem>>, vector<1x1x64xf32>
    %510 = vector.shape_cast %509 : vector<1x1x64xf32> to vector<64xf32>
    %511 = vector.shape_cast %510 : vector<64xf32> to vector<1x64xf32>
    %512 = vector.broadcast %511 : vector<1x64xf32> to vector<16x64xf32>
    %513 = arith.mulf %508, %512 : vector<16x64xf32>
    %514 = arith.addf %507, %513 : vector<16x64xf32>
    %c0_252 = arith.constant 0 : index
    %c0_253 = arith.constant 0 : index
    %515 = vector.load %arg8[%c0_252, %c0_253] : memref<64x64xf32, #tpu.memory_space<vmem>>, vector<64x64xf32>
    %cst_254 = arith.constant dense<0.000000e+00> : vector<16x64xf32>
    %516 = tpu.matmul %514, %515, %cst_254 {dimension_numbers = #tpu.dot_dimension_numbers<[1], [0], [0], [1], [0, 0, 1, 1], [], []>} : vector<16x64xf32>, vector<64x64xf32>, vector<16x64xf32> -> vector<16x64xf32>
    %c0_255 = arith.constant 0 : index
    %c0_256 = arith.constant 0 : index
    %c0_257 = arith.constant 0 : index
    %517 = vector.load %arg15[%c0_255, %c0_256, %c0_257] : memref<2x16x64xf32, #tpu.memory_space<vmem>>, vector<1x16x64xf32>
    %518 = vector.shape_cast %517 : vector<1x16x64xf32> to vector<16x64xf32>
    %519 = vector.shape_cast %516 : vector<16x64xf32> to vector<1x16x64xf32>
    tpu.vector_store %arg15[%c0_255, %c0_256, %c0_257], %519 {strides = array<i32>} : memref<2x16x64xf32, #tpu.memory_space<vmem>>, vector<1x16x64xf32>,
    %cst_258 = arith.constant dense<0.000000e+00> : vector<64xf32>
    %520 = vector.multi_reduction <add>, %516, %cst_258 [0] : vector<16x64xf32> to vector<64xf32>
    %521 = vector.shape_cast %520 : vector<64xf32> to vector<1x64xf32>
    %522 = arith.mulf %516, %516 : vector<16x64xf32>
    %cst_259 = arith.constant dense<0.000000e+00> : vector<64xf32>
    %523 = vector.multi_reduction <add>, %522, %cst_259 [0] : vector<16x64xf32> to vector<64xf32>
    %524 = vector.shape_cast %523 : vector<64xf32> to vector<1x64xf32>
    %c1_260 = arith.constant 1 : index
    %c0_261 = arith.constant 0 : index
    %c0_262 = arith.constant 0 : index
    %525 = vector.load %arg13[%c1_260, %c0_261, %c0_262] : memref<2x16x64xf32, #tpu.memory_space<vmem>>, vector<1x16x64xf32>
    %526 = vector.shape_cast %525 : vector<1x16x64xf32> to vector<16x64xf32>
    %527 = vector.broadcast %424 : vector<1x64xf32> to vector<16x64xf32>
    %528 = arith.subf %526, %527 : vector<16x64xf32>
    %529 = vector.broadcast %434 : vector<1x64xf32> to vector<16x64xf32>
    %530 = arith.mulf %528, %529 : vector<16x64xf32>
    %cst_263 = arith.constant 0.000000e+00 : f32
    %531 = vector.broadcast %cst_263 : f32 to vector<16x64xf32>
    %532 = arith.maximumf %530, %531 : vector<16x64xf32>
    %c1_264 = arith.constant 1 : index
    %c4_265 = arith.constant 4 : index
    %533 = vector.load %arg17[%c1_264, %c4_265] : memref<18x72xf32, #tpu.memory_space<vmem>>, vector<16x64xf32>
    tpu.vector_store %arg17[%c1_264, %c4_265], %532 {strides = array<i32>} : memref<18x72xf32, #tpu.memory_space<vmem>>, vector<16x64xf32>,
    %c0_266 = arith.constant 0 : index
    %c0_267 = arith.constant 0 : index
    %534 = vector.load %arg17[%c0_266, %c0_267] : memref<18x72xf32, #tpu.memory_space<vmem>>, vector<16x64xf32>
    %c0_268 = arith.constant 0 : index
    %c0_269 = arith.constant 0 : index
    %c0_270 = arith.constant 0 : index
    %535 = vector.load %arg7[%c0_268, %c0_269, %c0_270] : memref<3x3x64xf32, #tpu.memory_space<vmem>>, vector<1x1x64xf32>
    %536 = vector.shape_cast %535 : vector<1x1x64xf32> to vector<64xf32>
    %537 = vector.shape_cast %536 : vector<64xf32> to vector<1x64xf32>
    %538 = vector.broadcast %537 : vector<1x64xf32> to vector<16x64xf32>
    %539 = arith.mulf %534, %538 : vector<16x64xf32>
    %c0_271 = arith.constant 0 : index
    %c4_272 = arith.constant 4 : index
    %540 = vector.load %arg17[%c0_271, %c4_272] : memref<18x72xf32, #tpu.memory_space<vmem>>, vector<16x64xf32>
    %c0_273 = arith.constant 0 : index
    %c1_274 = arith.constant 1 : index
    %c0_275 = arith.constant 0 : index
    %541 = vector.load %arg7[%c0_273, %c1_274, %c0_275] : memref<3x3x64xf32, #tpu.memory_space<vmem>>, vector<1x1x64xf32>
    %542 = vector.shape_cast %541 : vector<1x1x64xf32> to vector<64xf32>
    %543 = vector.shape_cast %542 : vector<64xf32> to vector<1x64xf32>
    %544 = vector.broadcast %543 : vector<1x64xf32> to vector<16x64xf32>
    %545 = arith.mulf %540, %544 : vector<16x64xf32>
    %546 = arith.addf %539, %545 : vector<16x64xf32>
    %c0_276 = arith.constant 0 : index
    %c8_277 = arith.constant 8 : index
    %547 = vector.load %arg17[%c0_276, %c8_277] : memref<18x72xf32, #tpu.memory_space<vmem>>, vector<16x64xf32>
    %c0_278 = arith.constant 0 : index
    %c2_279 = arith.constant 2 : index
    %c0_280 = arith.constant 0 : index
    %548 = vector.load %arg7[%c0_278, %c2_279, %c0_280] : memref<3x3x64xf32, #tpu.memory_space<vmem>>, vector<1x1x64xf32>
    %549 = vector.shape_cast %548 : vector<1x1x64xf32> to vector<64xf32>
    %550 = vector.shape_cast %549 : vector<64xf32> to vector<1x64xf32>
    %551 = vector.broadcast %550 : vector<1x64xf32> to vector<16x64xf32>
    %552 = arith.mulf %547, %551 : vector<16x64xf32>
    %553 = arith.addf %546, %552 : vector<16x64xf32>
    %c1_281 = arith.constant 1 : index
    %c0_282 = arith.constant 0 : index
    %554 = vector.load %arg17[%c1_281, %c0_282] : memref<18x72xf32, #tpu.memory_space<vmem>>, vector<16x64xf32>
    %c1_283 = arith.constant 1 : index
    %c0_284 = arith.constant 0 : index
    %c0_285 = arith.constant 0 : index
    %555 = vector.load %arg7[%c1_283, %c0_284, %c0_285] : memref<3x3x64xf32, #tpu.memory_space<vmem>>, vector<1x1x64xf32>
    %556 = vector.shape_cast %555 : vector<1x1x64xf32> to vector<64xf32>
    %557 = vector.shape_cast %556 : vector<64xf32> to vector<1x64xf32>
    %558 = vector.broadcast %557 : vector<1x64xf32> to vector<16x64xf32>
    %559 = arith.mulf %554, %558 : vector<16x64xf32>
    %560 = arith.addf %553, %559 : vector<16x64xf32>
    %c1_286 = arith.constant 1 : index
    %c4_287 = arith.constant 4 : index
    %561 = vector.load %arg17[%c1_286, %c4_287] : memref<18x72xf32, #tpu.memory_space<vmem>>, vector<16x64xf32>
    %c1_288 = arith.constant 1 : index
    %c1_289 = arith.constant 1 : index
    %c0_290 = arith.constant 0 : index
    %562 = vector.load %arg7[%c1_288, %c1_289, %c0_290] : memref<3x3x64xf32, #tpu.memory_space<vmem>>, vector<1x1x64xf32>
    %563 = vector.shape_cast %562 : vector<1x1x64xf32> to vector<64xf32>
    %564 = vector.shape_cast %563 : vector<64xf32> to vector<1x64xf32>
    %565 = vector.broadcast %564 : vector<1x64xf32> to vector<16x64xf32>
    %566 = arith.mulf %561, %565 : vector<16x64xf32>
    %567 = arith.addf %560, %566 : vector<16x64xf32>
    %c1_291 = arith.constant 1 : index
    %c8_292 = arith.constant 8 : index
    %568 = vector.load %arg17[%c1_291, %c8_292] : memref<18x72xf32, #tpu.memory_space<vmem>>, vector<16x64xf32>
    %c1_293 = arith.constant 1 : index
    %c2_294 = arith.constant 2 : index
    %c0_295 = arith.constant 0 : index
    %569 = vector.load %arg7[%c1_293, %c2_294, %c0_295] : memref<3x3x64xf32, #tpu.memory_space<vmem>>, vector<1x1x64xf32>
    %570 = vector.shape_cast %569 : vector<1x1x64xf32> to vector<64xf32>
    %571 = vector.shape_cast %570 : vector<64xf32> to vector<1x64xf32>
    %572 = vector.broadcast %571 : vector<1x64xf32> to vector<16x64xf32>
    %573 = arith.mulf %568, %572 : vector<16x64xf32>
    %574 = arith.addf %567, %573 : vector<16x64xf32>
    %c2_296 = arith.constant 2 : index
    %c0_297 = arith.constant 0 : index
    %575 = vector.load %arg17[%c2_296, %c0_297] : memref<18x72xf32, #tpu.memory_space<vmem>>, vector<16x64xf32>
    %c2_298 = arith.constant 2 : index
    %c0_299 = arith.constant 0 : index
    %c0_300 = arith.constant 0 : index
    %576 = vector.load %arg7[%c2_298, %c0_299, %c0_300] : memref<3x3x64xf32, #tpu.memory_space<vmem>>, vector<1x1x64xf32>
    %577 = vector.shape_cast %576 : vector<1x1x64xf32> to vector<64xf32>
    %578 = vector.shape_cast %577 : vector<64xf32> to vector<1x64xf32>
    %579 = vector.broadcast %578 : vector<1x64xf32> to vector<16x64xf32>
    %580 = arith.mulf %575, %579 : vector<16x64xf32>
    %581 = arith.addf %574, %580 : vector<16x64xf32>
    %c2_301 = arith.constant 2 : index
    %c4_302 = arith.constant 4 : index
    %582 = vector.load %arg17[%c2_301, %c4_302] : memref<18x72xf32, #tpu.memory_space<vmem>>, vector<16x64xf32>
    %c2_303 = arith.constant 2 : index
    %c1_304 = arith.constant 1 : index
    %c0_305 = arith.constant 0 : index
    %583 = vector.load %arg7[%c2_303, %c1_304, %c0_305] : memref<3x3x64xf32, #tpu.memory_space<vmem>>, vector<1x1x64xf32>
    %584 = vector.shape_cast %583 : vector<1x1x64xf32> to vector<64xf32>
    %585 = vector.shape_cast %584 : vector<64xf32> to vector<1x64xf32>
    %586 = vector.broadcast %585 : vector<1x64xf32> to vector<16x64xf32>
    %587 = arith.mulf %582, %586 : vector<16x64xf32>
    %588 = arith.addf %581, %587 : vector<16x64xf32>
    %c2_306 = arith.constant 2 : index
    %c8_307 = arith.constant 8 : index
    %589 = vector.load %arg17[%c2_306, %c8_307] : memref<18x72xf32, #tpu.memory_space<vmem>>, vector<16x64xf32>
    %c2_308 = arith.constant 2 : index
    %c2_309 = arith.constant 2 : index
    %c0_310 = arith.constant 0 : index
    %590 = vector.load %arg7[%c2_308, %c2_309, %c0_310] : memref<3x3x64xf32, #tpu.memory_space<vmem>>, vector<1x1x64xf32>
    %591 = vector.shape_cast %590 : vector<1x1x64xf32> to vector<64xf32>
    %592 = vector.shape_cast %591 : vector<64xf32> to vector<1x64xf32>
    %593 = vector.broadcast %592 : vector<1x64xf32> to vector<16x64xf32>
    %594 = arith.mulf %589, %593 : vector<16x64xf32>
    %595 = arith.addf %588, %594 : vector<16x64xf32>
    %c0_311 = arith.constant 0 : index
    %c0_312 = arith.constant 0 : index
    %596 = vector.load %arg8[%c0_311, %c0_312] : memref<64x64xf32, #tpu.memory_space<vmem>>, vector<64x64xf32>
    %cst_313 = arith.constant dense<0.000000e+00> : vector<16x64xf32>
    %597 = tpu.matmul %595, %596, %cst_313 {dimension_numbers = #tpu.dot_dimension_numbers<[1], [0], [0], [1], [0, 0, 1, 1], [], []>} : vector<16x64xf32>, vector<64x64xf32>, vector<16x64xf32> -> vector<16x64xf32>
    %c1_314 = arith.constant 1 : index
    %c0_315 = arith.constant 0 : index
    %c0_316 = arith.constant 0 : index
    %598 = vector.load %arg15[%c1_314, %c0_315, %c0_316] : memref<2x16x64xf32, #tpu.memory_space<vmem>>, vector<1x16x64xf32>
    %599 = vector.shape_cast %598 : vector<1x16x64xf32> to vector<16x64xf32>
    %600 = vector.shape_cast %597 : vector<16x64xf32> to vector<1x16x64xf32>
    tpu.vector_store %arg15[%c1_314, %c0_315, %c0_316], %600 {strides = array<i32>} : memref<2x16x64xf32, #tpu.memory_space<vmem>>, vector<1x16x64xf32>,
    %cst_317 = arith.constant dense<0.000000e+00> : vector<64xf32>
    %601 = vector.multi_reduction <add>, %597, %cst_317 [0] : vector<16x64xf32> to vector<64xf32>
    %602 = vector.shape_cast %601 : vector<64xf32> to vector<1x64xf32>
    %603 = arith.mulf %597, %597 : vector<16x64xf32>
    %cst_318 = arith.constant dense<0.000000e+00> : vector<64xf32>
    %604 = vector.multi_reduction <add>, %603, %cst_318 [0] : vector<16x64xf32> to vector<64xf32>
    %605 = vector.shape_cast %604 : vector<64xf32> to vector<1x64xf32>
    %606 = arith.addf %521, %602 : vector<1x64xf32>
    %607 = arith.addf %524, %605 : vector<1x64xf32>
    %608 = tpu.concatenate %606, %607 in 0 : vector<1x64xf32>, vector<1x64xf32> -> vector<2x64xf32>
    %c0_319 = arith.constant 0 : index
    %c0_320 = arith.constant 0 : index
    %609 = vector.load %arg11[%c0_319, %c0_320] : memref<64x64xf32, #tpu.memory_space<vmem>>, vector<64x64xf32>
    %cst_321 = arith.constant dense<0.000000e+00> : vector<2x64xf32>
    %610 = tpu.matmul %608, %609, %cst_321 {dimension_numbers = #tpu.dot_dimension_numbers<[1], [0], [0], [1], [0, 0, 1, 1], [], []>} : vector<2x64xf32>, vector<64x64xf32>, vector<2x64xf32> -> vector<2x64xf32>
    %cst_322 = arith.constant 0.001953125 : f32
    %611 = vector.broadcast %cst_322 : f32 to vector<2x64xf32>
    %612 = arith.mulf %610, %611 : vector<2x64xf32>
    %613 = vector.extract_strided_slice %612 {offsets = [0, 0], sizes = [1, 64], strides = [1, 1]} : vector<2x64xf32> to vector<1x64xf32>
    %614 = vector.extract_strided_slice %612 {offsets = [1, 0], sizes = [1, 64], strides = [1, 1]} : vector<2x64xf32> to vector<1x64xf32>
    %615 = arith.mulf %613, %613 : vector<1x64xf32>
    %616 = arith.subf %614, %615 : vector<1x64xf32>
    %cst_323 = arith.constant 0.000000e+00 : f32
    %617 = vector.broadcast %cst_323 : f32 to vector<1x64xf32>
    %618 = arith.maximumf %616, %617 : vector<1x64xf32>
    %cst_324 = arith.constant 9.99999974E-6 : f32
    %619 = vector.broadcast %cst_324 : f32 to vector<1x64xf32>
    %620 = arith.addf %618, %619 : vector<1x64xf32>
    %621 = math.rsqrt %620 : vector<1x64xf32>
    %c0_325 = arith.constant 0 : index
    %c0_326 = arith.constant 0 : index
    %c0_327 = arith.constant 0 : index
    %622 = vector.load %arg16[%c0_325, %c0_326, %c0_327] : memref<2x16x64xf32, #tpu.memory_space<vmem>>, vector<1x16x64xf32>
    %623 = vector.shape_cast %622 : vector<1x16x64xf32> to vector<16x64xf32>
    %c0_328 = arith.constant 0 : index
    %c0_329 = arith.constant 0 : index
    %c0_330 = arith.constant 0 : index
    %624 = vector.load %arg14[%c0_328, %c0_329, %c0_330] : memref<2x16x64xf32, #tpu.memory_space<vmem>>, vector<1x16x64xf32>
    %625 = vector.shape_cast %624 : vector<1x16x64xf32> to vector<16x64xf32>
    %626 = vector.broadcast %426 : vector<1x64xf32> to vector<16x64xf32>
    %627 = arith.subf %625, %626 : vector<16x64xf32>
    %628 = vector.broadcast %441 : vector<1x64xf32> to vector<16x64xf32>
    %629 = arith.mulf %627, %628 : vector<16x64xf32>
    %630 = vector.broadcast %4 : f32 to vector<16x64xf32>
    %631 = arith.mulf %630, %629 : vector<16x64xf32>
    %632 = arith.addf %623, %631 : vector<16x64xf32>
    %c0_331 = arith.constant 0 : index
    %c0_332 = arith.constant 0 : index
    %c0_333 = arith.constant 0 : index
    %633 = vector.load %arg15[%c0_331, %c0_332, %c0_333] : memref<2x16x64xf32, #tpu.memory_space<vmem>>, vector<1x16x64xf32>
    %634 = vector.shape_cast %633 : vector<1x16x64xf32> to vector<16x64xf32>
    %635 = vector.broadcast %613 : vector<1x64xf32> to vector<16x64xf32>
    %636 = arith.subf %634, %635 : vector<16x64xf32>
    %637 = vector.broadcast %621 : vector<1x64xf32> to vector<16x64xf32>
    %638 = arith.mulf %636, %637 : vector<16x64xf32>
    %639 = vector.broadcast %3 : f32 to vector<16x64xf32>
    %640 = arith.mulf %639, %638 : vector<16x64xf32>
    %641 = arith.addf %632, %640 : vector<16x64xf32>
    %c0_334 = arith.constant 0 : index
    %c0_335 = arith.constant 0 : index
    %c0_336 = arith.constant 0 : index
    %642 = vector.load %arg12[%c0_334, %c0_335, %c0_336] : memref<2x16x64xf32, #tpu.memory_space<vmem>>, vector<1x16x64xf32>
    %643 = vector.shape_cast %642 : vector<1x16x64xf32> to vector<16x64xf32>
    %644 = vector.shape_cast %641 : vector<16x64xf32> to vector<1x16x64xf32>
    tpu.vector_store %arg12[%c0_334, %c0_335, %c0_336], %644 {strides = array<i32>} : memref<2x16x64xf32, #tpu.memory_space<vmem>>, vector<1x16x64xf32>,
    %c1_337 = arith.constant 1 : index
    %c0_338 = arith.constant 0 : index
    %c0_339 = arith.constant 0 : index
    %645 = vector.load %arg16[%c1_337, %c0_338, %c0_339] : memref<2x16x64xf32, #tpu.memory_space<vmem>>, vector<1x16x64xf32>
    %646 = vector.shape_cast %645 : vector<1x16x64xf32> to vector<16x64xf32>
    %c1_340 = arith.constant 1 : index
    %c0_341 = arith.constant 0 : index
    %c0_342 = arith.constant 0 : index
    %647 = vector.load %arg14[%c1_340, %c0_341, %c0_342] : memref<2x16x64xf32, #tpu.memory_space<vmem>>, vector<1x16x64xf32>
    %648 = vector.shape_cast %647 : vector<1x16x64xf32> to vector<16x64xf32>
    %649 = vector.broadcast %426 : vector<1x64xf32> to vector<16x64xf32>
    %650 = arith.subf %648, %649 : vector<16x64xf32>
    %651 = vector.broadcast %441 : vector<1x64xf32> to vector<16x64xf32>
    %652 = arith.mulf %650, %651 : vector<16x64xf32>
    %653 = vector.broadcast %4 : f32 to vector<16x64xf32>
    %654 = arith.mulf %653, %652 : vector<16x64xf32>
    %655 = arith.addf %646, %654 : vector<16x64xf32>
    %c1_343 = arith.constant 1 : index
    %c0_344 = arith.constant 0 : index
    %c0_345 = arith.constant 0 : index
    %656 = vector.load %arg15[%c1_343, %c0_344, %c0_345] : memref<2x16x64xf32, #tpu.memory_space<vmem>>, vector<1x16x64xf32>
    %657 = vector.shape_cast %656 : vector<1x16x64xf32> to vector<16x64xf32>
    %658 = vector.broadcast %613 : vector<1x64xf32> to vector<16x64xf32>
    %659 = arith.subf %657, %658 : vector<16x64xf32>
    %660 = vector.broadcast %621 : vector<1x64xf32> to vector<16x64xf32>
    %661 = arith.mulf %659, %660 : vector<16x64xf32>
    %662 = vector.broadcast %3 : f32 to vector<16x64xf32>
    %663 = arith.mulf %662, %661 : vector<16x64xf32>
    %664 = arith.addf %655, %663 : vector<16x64xf32>
    %c1_346 = arith.constant 1 : index
    %c0_347 = arith.constant 0 : index
    %c0_348 = arith.constant 0 : index
    %665 = vector.load %arg12[%c1_346, %c0_347, %c0_348] : memref<2x16x64xf32, #tpu.memory_space<vmem>>, vector<1x16x64xf32>
    %666 = vector.shape_cast %665 : vector<1x16x64xf32> to vector<16x64xf32>
    %667 = vector.shape_cast %664 : vector<16x64xf32> to vector<1x16x64xf32>
    tpu.vector_store %arg12[%c1_346, %c0_347, %c0_348], %667 {strides = array<i32>} : memref<2x16x64xf32, #tpu.memory_space<vmem>>, vector<1x16x64xf32>,
    return
  }
  func.func @transform_0(%arg0: i32) -> i32 {
    %c0_i32 = arith.constant 0 : i32
    %c0_i32_0 = arith.constant 0 : i32
    return %c0_i32 : i32
  }
  func.func @transform_1(%arg0: i32) -> (i32, i32, i32) {
    %c0_i32 = arith.constant 0 : i32
    %c0_i32_0 = arith.constant 0 : i32
    %c0_i32_1 = arith.constant 0 : i32
    %c0_i32_2 = arith.constant 0 : i32
    return %c0_i32, %c0_i32_0, %c0_i32_1 : i32, i32, i32
  }
  func.func @transform_2(%arg0: i32) -> (i32, i32) {
    %c0_i32 = arith.constant 0 : i32
    %c0_i32_0 = arith.constant 0 : i32
    %c0_i32_1 = arith.constant 0 : i32
    return %c0_i32, %c0_i32_0 : i32, i32
  }
  func.func @transform_3(%arg0: i32) -> (i32, i32) {
    %c0_i32 = arith.constant 0 : i32
    %c0_i32_0 = arith.constant 0 : i32
    %c0_i32_1 = arith.constant 0 : i32
    return %c0_i32, %c0_i32_0 : i32, i32
  }
  func.func @transform_4(%arg0: i32) -> (i32, i32, i32) {
    %c0_i32 = arith.constant 0 : i32
    %c0_i32_0 = arith.constant 0 : i32
    %c0_i32_1 = arith.constant 0 : i32
    %c0_i32_2 = arith.constant 0 : i32
    return %c0_i32, %c0_i32_0, %c0_i32_1 : i32, i32, i32
  }
  func.func @transform_5(%arg0: i32) -> (i32, i32) {
    %c0_i32 = arith.constant 0 : i32
    %c0_i32_0 = arith.constant 0 : i32
    %c0_i32_1 = arith.constant 0 : i32
    return %c0_i32, %c0_i32_0 : i32, i32
  }
  func.func @transform_6(%arg0: i32) -> (i32, i32, i32) {
    %c0_i32 = arith.constant 0 : i32
    %c0_i32_0 = arith.constant 0 : i32
    %c0_i32_1 = arith.constant 0 : i32
    %c0_i32_2 = arith.constant 0 : i32
    return %c0_i32, %c0_i32_0, %c0_i32_1 : i32, i32, i32
  }
  func.func @transform_7(%arg0: i32) -> (i32, i32) {
    %c0_i32 = arith.constant 0 : i32
    %c0_i32_0 = arith.constant 0 : i32
    %c0_i32_1 = arith.constant 0 : i32
    return %c0_i32, %c0_i32_0 : i32, i32
  }
  func.func @transform_8(%arg0: i32) -> (i32, i32, i32) {
    %c0_i32 = arith.constant 0 : i32
    %c0_i32_0 = arith.constant 0 : i32
    %c0_i32_1 = arith.constant 0 : i32
    %c0_i32_2 = arith.constant 0 : i32
    return %c0_i32, %c0_i32_0, %c0_i32_1 : i32, i32, i32
  }
  func.func @transform_9(%arg0: i32) -> (i32, i32) {
    %c0_i32 = arith.constant 0 : i32
    %c0_i32_0 = arith.constant 0 : i32
    %c0_i32_1 = arith.constant 0 : i32
    return %c0_i32, %c0_i32_0 : i32, i32
  }
  func.func @transform_10(%arg0: i32) -> (i32, i32) {
    %c0_i32 = arith.constant 0 : i32
    %c0_i32_0 = arith.constant 0 : i32
    %c0_i32_1 = arith.constant 0 : i32
    return %c0_i32, %c0_i32_0 : i32, i32
  }
  func.func @transform_11(%arg0: i32) -> (i32, i32, i32) {
    %c0_i32 = arith.constant 0 : i32
    %c0_i32_0 = arith.constant 0 : i32
    %c0_i32_1 = arith.constant 0 : i32
    %c0_i32_2 = arith.constant 0 : i32
    return %c0_i32, %c0_i32_0, %c0_i32_1 : i32, i32, i32
  }
}

</mosaic_0001>

<bundles_post_ra>
// kernel: tile.23
= control target key start
LH: loop header
LB: loop body
LE: loop exit
PB: predicated region body
PF: predicated region fallthrough
CT: control target
= control target key end

     0   :  { %s938_s0 = inlined_call_operand.vmem [shape: f32[4,4], index: 0, kind: input, shape index: {}]   ;;  %s939_s1 = inlined_call_operand.vmem [shape: f32[16,4,16,4], index: 1, kind: output, shape index: {}]  }
   0x1   :  { %v409_v0 = vld [vmem:[%s938_s0] ss:$0 sm:$0xff]  ;;  %v414_v1 = vld [vmem:[%s938_s0 + $0x1] ss:$0 sm:$0xff]  ;;  %v419_v2 = vld [vmem:[%s938_s0 + $0x2] ss:$0 sm:$0xff] }
   0x2   :  { %5 = vst [vmem:[%s939_s1] sm:$0xff] %v409_v0  ;;  %266 = vst [vmem:[%s939_s1 + $0x40] sm:$0xff] %v409_v0  ;;  %v616_v3 = vld [vmem:[%s938_s0 + $0x3] ss:$0 sm:$0xff] }
   0x3   :  { %267 = vst [vmem:[%s939_s1 + $0x80] sm:$0xff] %v409_v0  ;;  %268 = vst [vmem:[%s939_s1 + $0xc0] sm:$0xff] %v409_v0 }
   0x4   :  { %269 = vst [vmem:[%s939_s1 + $0x100] sm:$0xff] %v409_v0  ;;  %270 = vst [vmem:[%s939_s1 + $0x140] sm:$0xff] %v409_v0 }
   0x5   :  { %271 = vst [vmem:[%s939_s1 + $0x180] sm:$0xff] %v409_v0  ;;  %272 = vst [vmem:[%s939_s1 + $0x1c0] sm:$0xff] %v409_v0 }
   0x6   :  { %273 = vst [vmem:[%s939_s1 + $0x200] sm:$0xff] %v409_v0  ;;  %274 = vst [vmem:[%s939_s1 + $0x240] sm:$0xff] %v409_v0 }
   0x7   :  { %275 = vst [vmem:[%s939_s1 + $0x280] sm:$0xff] %v409_v0  ;;  %276 = vst [vmem:[%s939_s1 + $0x2c0] sm:$0xff] %v409_v0 }
   0x8   :  { %277 = vst [vmem:[%s939_s1 + $0x300] sm:$0xff] %v409_v0  ;;  %278 = vst [vmem:[%s939_s1 + $0x340] sm:$0xff] %v409_v0 }
   0x9   :  { %279 = vst [vmem:[%s939_s1 + $0x380] sm:$0xff] %v409_v0  ;;  %280 = vst [vmem:[%s939_s1 + $0x3c0] sm:$0xff] %v409_v0 }
   0xa   :  { %282 = vst [vmem:[%s939_s1 + $0x10] sm:$0xff] %v414_v1  ;;  %283 = vst [vmem:[%s939_s1 + $0x50] sm:$0xff] %v414_v1 }
   0xb   :  { %284 = vst [vmem:[%s939_s1 + $0x90] sm:$0xff] %v414_v1  ;;  %285 = vst [vmem:[%s939_s1 + $0xd0] sm:$0xff] %v414_v1 }
   0xc   :  { %286 = vst [vmem:[%s939_s1 + $0x110] sm:$0xff] %v414_v1  ;;  %287 = vst [vmem:[%s939_s1 + $0x150] sm:$0xff] %v414_v1 }
   0xd   :  { %288 = vst [vmem:[%s939_s1 + $0x190] sm:$0xff] %v414_v1  ;;  %289 = vst [vmem:[%s939_s1 + $0x1d0] sm:$0xff] %v414_v1 }
   0xe   :  { %290 = vst [vmem:[%s939_s1 + $0x210] sm:$0xff] %v414_v1  ;;  %291 = vst [vmem:[%s939_s1 + $0x250] sm:$0xff] %v414_v1 }
   0xf   :  { %292 = vst [vmem:[%s939_s1 + $0x290] sm:$0xff] %v414_v1  ;;  %293 = vst [vmem:[%s939_s1 + $0x2d0] sm:$0xff] %v414_v1 }
  0x10   :  { %294 = vst [vmem:[%s939_s1 + $0x310] sm:$0xff] %v414_v1  ;;  %295 = vst [vmem:[%s939_s1 + $0x350] sm:$0xff] %v414_v1 }
  0x11   :  { %296 = vst [vmem:[%s939_s1 + $0x390] sm:$0xff] %v414_v1  ;;  %297 = vst [vmem:[%s939_s1 + $0x3d0] sm:$0xff] %v414_v1 }
  0x12   :  { %299 = vst [vmem:[%s939_s1 + $0x20] sm:$0xff] %v419_v2  ;;  %300 = vst [vmem:[%s939_s1 + $0x60] sm:$0xff] %v419_v2 }
  0x13   :  { %301 = vst [vmem:[%s939_s1 + $0xa0] sm:$0xff] %v419_v2  ;;  %302 = vst [vmem:[%s939_s1 + $0xe0] sm:$0xff] %v419_v2 }
  0x14   :  { %303 = vst [vmem:[%s939_s1 + $0x120] sm:$0xff] %v419_v2  ;;  %304 = vst [vmem:[%s939_s1 + $0x160] sm:$0xff] %v419_v2 }
  0x15   :  { %305 = vst [vmem:[%s939_s1 + $0x1a0] sm:$0xff] %v419_v2  ;;  %306 = vst [vmem:[%s939_s1 + $0x1e0] sm:$0xff] %v419_v2 }
  0x16   :  { %307 = vst [vmem:[%s939_s1 + $0x220] sm:$0xff] %v419_v2  ;;  %308 = vst [vmem:[%s939_s1 + $0x260] sm:$0xff] %v419_v2 }
  0x17   :  { %309 = vst [vmem:[%s939_s1 + $0x2a0] sm:$0xff] %v419_v2  ;;  %310 = vst [vmem:[%s939_s1 + $0x2e0] sm:$0xff] %v419_v2 }
  0x18   :  { %311 = vst [vmem:[%s939_s1 + $0x320] sm:$0xff] %v419_v2  ;;  %312 = vst [vmem:[%s939_s1 + $0x360] sm:$0xff] %v419_v2 }
  0x19   :  { %313 = vst [vmem:[%s939_s1 + $0x3a0] sm:$0xff] %v419_v2  ;;  %314 = vst [vmem:[%s939_s1 + $0x3e0] sm:$0xff] %v419_v2 }
  0x1a   :  { %332 = vst [vmem:[%s939_s1 + $0x8] sm:$0xff] %v409_v0  ;;  %333 = vst [vmem:[%s939_s1 + $0x48] sm:$0xff] %v409_v0 }
  0x1b   :  { %334 = vst [vmem:[%s939_s1 + $0x88] sm:$0xff] %v409_v0  ;;  %335 = vst [vmem:[%s939_s1 + $0xc8] sm:$0xff] %v409_v0 }
  0x1c   :  { %336 = vst [vmem:[%s939_s1 + $0x108] sm:$0xff] %v409_v0  ;;  %337 = vst [vmem:[%s939_s1 + $0x148] sm:$0xff] %v409_v0 }
  0x1d   :  { %338 = vst [vmem:[%s939_s1 + $0x188] sm:$0xff] %v409_v0  ;;  %339 = vst [vmem:[%s939_s1 + $0x1c8] sm:$0xff] %v409_v0 }
  0x1e   :  { %340 = vst [vmem:[%s939_s1 + $0x208] sm:$0xff] %v409_v0  ;;  %341 = vst [vmem:[%s939_s1 + $0x248] sm:$0xff] %v409_v0 }
  0x1f   :  { %342 = vst [vmem:[%s939_s1 + $0x288] sm:$0xff] %v409_v0  ;;  %343 = vst [vmem:[%s939_s1 + $0x2c8] sm:$0xff] %v409_v0 }
  0x20   :  { %344 = vst [vmem:[%s939_s1 + $0x308] sm:$0xff] %v409_v0  ;;  %345 = vst [vmem:[%s939_s1 + $0x348] sm:$0xff] %v409_v0 }
  0x21   :  { %346 = vst [vmem:[%s939_s1 + $0x388] sm:$0xff] %v409_v0  ;;  %347 = vst [vmem:[%s939_s1 + $0x3c8] sm:$0xff] %v409_v0 }
  0x22   :  { %348 = vst [vmem:[%s939_s1 + $0x18] sm:$0xff] %v414_v1  ;;  %349 = vst [vmem:[%s939_s1 + $0x58] sm:$0xff] %v414_v1 }
  0x23   :  { %350 = vst [vmem:[%s939_s1 + $0x98] sm:$0xff] %v414_v1  ;;  %351 = vst [vmem:[%s939_s1 + $0xd8] sm:$0xff] %v414_v1 }
  0x24   :  { %352 = vst [vmem:[%s939_s1 + $0x118] sm:$0xff] %v414_v1  ;;  %353 = vst [vmem:[%s939_s1 + $0x158] sm:$0xff] %v414_v1 }
  0x25   :  { %354 = vst [vmem:[%s939_s1 + $0x198] sm:$0xff] %v414_v1  ;;  %355 = vst [vmem:[%s939_s1 + $0x1d8] sm:$0xff] %v414_v1 }
  0x26   :  { %356 = vst [vmem:[%s939_s1 + $0x218] sm:$0xff] %v414_v1  ;;  %357 = vst [vmem:[%s939_s1 + $0x258] sm:$0xff] %v414_v1 }
  0x27   :  { %358 = vst [vmem:[%s939_s1 + $0x298] sm:$0xff] %v414_v1  ;;  %359 = vst [vmem:[%s939_s1 + $0x2d8] sm:$0xff] %v414_v1 }
  0x28   :  { %360 = vst [vmem:[%s939_s1 + $0x318] sm:$0xff] %v414_v1  ;;  %361 = vst [vmem:[%s939_s1 + $0x358] sm:$0xff] %v414_v1 }
  0x29   :  { %362 = vst [vmem:[%s939_s1 + $0x398] sm:$0xff] %v414_v1  ;;  %363 = vst [vmem:[%s939_s1 + $0x3d8] sm:$0xff] %v414_v1 }
  0x2a   :  { %364 = vst [vmem:[%s939_s1 + $0x28] sm:$0xff] %v419_v2  ;;  %365 = vst [vmem:[%s939_s1 + $0x68] sm:$0xff] %v419_v2 }
  0x2b   :  { %366 = vst [vmem:[%s939_s1 + $0xa8] sm:$0xff] %v419_v2  ;;  %367 = vst [vmem:[%s939_s1 + $0xe8] sm:$0xff] %v419_v2 }
  0x2c   :  { %368 = vst [vmem:[%s939_s1 + $0x128] sm:$0xff] %v419_v2  ;;  %369 = vst [vmem:[%s939_s1 + $0x168] sm:$0xff] %v419_v2 }
  0x2d   :  { %370 = vst [vmem:[%s939_s1 + $0x1a8] sm:$0xff] %v419_v2  ;;  %371 = vst [vmem:[%s939_s1 + $0x1e8] sm:$0xff] %v419_v2 }
  0x2e   :  { %372 = vst [vmem:[%s939_s1 + $0x228] sm:$0xff] %v419_v2  ;;  %373 = vst [vmem:[%s939_s1 + $0x268] sm:$0xff] %v419_v2 }
  0x2f   :  { %374 = vst [vmem:[%s939_s1 + $0x2a8] sm:$0xff] %v419_v2  ;;  %375 = vst [vmem:[%s939_s1 + $0x2e8] sm:$0xff] %v419_v2 }
  0x30   :  { %376 = vst [vmem:[%s939_s1 + $0x328] sm:$0xff] %v419_v2  ;;  %377 = vst [vmem:[%s939_s1 + $0x368] sm:$0xff] %v419_v2 }
  0x31   :  { %378 = vst [vmem:[%s939_s1 + $0x3a8] sm:$0xff] %v419_v2  ;;  %379 = vst [vmem:[%s939_s1 + $0x3e8] sm:$0xff] %v419_v2 }
  0x32   :  { %316 = vst [vmem:[%s939_s1 + $0x30] sm:$0xff] %v616_v3  ;;  %317 = vst [vmem:[%s939_s1 + $0x70] sm:$0xff] %v616_v3 }
  0x33   :  { %318 = vst [vmem:[%s939_s1 + $0xb0] sm:$0xff] %v616_v3  ;;  %319 = vst [vmem:[%s939_s1 + $0xf0] sm:$0xff] %v616_v3 }
  0x34   :  { %320 = vst [vmem:[%s939_s1 + $0x130] sm:$0xff] %v616_v3  ;;  %321 = vst [vmem:[%s939_s1 + $0x170] sm:$0xff] %v616_v3 }
  0x35   :  { %322 = vst [vmem:[%s939_s1 + $0x1b0] sm:$0xff] %v616_v3  ;;  %323 = vst [vmem:[%s939_s1 + $0x1f0] sm:$0xff] %v616_v3 }
  0x36   :  { %324 = vst [vmem:[%s939_s1 + $0x230] sm:$0xff] %v616_v3  ;;  %325 = vst [vmem:[%s939_s1 + $0x270] sm:$0xff] %v616_v3 }
  0x37   :  { %326 = vst [vmem:[%s939_s1 + $0x2b0] sm:$0xff] %v616_v3  ;;  %327 = vst [vmem:[%s939_s1 + $0x2f0] sm:$0xff] %v616_v3 }
  0x38   :  { %328 = vst [vmem:[%s939_s1 + $0x330] sm:$0xff] %v616_v3  ;;  %329 = vst [vmem:[%s939_s1 + $0x370] sm:$0xff] %v616_v3 }
  0x39   :  { %330 = vst [vmem:[%s939_s1 + $0x3b0] sm:$0xff] %v616_v3  ;;  %331 = vst [vmem:[%s939_s1 + $0x3f0] sm:$0xff] %v616_v3 }
  0x3a   :  { %380 = vst [vmem:[%s939_s1 + $0x38] sm:$0xff] %v616_v3  ;;  %381 = vst [vmem:[%s939_s1 + $0x78] sm:$0xff] %v616_v3 }
  0x3b   :  { %382 = vst [vmem:[%s939_s1 + $0xb8] sm:$0xff] %v616_v3  ;;  %383 = vst [vmem:[%s939_s1 + $0xf8] sm:$0xff] %v616_v3 }
  0x3c   :  { %384 = vst [vmem:[%s939_s1 + $0x138] sm:$0xff] %v616_v3  ;;  %385 = vst [vmem:[%s939_s1 + $0x178] sm:$0xff] %v616_v3 }
  0x3d   :  { %386 = vst [vmem:[%s939_s1 + $0x1b8] sm:$0xff] %v616_v3  ;;  %387 = vst [vmem:[%s939_s1 + $0x1f8] sm:$0xff] %v616_v3 }
  0x3e   :  { %388 = vst [vmem:[%s939_s1 + $0x238] sm:$0xff] %v616_v3  ;;  %389 = vst [vmem:[%s939_s1 + $0x278] sm:$0xff] %v616_v3 }
  0x3f   :  { %390 = vst [vmem:[%s939_s1 + $0x2b8] sm:$0xff] %v616_v3  ;;  %391 = vst [vmem:[%s939_s1 + $0x2f8] sm:$0xff] %v616_v3 }
  0x40   :  { %392 = vst [vmem:[%s939_s1 + $0x338] sm:$0xff] %v616_v3  ;;  %393 = vst [vmem:[%s939_s1 + $0x378] sm:$0xff] %v616_v3 }
  0x41   :  { %394 = vst [vmem:[%s939_s1 + $0x3b8] sm:$0xff] %v616_v3  ;;  %395 = vst [vmem:[%s939_s1 + $0x3f8] sm:$0xff] %v616_v3 }

// kernel: tile.29
= control target key start
LH: loop header
LB: loop body
LE: loop exit
PB: predicated region body
PF: predicated region fallthrough
CT: control target
= control target key end

     0   :  { %s633_s10 = smov 56   ;;  %s634_s11 = smov 60   ;;  %vm6_vm0 = vcmask 1043458   ;;  %vm10_vm1 = vcmask 1045508   ;;  %vm14_vm2 = vcmask 1047558   ;;  %vm16_vm3 = vcmask 31744   ;;  %s961_s0 = inlined_call_operand.vmem [shape: f32[3,3,16,4], index: 0, kind: input, shape index: {}]   ;;  %s962_s1 = inlined_call_operand.vmem [shape: f32[3,3,64], index: 1, kind: output, shape index: {}]  }
   0x1   :  { %v550_v0 = vld [vmem:[%s961_s0 + $0x8e] sm:$0x1]   ;;  %v545_v1 = vld [vmem:[%s961_s0 + $0x8f] sm:$0x1]   ;;  %s61_s12 = smov 3  ;;  %s64_s13 = smov 12 }
   0x2   :  { %88 = vrot.lane.b32.xlu1 %v550_v0, %s633_s10  ;;  %55 = vrot.lane.b32.xlu0 %v545_v1, %s634_s11  ;;  %v546_v2 = vld [vmem:[%s961_s0 + $0xe] ss:$16 sm:%s61_s12]   ;;  %s69_s18 = smov 48  ;;  %s74_s19 = smov 192  ;;  %vm47_vm4 = vcmask 523744   ;;  %vm80_vm5 = vcmask 490944  }
   0x3   :  { %v547_v3 = vld [vmem:[%s961_s0 + $0xe] ss:$16 sm:%s64_s13]   ;;  %s28_s24 = smov 3  ;;  %s31_s25 = smov 12  ;;  %v555_v15 = vld [vmem:[%s961_s0 + $0x8d] sm:$0x1]  }
   0x4   :  { %v67_v4 = vsel %vm6_vm0, %v547_v3, %v546_v2  ;;  %v548_v5 = vld [vmem:[%s961_s0 + $0xe] ss:$16 sm:%s69_s18]   ;;  %v541_v8 = vld [vmem:[%s961_s0 + $0xf] ss:$16 sm:%s28_s24]   ;;  %s36_s30 = smov 48  ;;  %s41_s2 = smov 192 }
   0x5   :  { %v549_v6 = vld [vmem:[%s961_s0 + $0xe] ss:$16 sm:%s74_s19]   ;;  %v72_v7 = vsel %vm10_vm1, %v548_v5, %v67_v4  ;;  %v542_v9 = vld [vmem:[%s961_s0 + $0xf] ss:$16 sm:%s31_s25]   ;;  %s94_s7 = smov 3  ;;  %s97_s13 = smov 12 }
   0x6   :  { %v77_v10 = vsel %vm14_vm2, %v549_v6, %v72_v7  ;;  %v34_v11 = vsel %vm6_vm0, %v542_v9, %v541_v8  ;;  %v543_v12 = vld [vmem:[%s961_s0 + $0xf] ss:$16 sm:%s36_s30]   ;;  %v551_v16 = vld [vmem:[%s961_s0 + $0xd] ss:$16 sm:%s94_s7]   ;;  %s102_s14 = smov 48  ;;  %s107_s19 = smov 192 }
   0x7   :  { %v544_v13 = vld [vmem:[%s961_s0 + $0xf] ss:$16 sm:%s41_s2]   ;;  %78 = vrot.lane.b32.xlu1 %v77_v10, %s633_s10  ;;  %v39_v14 = vsel %vm10_vm1, %v543_v12, %v34_v11  ;;  %s127_s21 = smov 3  ;;  %s130_s22 = smov 12  ;;  %v560_v26 = vld [vmem:[%s961_s0 + $0x8c] sm:$0x1]  }
   0x8   :  { %v44_v17 = vsel %vm14_vm2, %v544_v13, %v39_v14  ;;  %v552_v18 = vld [vmem:[%s961_s0 + $0xd] ss:$16 sm:%s97_s13]   ;;  %v556_v23 = vld [vmem:[%s961_s0 + $0xc] ss:$16 sm:%s127_s21]   ;;  %s135_s27 = smov 48  ;;  %s140_s28 = smov 192 }
   0x9   :  { %v553_v19 = vld [vmem:[%s961_s0 + $0xd] ss:$16 sm:%s102_s14]   ;;  %45 = vrot.lane.b32.xlu0 %v44_v17, %s634_s11  ;;  %v100_v20 = vsel %vm6_vm0, %v552_v18, %v551_v16  ;;  %s635_s29 = smov 52   ;;  %s160_s5 = smov 3  ;;  %v565_v37 = vld [vmem:[%s961_s0 + $0x8b] sm:$0x1]  }
   0xa   :  { %v554_v21 = vld [vmem:[%s961_s0 + $0xd] ss:$16 sm:%s107_s19]   ;;  %v105_v22 = vsel %vm10_vm1, %v553_v19, %v100_v20  ;;  %v557_v24 = vld [vmem:[%s961_s0 + $0xc] ss:$16 sm:%s130_s22]   ;;  %s163_s10 = smov 12  ;;  %s168_s12 = smov 48 }
   0xb   :  { %121 = vrot.lane.b32.xlu1 %v555_v15, %s635_s29  ;;  %v110_v25 = vsel %vm14_vm2, %v554_v21, %v105_v22  ;;  %v133_v27 = vsel %vm6_vm0, %v557_v24, %v556_v23  ;;  %v558_v28 = vld [vmem:[%s961_s0 + $0xc] ss:$16 sm:%s135_s27]   ;;  %s173_s15 = smov 192  ;;  %s193_s11 = smov 3  ;;  %v570_v46 = vld [vmem:[%s961_s0 + $0x8a] sm:$0x1]  }
   0xc   :  { %v138_v29 = vsel %vm10_vm1, %v558_v28, %v133_v27  ;;  %v559_v30 = vld [vmem:[%s961_s0 + $0xc] ss:$16 sm:%s140_s28]   ;;  %v561_v31 = vld [vmem:[%s961_s0 + $0xb] ss:$16 sm:%s160_s5]   ;;  %s196_s20 = smov 12  ;;  %s636_s21 = smov 48  }
   0xd   :  { %111 = vrot.lane.b32.xlu0 %v110_v25, %s635_s29  ;;  %v562_v32 = vld [vmem:[%s961_s0 + $0xb] ss:$16 sm:%s163_s10]   ;;  %v143_v33 = vsel %vm14_vm2, %v559_v30, %v138_v29  ;;  %s201_s26 = smov 48  ;;  %s206_s2 = smov 192  ;;  %v575_v54 = vld [vmem:[%s961_s0 + $0x89] sm:$0x1]  }
   0xe   :  { %v166_v34 = vsel %vm6_vm0, %v562_v32, %v561_v31  ;;  %v563_v35 = vld [vmem:[%s961_s0 + $0xb] ss:$16 sm:%s168_s12]   ;;  %v566_v39 = vld [vmem:[%s961_s0 + $0xa] ss:$16 sm:%s193_s11]   ;;  %s226_s3 = smov 3  ;;  %s229_s4 = smov 12 }
   0xf   :  { %v564_v36 = vld [vmem:[%s961_s0 + $0xb] ss:$16 sm:%s173_s15]   ;;  %154 = vrot.lane.b32.xlu1 %v560_v26, %s636_s21  ;;  %v171_v38 = vsel %vm10_vm1, %v563_v35, %v166_v34  ;;  %s234_s5 = smov 48  ;;  %s637_s10 = smov 44   ;;  %v580_v62 = vld [vmem:[%s961_s0 + $0x88] sm:$0x1]  }
  0x10   :  { %v567_v40 = vld [vmem:[%s961_s0 + $0xa] ss:$16 sm:%s196_s20]   ;;  %v176_v43 = vsel %vm14_vm2, %v564_v36, %v171_v38  ;;  %v571_v44 = vld [vmem:[%s961_s0 + $0x9] ss:$16 sm:%s226_s3]   ;;  %s259_s16 = smov 3  ;;  %s262_s17 = smov 12 }
  0x11   :  { %v568_v41 = vld [vmem:[%s961_s0 + $0xa] ss:$16 sm:%s201_s26]   ;;  %144 = vrot.lane.b32.xlu0 %v143_v33, %s636_s21  ;;  %v199_v42 = vsel %vm6_vm0, %v567_v40, %v566_v39  ;;  %s239_s11 = smov 192  ;;  %s267_s24 = smov 48  ;;  %v585_v6 = vld [vmem:[%s961_s0 + $0x87] sm:$0x1]  }
  0x12   :  { %v572_v45 = vld [vmem:[%s961_s0 + $0x9] ss:$16 sm:%s229_s4]   ;;  %v204_v47 = vsel %vm10_vm1, %v568_v41, %v199_v42  ;;  %v569_v48 = vld [vmem:[%s961_s0 + $0xa] ss:$16 sm:%s206_s2]   ;;  %s292_s25 = smov 3  ;;  %s295_s26 = smov 12 }
  0x13   :  { %187 = vrot.lane.b32.xlu1 %v565_v37, %s637_s10  ;;  %v232_v49 = vsel %vm6_vm0, %v572_v45, %v571_v44  ;;  %v573_v50 = vld [vmem:[%s961_s0 + $0x9] ss:$16 sm:%s234_s5]   ;;  %v209_v53 = vsel %vm14_vm2, %v569_v48, %v204_v47  ;;  %s638_s27 = smov 40   ;;  %s272_s5 = smov 192  ;;  %v590_v14 = vld [vmem:[%s961_s0 + $0x86] sm:$0x1]  }
  0x14   :  { %v576_v51 = vld [vmem:[%s961_s0 + $0x8] ss:$16 sm:%s259_s16]   ;;  %v237_v55 = vsel %vm10_vm1, %v573_v50, %v232_v49  ;;  %v574_v56 = vld [vmem:[%s961_s0 + $0x9] ss:$16 sm:%s239_s11]   ;;  %s325_s12 = smov 3  ;;  %s328_s13 = smov 12 }
  0x15   :  { %177 = vrot.lane.b32.xlu0 %v176_v43, %s637_s10  ;;  %v577_v52 = vld [vmem:[%s961_s0 + $0x8] ss:$16 sm:%s262_s17]   ;;  %s300_s10 = smov 48  ;;  %v242_v61 = vsel %vm14_vm2, %v574_v56, %v237_v55  ;;  %s639_s14 = smov 36   ;;  %v540_v17 = vld [vmem:[%s961_s0 + $0x80] sm:$0x1]  }
  0x16   :  { %v265_v57 = vsel %vm6_vm0, %v577_v52, %v576_v51  ;;  %v578_v58 = vld [vmem:[%s961_s0 + $0x8] ss:$16 sm:%s267_s24]   ;;  %v581_v59 = vld [vmem:[%s961_s0 + $0x7] ss:$16 sm:%s292_s25]   ;;  %s305_s20 = smov 192  ;;  %s333_s25 = smov 48 }
  0x17   :  { %220 = vrot.lane.b32.xlu1 %v570_v46, %s638_s27  ;;  %v582_v60 = vld [vmem:[%s961_s0 + $0x7] ss:$16 sm:%s295_s26]   ;;  %v270_v63 = vsel %vm10_vm1, %v578_v58, %v265_v57  ;;  %s358_s26 = smov 3  ;;  %s640_s28 = smov 32   ;;  %26 = vst.msk [vmem:[#allocation0 + $0x12] sm:$0x1] %vm16_vm3, %v540_v17  }
  0x18   :  { %v579_v0 = vld [vmem:[%s961_s0 + $0x8] ss:$16 sm:%s272_s5]   ;;  %v298_v1 = vsel %vm6_vm0, %v582_v60, %v581_v59  ;;  %v583_v2 = vld [vmem:[%s961_s0 + $0x7] ss:$16 sm:%s300_s10]   ;;  %s338_s6 = smov 192  ;;  %s394_s16 = smov 12 }
  0x19   :  { %210 = vrot.lane.b32.xlu0 %v209_v53, %s638_s27  ;;  %v586_v3 = vld [vmem:[%s961_s0 + $0x6] ss:$16 sm:%s325_s12]   ;;  %v275_v5 = vsel %vm14_vm2, %v579_v0, %v270_v63  ;;  %s361_s27 = smov 12  ;;  %v303_v7 = vsel %vm10_vm1, %v583_v2, %v298_v1  ;;  %s366_s12 = smov 48  ;;  %v595_v23 = vld [vmem:[%s961_s0 + $0x85] sm:$0x1]  }
  0x1a   :  { %v587_v4 = vld [vmem:[%s961_s0 + $0x6] ss:$16 sm:%s328_s13]   ;;  %v584_v8 = vld [vmem:[%s961_s0 + $0x7] ss:$16 sm:%s305_s20]   ;;  %s391_s13 = smov 3  ;;  %s641_s17 = smov 28  }
  0x1b   :  { %253 = vrot.lane.b32.xlu1 %v575_v54, %s639_s14  ;;  %v331_v9 = vsel %vm6_vm0, %v587_v4, %v586_v3  ;;  %v588_v10 = vld [vmem:[%s961_s0 + $0x6] ss:$16 sm:%s333_s25]   ;;  %v308_v13 = vsel %vm14_vm2, %v584_v8, %v303_v7  ;;  %s371_s23 = smov 192  ;;  %s424_s29 = smov 3  ;;  %v600_v34 = vld [vmem:[%s961_s0 + $0x84] sm:$0x1]  }
  0x1c   :  { %v591_v11 = vld [vmem:[%s961_s0 + $0x5] ss:$16 sm:%s358_s26]   ;;  %v336_v15 = vsel %vm10_vm1, %v588_v10, %v331_v9  ;;  %v589_v16 = vld [vmem:[%s961_s0 + $0x6] ss:$16 sm:%s338_s6]   ;;  %s404_s30 = smov 192  ;;  %s427_s2 = smov 12 }
  0x1d   :  { %243 = vrot.lane.b32.xlu0 %v242_v61, %s639_s14  ;;  %v592_v12 = vld [vmem:[%s961_s0 + $0x5] ss:$16 sm:%s361_s27]   ;;  %v341_v22 = vsel %vm14_vm2, %v589_v16, %v336_v15  ;;  %s642_s3 = smov 24   ;;  %s432_s8 = smov 48  ;;  %v605_v45 = vld [vmem:[%s961_s0 + $0x83] sm:$0x1]  }
  0x1e   :  { %v364_v18 = vsel %vm6_vm0, %v592_v12, %v591_v11  ;;  %v593_v19 = vld [vmem:[%s961_s0 + $0x5] ss:$16 sm:%s366_s12]   ;;  %v596_v20 = vld [vmem:[%s961_s0 + $0x4] ss:$16 sm:%s391_s13]   ;;  %s8_s9 = smov 48  ;;  %s457_s15 = smov 3 }
  0x1f   :  { %286 = vrot.lane.b32.xlu1 %v580_v62, %s640_s28  ;;  %v597_v21 = vld [vmem:[%s961_s0 + $0x4] ss:$16 sm:%s394_s16]   ;;  %v369_v24 = vsel %vm10_vm1, %v593_v19, %v364_v18  ;;  %s2_s16 = smov 3  ;;  %s12_s20 = smov 192  ;;  %v610_v56 = vld [vmem:[%s961_s0 + $0x82] sm:$0x1]  }
  0x20   :  { %v594_v25 = vld [vmem:[%s961_s0 + $0x5] ss:$16 sm:%s371_s23]   ;;  %v397_v26 = vsel %vm6_vm0, %v597_v21, %v596_v20  ;;  %v601_v28 = vld [vmem:[%s961_s0 + $0x3] ss:$16 sm:%s424_s29]   ;;  %s4_s21 = smov 12  ;;  %s460_s24 = smov 12 }
  0x21   :  { %276 = vrot.lane.b32.xlu0 %v275_v5, %s640_s28  ;;  %s399_s28 = smov 48  ;;  %v599_v29 = vld [vmem:[%s961_s0 + $0x4] ss:$16 sm:%s404_s30]   ;;  %v374_v31 = vsel %vm14_vm2, %v594_v25, %v369_v24  ;;  %s643_s27 = smov 20   ;;  %v615_v62 = vld [vmem:[%s961_s0 + $0x81] sm:$0x1]  }
  0x22   :  { %v598_v27 = vld [vmem:[%s961_s0 + $0x4] ss:$16 sm:%s399_s28]   ;;  %v602_v30 = vld [vmem:[%s961_s0 + $0x3] ss:$16 sm:%s427_s2]   ;;  %s437_s5 = smov 192  ;;  %s465_s13 = smov 48 }
  0x23   :  { %319 = vrot.lane.b32.xlu1 %v585_v6, %s641_s17  ;;  %v603_v32 = vld [vmem:[%s961_s0 + $0x3] ss:$16 sm:%s432_s8]   ;;  %v402_v35 = vsel %vm10_vm1, %v598_v27, %v397_v26  ;;  %v430_v38 = vsel %vm6_vm0, %v602_v30, %v601_v28  ;;  %s490_s14 = smov 3  ;;  %s470_s22 = smov 192  ;;  %vm113_vm6 = vcmask 458144   ;;  %vm146_vm7 = vcmask 425344  }
  0x24   :  { %v9_v33 = vld [vmem:[%s961_s0] ss:$16 sm:%s8_s9]   ;;  %v606_v36 = vld [vmem:[%s961_s0 + $0x2] ss:$16 sm:%s457_s15]   ;;  %v407_v43 = vsel %vm14_vm2, %v599_v29, %v402_v35  ;;  %s493_s15 = smov 12  ;;  %v435_v46 = vsel %vm10_vm1, %v603_v32, %v430_v38  ;;  %s645_s28 = smov 12  }
  0x25   :  { %309 = vrot.lane.b32.xlu0 %v308_v13, %s641_s17  ;;  %v3_v37 = vld [vmem:[%s961_s0] ss:$16 sm:%s2_s16]   ;;  %s644_s16 = smov 16   ;;  %s503_s6 = smov 192  ;;  %vm179_vm8 = vcmask 392544   ;;  %vm212_vm9 = vcmask 359744  }
  0x26   :  { %v13_v39 = vld [vmem:[%s961_s0] ss:$16 sm:%s12_s20]   ;;  %v607_v41 = vld [vmem:[%s961_s0 + $0x2] ss:$16 sm:%s460_s24]   ;;  %s646_s7 = smov 8   ;;  %vm245_vm10 = vcmask 326944  }
  0x27   :  { %352 = vrot.lane.b32.xlu1 %v590_v14, %s642_s3  ;;  %v5_v40 = vld [vmem:[%s961_s0] ss:$16 sm:%s4_s21]   ;;  %v463_v49 = vsel %vm6_vm0, %v607_v41, %v606_v36  ;;  %vm278_vm11 = vcmask 294144   ;;  %vm311_vm12 = vcmask 261344   ;;  %vm344_vm13 = vcmask 228544  }
  0x28   :  { %v7_v42 = vsel %vm6_vm0, %v5_v40, %v3_v37  ;;  %v604_v47 = vld [vmem:[%s961_s0 + $0x3] ss:$16 sm:%s437_s5]   ;;  %v608_v50 = vld [vmem:[%s961_s0 + $0x2] ss:$16 sm:%s465_s13]   ;;  %vm377_vm14 = vcmask 195744   ;;  %vm410_vm15 = vcmask 162944  }
  0x29   :  { %342 = vrot.lane.b32.xlu0 %v341_v22, %s642_s3  ;;  %v11_v44 = vsel %vm10_vm1, %v9_v33, %v7_v42  ;;  %v611_v51 = vld [vmem:[%s961_s0 + $0x1] ss:$16 sm:%s490_s14]   ;;  %v440_v53 = vsel %vm14_vm2, %v604_v47, %v435_v46  ;;  %v468_v54 = vsel %vm10_vm1, %v608_v50, %v463_v49 }
  0x2a   :  { %v15_v48 = vsel %vm14_vm2, %v13_v39, %v11_v44  ;;  %v612_v52 = vld [vmem:[%s961_s0 + $0x1] ss:$16 sm:%s493_s15]   ;;  %v609_v55 = vld [vmem:[%s961_s0 + $0x2] ss:$16 sm:%s470_s22]  }
  0x2b   :  { %385 = vrot.lane.b32.xlu1 %v595_v23, %s643_s27  ;;  %17 = vst.msk [vmem:[#allocation0] sm:$0x7] %vm16_vm3, %v15_v48   ;;  %19 = vst.msk [vmem:[#allocation0 + $0x5] sm:$0x38] %vm16_vm3, %v15_v48   ;;  %v496_v57 = vsel %vm6_vm0, %v612_v52, %v611_v51  ;;  %v473_v59 = vsel %vm14_vm2, %v609_v55, %v468_v54  ;;  %v614_v61 = vld [vmem:[%s961_s0 + $0x1] ss:$16 sm:%s503_s6]  }
  0x2c   :  { %21 = vst.msk [vmem:[#allocation0 + $0xa] sm:$0xc0] %vm16_vm3, %v15_v48   ;;  %vm443_vm0 = vcmask 130144  }
  0x2d   :  { %375 = vrot.lane.b32.xlu0 %v374_v31, %s643_s27  ;;  %s498_s27 = smov 48 }
  0x2e   :  { %v613_v58 = vld [vmem:[%s961_s0 + $0x1] ss:$16 sm:%s498_s27]   ;;  %s647_s0 = smov 4  }
  0x2f   :  { %418 = vrot.lane.b32.xlu1 %v600_v34, %s644_s16  ;;  %v501_v60 = vsel %vm10_vm1, %v613_v58, %v496_v57  ;;  %vm476_vm1 = vcmask 97344  }
  0x30   :  { %v506_v63 = vsel %vm14_vm2, %v614_v61, %v501_v60  ;;  %vm509_vm2 = vcmask 64544  }
  0x31   :  { %408 = vrot.lane.b32.xlu0 %v407_v43, %s644_s16 }
  0x33   :  { %451 = vrot.lane.b32.xlu1 %v605_v45, %s645_s28 }
  0x35   :  { %441 = vrot.lane.b32.xlu0 %v440_v53, %s645_s28 }
  0x37   :  { %484 = vrot.lane.b32.xlu1 %v610_v56, %s646_s7 }
  0x39   :  { %474 = vrot.lane.b32.xlu0 %v473_v59, %s646_s7 }
  0x3b   :  { %517 = vrot.lane.b32.xlu1 %v615_v62, %s647_s0 }
  0x3d   :  { %507 = vrot.lane.b32.xlu0 %v506_v63, %s647_s0 }
  0x74   :  { %v89_v0 = vpop.permute.xlu1 %88   ;;  %v56_v1 = vpop.permute.xlu0 %55  }
  0x75   :  { %59 = vst.msk [vmem:[#allocation0 + $0x12] sm:$0x1] %vm47_vm4, %v56_v1  }
  0x76   :  { %92 = vst.msk [vmem:[#allocation0 + $0x12] sm:$0x1] %vm80_vm5, %v89_v0  }
  0x79   :  { %v79_v2 = vpop.permute.xlu1 %78  }
  0x7b   :  { %v46_v3 = vpop.permute.xlu0 %45  }
  0x7c   :  { %48 = vst.msk [vmem:[#allocation0] sm:$0x7] %vm47_vm4, %v46_v3   ;;  %50 = vst.msk [vmem:[#allocation0 + $0x5] sm:$0x38] %vm47_vm4, %v46_v3  }
  0x7d   :  { %52 = vst.msk [vmem:[#allocation0 + $0xa] sm:$0xc0] %vm47_vm4, %v46_v3   ;;  %v122_v4 = vpop.permute.xlu1 %121  }
  0x7e   :  { %81 = vst.msk [vmem:[#allocation0] sm:$0x7] %vm80_vm5, %v79_v2   ;;  %83 = vst.msk [vmem:[#allocation0 + $0x5] sm:$0x38] %vm80_vm5, %v79_v2  }
  0x7f   :  { %85 = vst.msk [vmem:[#allocation0 + $0xa] sm:$0xc0] %vm80_vm5, %v79_v2   ;;  %v112_v5 = vpop.permute.xlu0 %111  }
  0x80   :  { %125 = vst.msk [vmem:[#allocation0 + $0x12] sm:$0x1] %vm113_vm6, %v122_v4   ;;  %114 = vst.msk [vmem:[#allocation0] sm:$0x7] %vm113_vm6, %v112_v5  }
  0x81   :  { %116 = vst.msk [vmem:[#allocation0 + $0x5] sm:$0x38] %vm113_vm6, %v112_v5   ;;  %118 = vst.msk [vmem:[#allocation0 + $0xa] sm:$0xc0] %vm113_vm6, %v112_v5   ;;  %v155_v6 = vpop.permute.xlu1 %154  }
  0x82   :  { %158 = vst.msk [vmem:[#allocation0 + $0x12] sm:$0x1] %vm146_vm7, %v155_v6  }
  0x83   :  { %v145_v7 = vpop.permute.xlu0 %144  }
  0x84   :  { %147 = vst.msk [vmem:[#allocation0] sm:$0x7] %vm146_vm7, %v145_v7   ;;  %149 = vst.msk [vmem:[#allocation0 + $0x5] sm:$0x38] %vm146_vm7, %v145_v7  }
  0x85   :  { %151 = vst.msk [vmem:[#allocation0 + $0xa] sm:$0xc0] %vm146_vm7, %v145_v7   ;;  %v188_v8 = vpop.permute.xlu1 %187  }
  0x86   :  { %191 = vst.msk [vmem:[#allocation0 + $0x12] sm:$0x1] %vm179_vm8, %v188_v8  }
  0x87   :  { %v178_v9 = vpop.permute.xlu0 %177  }
  0x88   :  { %180 = vst.msk [vmem:[#allocation0] sm:$0x7] %vm179_vm8, %v178_v9   ;;  %182 = vst.msk [vmem:[#allocation0 + $0x5] sm:$0x38] %vm179_vm8, %v178_v9  }
  0x89   :  { %184 = vst.msk [vmem:[#allocation0 + $0xa] sm:$0xc0] %vm179_vm8, %v178_v9   ;;  %v221_v10 = vpop.permute.xlu1 %220  }
  0x8a   :  { %224 = vst.msk [vmem:[#allocation0 + $0x12] sm:$0x1] %vm212_vm9, %v221_v10  }
  0x8b   :  { %v211_v11 = vpop.permute.xlu0 %210  }
  0x8c   :  { %213 = vst.msk [vmem:[#allocation0] sm:$0x7] %vm212_vm9, %v211_v11   ;;  %215 = vst.msk [vmem:[#allocation0 + $0x5] sm:$0x38] %vm212_vm9, %v211_v11  }
  0x8d   :  { %217 = vst.msk [vmem:[#allocation0 + $0xa] sm:$0xc0] %vm212_vm9, %v211_v11   ;;  %v254_v12 = vpop.permute.xlu1 %253  }
  0x8e   :  { %257 = vst.msk [vmem:[#allocation0 + $0x12] sm:$0x1] %vm245_vm10, %v254_v12  }
  0x8f   :  { %v244_v13 = vpop.permute.xlu0 %243  }
  0x90   :  { %246 = vst.msk [vmem:[#allocation0] sm:$0x7] %vm245_vm10, %v244_v13   ;;  %248 = vst.msk [vmem:[#allocation0 + $0x5] sm:$0x38] %vm245_vm10, %v244_v13  }
  0x91   :  { %250 = vst.msk [vmem:[#allocation0 + $0xa] sm:$0xc0] %vm245_vm10, %v244_v13   ;;  %v287_v14 = vpop.permute.xlu1 %286  }
  0x92   :  { %290 = vst.msk [vmem:[#allocation0 + $0x12] sm:$0x1] %vm278_vm11, %v287_v14  }
  0x93   :  { %v277_v15 = vpop.permute.xlu0 %276  }
  0x94   :  { %279 = vst.msk [vmem:[#allocation0] sm:$0x7] %vm278_vm11, %v277_v15   ;;  %281 = vst.msk [vmem:[#allocation0 + $0x5] sm:$0x38] %vm278_vm11, %v277_v15  }
  0x95   :  { %283 = vst.msk [vmem:[#allocation0 + $0xa] sm:$0xc0] %vm278_vm11, %v277_v15   ;;  %v320_v16 = vpop.permute.xlu1 %319  }
  0x96   :  { %323 = vst.msk [vmem:[#allocation0 + $0x12] sm:$0x1] %vm311_vm12, %v320_v16  }
  0x97   :  { %v310_v17 = vpop.permute.xlu0 %309  }
  0x98   :  { %312 = vst.msk [vmem:[#allocation0] sm:$0x7] %vm311_vm12, %v310_v17   ;;  %314 = vst.msk [vmem:[#allocation0 + $0x5] sm:$0x38] %vm311_vm12, %v310_v17  }
  0x99   :  { %316 = vst.msk [vmem:[#allocation0 + $0xa] sm:$0xc0] %vm311_vm12, %v310_v17   ;;  %v353_v18 = vpop.permute.xlu1 %352  }
  0x9a   :  { %356 = vst.msk [vmem:[#allocation0 + $0x12] sm:$0x1] %vm344_vm13, %v353_v18  }
  0x9b   :  { %v343_v19 = vpop.permute.xlu0 %342  }
  0x9c   :  { %345 = vst.msk [vmem:[#allocation0] sm:$0x7] %vm344_vm13, %v343_v19   ;;  %347 = vst.msk [vmem:[#allocation0 + $0x5] sm:$0x38] %vm344_vm13, %v343_v19  }
  0x9d   :  { %349 = vst.msk [vmem:[#allocation0 + $0xa] sm:$0xc0] %vm344_vm13, %v343_v19   ;;  %v386_v20 = vpop.permute.xlu1 %385  }
  0x9e   :  { %389 = vst.msk [vmem:[#allocation0 + $0x12] sm:$0x1] %vm377_vm14, %v386_v20  }
  0x9f   :  { %v376_v21 = vpop.permute.xlu0 %375  }
  0xa0   :  { %378 = vst.msk [vmem:[#allocation0] sm:$0x7] %vm377_vm14, %v376_v21   ;;  %380 = vst.msk [vmem:[#allocation0 + $0x5] sm:$0x38] %vm377_vm14, %v376_v21  }
  0xa1   :  { %382 = vst.msk [vmem:[#allocation0 + $0xa] sm:$0xc0] %vm377_vm14, %v376_v21   ;;  %v419_v22 = vpop.permute.xlu1 %418  }
  0xa2   :  { %422 = vst.msk [vmem:[#allocation0 + $0x12] sm:$0x1] %vm410_vm15, %v419_v22  }
  0xa3   :  { %v409_v23 = vpop.permute.xlu0 %408  }
  0xa4   :  { %411 = vst.msk [vmem:[#allocation0] sm:$0x7] %vm410_vm15, %v409_v23   ;;  %413 = vst.msk [vmem:[#allocation0 + $0x5] sm:$0x38] %vm410_vm15, %v409_v23  }
  0xa5   :  { %415 = vst.msk [vmem:[#allocation0 + $0xa] sm:$0xc0] %vm410_vm15, %v409_v23   ;;  %v452_v24 = vpop.permute.xlu1 %451  }
  0xa6   :  { %455 = vst.msk [vmem:[#allocation0 + $0x12] sm:$0x1] %vm443_vm0, %v452_v24  }
  0xa7   :  { %v442_v25 = vpop.permute.xlu0 %441  }
  0xa8   :  { %444 = vst.msk [vmem:[#allocation0] sm:$0x7] %vm443_vm0, %v442_v25   ;;  %446 = vst.msk [vmem:[#allocation0 + $0x5] sm:$0x38] %vm443_vm0, %v442_v25  }
  0xa9   :  { %448 = vst.msk [vmem:[#allocation0 + $0xa] sm:$0xc0] %vm443_vm0, %v442_v25   ;;  %v485_v26 = vpop.permute.xlu1 %484  }
  0xaa   :  { %488 = vst.msk [vmem:[#allocation0 + $0x12] sm:$0x1] %vm476_vm1, %v485_v26  }
  0xab   :  { %v475_v27 = vpop.permute.xlu0 %474  }
  0xac   :  { %477 = vst.msk [vmem:[#allocation0] sm:$0x7] %vm476_vm1, %v475_v27   ;;  %479 = vst.msk [vmem:[#allocation0 + $0x5] sm:$0x38] %vm476_vm1, %v475_v27  }
  0xad   :  { %481 = vst.msk [vmem:[#allocation0 + $0xa] sm:$0xc0] %vm476_vm1, %v475_v27   ;;  %v518_v28 = vpop.permute.xlu1 %517  }
  0xae   :  { %521 = vst.msk [vmem:[#allocation0 + $0x12] sm:$0x1] %vm509_vm2, %v518_v28  }
  0xaf   :  { %v508_v29 = vpop.permute.xlu0 %507  }
  0xb0   :  { %510 = vst.msk [vmem:[#allocation0] sm:$0x7] %vm509_vm2, %v508_v29   ;;  %512 = vst.msk [vmem:[#allocation0 + $0x5] sm:$0x38] %vm509_vm2, %v508_v29  }
  0xb1   :  { %514 = vst.msk [vmem:[#allocation0 + $0xa] sm:$0xc0] %vm509_vm2, %v508_v29  }
  0xb7   :  { %v525_v30 = vld [vmem:[#allocation0] sm:$0xf]  ;;  %v529_v31 = vld [vmem:[#allocation0 + $0x8] sm:$0xf] }
  0xb8   :  { %v534_v32 = vld [vmem:[#allocation0 + $0x10] sm:$0xf]  ;;  %527 = vst [vmem:[%s962_s1] sm:$0xf] %v525_v30  ;;  %616 = vst [vmem:[%s962_s1 + $0x4] sm:$0xf] %v529_v31 }
  0xb9   :  { %617 = vst [vmem:[%s962_s1 + $0x8] sm:$0xf] %v534_v32 }

// kernel: mixed_op_forward.1
= control target key start
LH: loop header
LB: loop body
LE: loop exit
PB: predicated region body
PF: predicated region fallthrough
CT: control target
= control target key end

     0   :  { %16 = vsyncpa [#allocation8], 0  ;;  %s4816_s0 = inlined_call_operand.vmem [shape: f32[6], index: 0, kind: input, shape index: {}]   ;;  %s4817_s1 = inlined_call_operand.vmem [shape: f32[2,20,80], index: 1, kind: input, shape index: {}]   ;;  %s4818_s2 = inlined_call_operand.vmem [shape: f32[20,80], index: 2, kind: input, shape index: {}]   ;;  %s4819_s3 = inlined_call_operand.vmem [shape: f32[16,64], index: 3, kind: input, shape index: {}]   ;;  %s4820_s4 = inlined_call_operand.vmem [shape: f32[3,3,64], index: 4, kind: input, shape index: {}]   ;;  %s4821_s5 = inlined_call_operand.vmem [shape: f32[64,64], index: 5, kind: input, shape index: {}]   ;;  %s4822_s6 = inlined_call_operand.vmem [shape: f32[3,3,64], index: 6, kind: input, shape index: {}]   ;;  %s4823_s7 = inlined_call_operand.vmem [shape: f32[64,64], index: 7, kind: input, shape index: {}]   ;;  %s4824_s8 = inlined_call_operand.vmem [shape: f32[3,3,64], index: 8, kind: input, shape index: {}]   ;;  %s4825_s9 = inlined_call_operand.vmem [shape: f32[64,64], index: 9, kind: input, shape index: {}]   ;;  %s4826_s10 = inlined_call_operand.vmem [shape: f32[64,64], index: 10, kind: input, shape index: {}]   ;;  %s4827_s11 = inlined_call_operand.vmem [shape: f32[2,16,64], index: 11, kind: output, shape index: {}]  }
   0x1   :  { %s23_s19 = sshll.u32 %s4816_s0, 4  ;;  %s24_s19 = int_to_ptr.vmem [resolvable:$true] %s23_s19 }
   0x2   :  { %s3392_s20 = scalar_lea.vmem %s24_s19, 16  ;;  %p3397_p1 = scmp.lt.s32.totalorder %s24_s19, %s24_s19 }
   0x3   :  { %p3393_p0 = scmp.ne.s32.totalorder %s24_s19, %s3392_s20  ;;  %p3398_p2 = scmp.lt.s32.totalorder %s3392_s20, %s3392_s20 }
   0x5   :  { %p3399_p3 = por %p3398_p2, %p3397_p1 }
   0x7   :  { %p3400_p4 = pnand %p3399_p3, %p3393_p0 }
   0x9   :  { %3403 = shalt.err (!%p3400_p4)
}
   0xa   :  { %s3406_s21 = smov [#allocation7]  }
   0xb   :  { %26 = dma.vmem_to_smem %s24_s19, 16, %s3406_s21, [#allocation8]  }
   0xc   :  { %3404 = dma.done.wait [#allocation8], 16  }
   0xd   :  { %3405 = vsyncadd [#allocation8], 4294967280 }
   0xe   :  { %50 = sfence }
   0xf   :  { %v2914_v0 = vld [vmem:[%s4820_s4 + $0x1] ss:$0 sm:$0xff]  ;;  %s3407_s24 = smov 8   ;;  %v2923_v1 = vld [vmem:[%s4820_s4 + $0x5] ss:$0 sm:$0xff]  ;;  %s3408_s30 = smov 12  }
  0x10   :  { %131 = vrot.lane.b32.xlu0 %v2914_v0, %s3407_s24  ;;  %v2916_v2 = vld [vmem:[%s4820_s4 + $0x2] ss:$0 sm:$0xff]  ;;  %364 = vrot.lane.b32.xlu1 %v2923_v1, %s3407_s24  ;;  %v2927_v3 = vld [vmem:[%s4820_s4 + $0x6] ss:$0 sm:$0xff]  ;;  %s3409_s20 = smov 4   ;;  %s3410_s29 = smov 16  }
  0x11   :  { %v2935_v4 = vld [vmem:[%s4820_s4 + $0x9] ss:$0 sm:$0xff]  ;;  %v2939_v5 = vld [vmem:[%s4820_s4 + $0xa] ss:$0 sm:$0xff]  ;;  %v2912_v6 = vld [vmem:[%s4820_s4] ss:$0 sm:$0xff] }
  0x12   :  { %v2919_v7 = vld [vmem:[%s4820_s4 + $0x4] ss:$0 sm:$0xff]  ;;  %v2931_v8 = vld [vmem:[%s4820_s4 + $0x8] ss:$0 sm:$0xff]  ;;  %v2915_v9 = vld [vmem:[%s4824_s8 + $0x1] ss:$0 sm:$0xff] }
  0x13   :  { %v3523_v10 = vld [vmem:[%s4824_s8 + $0xa] ss:$0 sm:$0xff]  ;;  %v2917_v11 = vld [vmem:[%s4824_s8 + $0x2] ss:$0 sm:$0xff]  ;;  %v2925_v12 = vld [vmem:[%s4824_s8 + $0x5] ss:$0 sm:$0xff] }
  0x14   :  { %203 = vrot.lane.b32.xlu0 %v2916_v2, %s3408_s30  ;;  %448 = vrot.lane.b32.xlu1 %v2927_v3, %s3408_s30  ;;  %v2929_v13 = vld [vmem:[%s4824_s8 + $0x6] ss:$0 sm:$0xff]  ;;  %v2937_v14 = vld [vmem:[%s4824_s8 + $0x9] ss:$0 sm:$0xff]  ;;  %s3411_s23 = smov 124   ;;  %s3412_s26 = smov 120  }
  0x15   :  { %v57_v15 = vld [vmem:[%s4817_s1 + $0x8] sm:$0xff]  ;;  %v56_v16 = vld [vmem:[%s4817_s1] sm:$0xff]  ;;  %v58_v19 = vld [vmem:[%s4817_s1 + $0x10] sm:$0xf]  ;;  %vm262_vm0 = vcmask 1046528   ;;  %vm324_vm1 = vcmask 1045504  }
  0x16   :  { %v3557_v17 = vmax.f32 %v57_v15, 0.0  ;;  %v3559_v18 = vmax.f32 %v56_v16, 0.0  ;;  %v3566_v23 = vmax.f32 %v58_v19, 0.0  ;;  %v2946_v29 = vld [vmem:[%s4817_s1 + $0x18] sm:$0xff]  ;;  %v2948_v32 = vld [vmem:[%s4817_s1 + $0x28] sm:$0xf] }
  0x17   :  { %v2947_v33 = vld [vmem:[%s4817_s1 + $0x20] sm:$0xff]  ;;  %v3584_v34 = vmax.f32 %v2946_v29, 0.0  ;;  %v3587_v36 = vmax.f32 %v2948_v32, 0.0  ;;  %s3413_s25 = smov 112   ;;  %vm580_vm2 = vcmask 1043456   ;;  %vm826_vm3 = vcmask 523264  }
  0x18   :  { %620 = vrot.lane.b32.xlu0 %v2935_v4, %s3407_s24  ;;  %704 = vrot.lane.b32.xlu1 %v2939_v5, %s3408_s30  ;;  %v3589_v37 = vmax.f32 %v2947_v33, 0.0  ;;  %vm3415_vm4 = vmmov 0   ;;  %vm66_vm5 = vcmask 1040384   ;;  %vm249_vm6 = vcmask 1041408   ;;  %s2909_s0 = sld [smem:[#allocation7 + $0x3]]  ;;  %s2910_s16 = sld [smem:[#allocation7 + $0x4]] }
  0x19   :  { %vm506_vm7 = vcmask 1042432   ;;  %vm2153_vm8 = vcmask 588800   ;;  %vm2156_vm9 = vcmask 582656   ;;  %vm2182_vm10 = vcmask 556064  }
  0x1a   :  { %vm824_vm11 = vcmask 523265   ;;  %vm828_vm12 = vcmask 516096  }
  0x1c   :  { %1137 = vrot.lane.b32.xlu0 %v2914_v0, %s3407_s24  ;;  %1209 = vrot.lane.b32.xlu1 %v2916_v2, %s3408_s30 }
  0x20   :  { %1365 = vrot.lane.b32.xlu0 %v2923_v1, %s3407_s24  ;;  %1449 = vrot.lane.b32.xlu1 %v2927_v3, %s3408_s30 }
  0x24   :  { %1617 = vrot.lane.b32.xlu0 %v2935_v4, %s3407_s24  ;;  %1701 = vrot.lane.b32.xlu1 %v2939_v5, %s3408_s30 }
  0x28   :  { %82 = vrot.lane.b32.xlu0 %v2912_v6, %s3409_s20  ;;  %292 = vrot.lane.b32.xlu1 %v2919_v7, %s3409_s20 }
  0x2c   :  { %548 = vrot.lane.b32.xlu0 %v2931_v8, %s3409_s20  ;;  %158 = vrot.lane.b32.xlu1 %v2915_v9, %s3407_s24 }
  0x30   :  { %736 = vrot.lane.b32.xlu0 %v3523_v10, %s3410_s29  ;;  %230 = vrot.lane.b32.xlu1 %v2917_v11, %s3410_s29 }
  0x34   :  { %1164 = vrot.lane.b32.xlu0 %v2915_v9, %s3407_s24  ;;  %396 = vrot.lane.b32.xlu1 %v2925_v12, %s3407_s24 }
  0x38   :  { %1236 = vrot.lane.b32.xlu0 %v2917_v11, %s3410_s29  ;;  %480 = vrot.lane.b32.xlu1 %v2929_v13, %s3410_s29 }
  0x3c   :  { %1397 = vrot.lane.b32.xlu0 %v2925_v12, %s3407_s24  ;;  %652 = vrot.lane.b32.xlu1 %v2937_v14, %s3407_s24 }
  0x40   :  { %1481 = vrot.lane.b32.xlu0 %v2929_v13, %s3410_s29  ;;  %1088 = vrot.lane.b32.xlu1 %v2912_v6, %s3409_s20 }
  0x44   :  { %1649 = vrot.lane.b32.xlu0 %v2937_v14, %s3407_s24  ;;  %1295 = vrot.lane.b32.xlu1 %v2919_v7, %s3409_s20 }
  0x48   :  { %1547 = vrot.lane.b32.xlu1 %v2931_v8, %s3409_s20 }
  0x82   :  { %v132_v20 = vpop.permute.xlu0 %131  ;;  %v365_v24 = vpop.permute.xlu1 %364 }
  0x83   :  { %v135_v21 = vmul.f32 %v132_v20, %v3557_v17  ;;  %v134_v22 = vmul.f32 %v132_v20, %v3559_v18  ;;  %v136_v27 = vmul.f32 %v132_v20, %v3566_v23  ;;  %v369_v47 = vmul.f32 %v365_v24, %v3566_v23 }
  0x84   :  { %v367_v60 = vmul.f32 %v365_v24, %v3559_v18  ;;  %v368_v61 = vmul.f32 %v365_v24, %v3557_v17 }
  0x85   :  { %142 = vrot.lane.b32.xlu1 %v135_v21, %s3411_s23  ;;  %140 = vrot.lane.b32.xlu0 %v134_v22, %s3411_s23  ;;  %v376_v51 = vrot.slane %v369_v47, 1 }
  0x86   :  { %v204_v25 = vpop.permute.xlu0 %203  ;;  %v449_v28 = vpop.permute.xlu1 %448  ;;  %v373_v2 = vrot.slane %v367_v60, 1  ;;  %v374_v3 = vrot.slane %v368_v61, 1 }
  0x87   :  { %v206_v26 = vmul.f32 %v204_v25, %v3559_v18  ;;  %v207_v30 = vmul.f32 %v204_v25, %v3557_v17  ;;  %v208_v40 = vmul.f32 %v204_v25, %v3566_v23  ;;  %v453_v52 = vmul.f32 %v449_v28, %v3566_v23 }
  0x88   :  { %v451_v4 = vmul.f32 %v449_v28, %v3559_v18  ;;  %v452_v5 = vmul.f32 %v449_v28, %v3557_v17  ;;  %v375_v6 = vsel %vm262_vm0, %v373_v2, %v374_v3  ;;  %v377_v7 = vsel %vm262_vm0, %v374_v3, %v376_v51  ;;  %v929_v3 = vld [vmem:[%s4825_s9] sm:$0xff] }
  0x89   :  { %212 = vrot.lane.b32.xlu1 %v206_v26, %s3412_s26  ;;  %144 = vrot.lane.b32.xlu0 %v136_v27, %s3411_s23  ;;  %v460_v56 = vrot.slane %v453_v52, 1 }
  0x8a   :  { %v621_v31 = vpop.permute.xlu0 %620  ;;  %v705_v35 = vpop.permute.xlu1 %704  ;;  %v457_v11 = vrot.slane %v451_v4, 1  ;;  %v458_v12 = vrot.slane %v452_v5, 1  ;;  %v930_v4 = vld [vmem:[%s4825_s9 + $0x8] sm:$0xff] }
  0x8b   :  { %v625_v57 = vmul.f32 %v621_v31, %v3566_v23  ;;  %v709_v63 = vmul.f32 %v705_v35, %v3566_v23  ;;  %v623_v8 = vmul.f32 %v621_v31, %v3559_v18  ;;  %v624_v9 = vmul.f32 %v621_v31, %v3557_v17 }
  0x8c   :  { %v707_v13 = vmul.f32 %v705_v35, %v3559_v18  ;;  %v708_v14 = vmul.f32 %v705_v35, %v3557_v17  ;;  %v459_v16 = vsel %vm262_vm0, %v457_v11, %v458_v12  ;;  %v461_v19 = vsel %vm262_vm0, %v458_v12, %v460_v56 }
  0x8d   :  { %214 = vrot.lane.b32.xlu0 %v207_v30, %s3412_s26  ;;  %v632_v62 = vrot.slane %v625_v57, 2  ;;  %v716_v1 = vrot.slane %v709_v63, 2  ;;  %v629_v20 = vrot.slane %v623_v8, 2  ;;  %v630_v21 = vrot.slane %v624_v9, 2 }
  0x8e   :  { %v1138_v38 = vpop.permute.xlu0 %1137  ;;  %v1210_v43 = vpop.permute.xlu1 %1209  ;;  %v714_v22 = vrot.slane %v708_v14, 2  ;;  %v713_v24 = vrot.slane %v707_v13, 2  ;;  %v3709_v9 = vpack.c.bf16 %v930_v4, %v929_v3 }
  0x8f   :  { %v1140_v39 = vmul.f32 %v1138_v38, %v3584_v34  ;;  %v1142_v41 = vmul.f32 %v1138_v38, %v3587_v36  ;;  %v1141_v42 = vmul.f32 %v1138_v38, %v3589_v37  ;;  %v1213_v44 = vmul.f32 %v1210_v43, %v3589_v37 }
  0x90   :  { %v1212_v45 = vmul.f32 %v1210_v43, %v3584_v34  ;;  %v1214_v50 = vmul.f32 %v1210_v43, %v3587_v36  ;;  %v631_v27 = vsel %vm324_vm1, %v629_v20, %v630_v21  ;;  %v633_v28 = vsel %vm324_vm1, %v630_v21, %v632_v62  ;;  %3268 = vmatprep.subr.bf16.mxu1 %v3709_v9 }
  0x91   :  { %1146 = vrot.lane.b32.xlu1 %v1140_v39, %s3411_s23  ;;  %216 = vrot.lane.b32.xlu0 %v208_v40, %s3412_s26  ;;  %v717_v32 = vsel %vm324_vm1, %v714_v22, %v716_v1  ;;  %v715_v33 = vsel %vm324_vm1, %v713_v24, %v714_v22 }
  0x92   :  { %v1366_v46 = vpop.permute.xlu0 %1365  ;;  %v1450_v49 = vpop.permute.xlu1 %1449  ;;  %3270 = vmatpush3.bf16.msra.mxu1 %v3709_v9 }
  0x93   :  { %v3605_v48 = vmul.f32 %v1366_v46, %v3587_v36  ;;  %v3613_v54 = vmul.f32 %v1450_v49, %v3587_v36  ;;  %v1368_v25 = vmul.f32 %v1366_v46, %v3584_v34  ;;  %v1369_v26 = vmul.f32 %v1366_v46, %v3589_v37 }
  0x94   :  { %v1452_v30 = vmul.f32 %v1450_v49, %v3584_v34  ;;  %v1453_v31 = vmul.f32 %v1450_v49, %v3589_v37 }
  0x95   :  { %1150 = vrot.lane.b32.xlu1 %v1142_v41, %s3411_s23  ;;  %1148 = vrot.lane.b32.xlu0 %v1141_v42, %s3411_s23  ;;  %v1377_v53 = vrot.slane %v3605_v48, 1  ;;  %v1461_v58 = vrot.slane %v3613_v54, 1  ;;  %v1375_v35 = vrot.slane %v1369_v26, 1  ;;  %v1374_v38 = vrot.slane %v1368_v25, 1 }
  0x96   :  { %v1618_v55 = vpop.permute.xlu0 %1617  ;;  %v1702_v15 = vpop.permute.xlu1 %1701  ;;  %v1459_v39 = vrot.slane %v1453_v31, 1  ;;  %v1458_v40 = vrot.slane %v1452_v30, 1 }
  0x97   :  { %v3622_v59 = vmul.f32 %v1618_v55, %v3587_v36  ;;  %v1620_v42 = vmul.f32 %v1618_v55, %v3584_v34  ;;  %v1621_v43 = vmul.f32 %v1618_v55, %v3589_v37  ;;  %v1704_v46 = vmul.f32 %v1702_v15, %v3584_v34 }
  0x98   :  { %v1705_v47 = vmul.f32 %v1702_v15, %v3589_v37  ;;  %v1706_v49 = vmul.f32 %v1702_v15, %v3587_v36  ;;  %v1460_v48 = vsel %vm262_vm0, %v1458_v40, %v1459_v39  ;;  %v932_v15 = vld [vmem:[%s4825_s9 + $0x18] sm:$0xff] }
  0x99   :  { %1220 = vrot.lane.b32.xlu1 %v1213_v44, %s3412_s26  ;;  %1218 = vrot.lane.b32.xlu0 %v1212_v45, %s3412_s26  ;;  %v1629_v0 = vrot.slane %v3622_v59, 2  ;;  %v1378_v44 = vsel %vm262_vm0, %v1375_v35, %v1377_v53  ;;  %v1376_v45 = vsel %vm262_vm0, %v1374_v38, %v1375_v35  ;;  %v1626_v52 = vrot.slane %v1620_v42, 2  ;;  %v935_v42 = vld [vmem:[%s4825_s9 + $0x30] sm:$0xff] }
  0x9a   :  { %v3656_v29 = vpop.permute.xlu1 %292  ;;  %v3681_v55 = vpop.permute.xlu0 %82  ;;  %v1713_v57 = vrot.slane %v1706_v49, 2  ;;  %v1710_v60 = vrot.slane %v1704_v46, 2 }
  0x9d   :  { %1222 = vrot.lane.b32.xlu1 %v1214_v50, %s3412_s26  ;;  %382 = vrot.lane.b32.xlu0 %v376_v51, %s3411_s23  ;;  %v1462_v50 = vsel %vm262_vm0, %v1459_v39, %v1461_v58  ;;  %v1627_v51 = vrot.slane %v1621_v43, 2  ;;  %v936_v43 = vld [vmem:[%s4825_s9 + $0x38] sm:$0xff] }
  0x9e   :  { %v159_v41 = vpop.permute.xlu1 %158 }
  0x9f   :  { %v1630_v54 = vsel %vm324_vm1, %v1627_v51, %v1629_v0  ;;  %v161_v59 = vmul.f32 %v159_v41, %v3559_v18  ;;  %v162_v5 = vmul.f32 %v159_v41, %v3557_v17 }
  0xa1   :  { %1383 = vrot.lane.b32.xlu1 %v1377_v53, %s3411_s23  ;;  %466 = vrot.lane.b32.xlu0 %v460_v56, %s3412_s26  ;;  %v1711_v56 = vrot.slane %v1705_v47, 2  ;;  %v3758_v47 = vpack.c.bf16 %v936_v43, %v935_v42 }
  0xa2   :  { %v231_v53 = vpop.permute.xlu1 %230 }
  0xa3   :  { %v1714_v61 = vsel %vm324_vm1, %v1711_v56, %v1713_v57  ;;  %v233_v11 = vmul.f32 %v231_v53, %v3559_v18  ;;  %v234_v12 = vmul.f32 %v231_v53, %v3557_v17 }
  0xa5   :  { %1467 = vrot.lane.b32.xlu1 %v1461_v58, %s3412_s26  ;;  %638 = vrot.lane.b32.xlu0 %v632_v62, %s3411_s23  ;;  %v1628_v58 = vsel %vm324_vm1, %v1626_v52, %v1627_v51  ;;  %v1712_v62 = vsel %vm324_vm1, %v1710_v60, %v1711_v56 }
  0xa6   :  { %v397_v63 = vpop.permute.xlu1 %396 }
  0xa7   :  { %v401_v2 = vmul.f32 %v397_v63, %v3566_v23 }
  0xa9   :  { %1635 = vrot.lane.b32.xlu1 %v1629_v0, %s3411_s23  ;;  %722 = vrot.lane.b32.xlu0 %v716_v1, %s3412_s26  ;;  %v3691_v1 = vpop.permute.xlu0 %548  ;;  %v400_v0 = vmul.f32 %v397_v63, %v3557_v17  ;;  %v408_v14 = vrot.slane %v401_v2, 2 }
  0xab   :  { %v406_v13 = vrot.slane %v400_v0, 2 }
  0xad   :  { %378 = vrot.lane.b32.xlu1 %v375_v6, %s3411_s23  ;;  %380 = vrot.lane.b32.xlu0 %v377_v7, %s3411_s23  ;;  %v399_v6 = vmul.f32 %v397_v63, %v3559_v18  ;;  %v481_v7 = vpop.permute.xlu1 %480  ;;  %v737_v8 = vpop.permute.xlu0 %736  ;;  %v409_v26 = vsel %vm324_vm1, %v406_v13, %v408_v14 }
  0xae   :  { %v483_v22 = vmul.f32 %v481_v7, %v3559_v18  ;;  %v739_v41 = vmul.f32 %v737_v8, %v3559_v18 }
  0xaf   :  { %v405_v20 = vrot.slane %v399_v6, 2 }
  0xb0   :  { %v489_v40 = vrot.slane %v483_v22, 2  ;;  %v745_v56 = vrot.slane %v739_v41, 4 }
  0xb1   :  { %462 = vrot.lane.b32.xlu1 %v459_v16, %s3412_s26  ;;  %464 = vrot.lane.b32.xlu0 %v461_v19, %s3412_s26  ;;  %v484_v16 = vmul.f32 %v481_v7, %v3557_v17  ;;  %v485_v19 = vmul.f32 %v481_v7, %v3566_v23  ;;  %v653_v24 = vpop.permute.xlu1 %652  ;;  %v1165_v25 = vpop.permute.xlu0 %1164  ;;  %v407_v30 = vsel %vm324_vm1, %v405_v20, %v406_v13  ;;  %v832_v20 = vld [vmem:[%s4821_s5 + $0x10] sm:$0xff] }
  0xb2   :  { %v655_v35 = vmul.f32 %v653_v24, %v3559_v18  ;;  %v656_v38 = vmul.f32 %v653_v24, %v3557_v17  ;;  %v657_v39 = vmul.f32 %v653_v24, %v3566_v23  ;;  %v1167_v7 = vmul.f32 %v1165_v25, %v3584_v34 }
  0xb3   :  { %v490_v31 = vrot.slane %v484_v16, 2  ;;  %v830_v16 = vld [vmem:[%s4821_s5] sm:$0xff] }
  0xb4   :  { %v661_v51 = vrot.slane %v655_v35, 4 }
  0xb5   :  { %634 = vrot.lane.b32.xlu1 %v631_v27, %s3411_s23  ;;  %636 = vrot.lane.b32.xlu0 %v633_v28, %s3411_s23  ;;  %v933_v27 = vld [vmem:[%s4825_s9 + $0x20] sm:$0xff]  ;;  %v934_v28 = vld [vmem:[%s4825_s9 + $0x28] sm:$0xff]  ;;  %v1237_v46 = vpop.permute.xlu0 %1236  ;;  %v491_v49 = vsel %vm324_vm1, %v489_v40, %v490_v31  ;;  %v3778_v4 = vpop.permute.xlu1 %1088 }
  0xb6   :  { %v1240_v0 = vmul.f32 %v1237_v46, %v3589_v37  ;;  %v1239_v13 = vmul.f32 %v1237_v46, %v3584_v34 }
  0xb9   :  { %720 = vrot.lane.b32.xlu1 %v717_v32, %s3412_s26  ;;  %718 = vrot.lane.b32.xlu0 %v715_v33, %s3412_s26  ;;  %v492_v32 = vrot.slane %v485_v19, 2  ;;  %v3740_v33 = vpack.c.bf16 %v934_v28, %v933_v27  ;;  %v1398_v60 = vpop.permute.xlu0 %1397  ;;  %v831_v19 = vld [vmem:[%s4821_s5 + $0x8] sm:$0xff]  ;;  %v834_v27 = vld [vmem:[%s4821_s5 + $0x20] sm:$0xff] }
  0xba   :  { %v1402_v63 = vmul.f32 %v1398_v60, %v3587_v36  ;;  %v3811_v24 = vpack.c.bf16 %v831_v19, %v830_v16  ;;  %v835_v28 = vld [vmem:[%s4821_s5 + $0x28] sm:$0xff] }
  0xbb   :  { %v3838_v40 = vpack.c.bf16 %v835_v28, %v834_v27 }
  0xbc   :  { %v1409_v3 = vrot.slane %v1402_v63, 2  ;;  %3252 = vmatprep.subr.bf16.mxu0 %v3811_v24  ;;  %v295_v63 = vmul.f32 %v3656_v29, %v3559_v18 }
  0xbd   :  { %1381 = vrot.lane.b32.xlu1 %v1378_v44, %s3411_s23  ;;  %1379 = vrot.lane.b32.xlu0 %v1376_v45, %s3411_s23  ;;  %v740_v44 = vmul.f32 %v737_v8, %v3557_v17  ;;  %v493_v45 = vsel %vm324_vm1, %v490_v31, %v492_v32 }
  0xbe   :  { %3254 = vmatpush3.bf16.msra.mxu0 %v3811_v24 }
  0xc1   :  { %1465 = vrot.lane.b32.xlu1 %v1462_v50, %s3412_s26  ;;  %1463 = vrot.lane.b32.xlu0 %v1460_v48, %s3412_s26  ;;  %v662_v50 = vrot.slane %v656_v38, 4  ;;  %v664_v48 = vrot.slane %v657_v39, 4 }
  0xc3   :  { %v665_v52 = vsel %vm580_vm2, %v662_v50, %v664_v48  ;;  %v663_v53 = vsel %vm580_vm2, %v661_v51, %v662_v50 }
  0xc5   :  { %1633 = vrot.lane.b32.xlu1 %v1630_v54, %s3411_s23  ;;  %1631 = vrot.lane.b32.xlu0 %v1628_v58, %s3411_s23  ;;  %v741_v54 = vmul.f32 %v737_v8, %v3566_v23  ;;  %v1168_v58 = vmul.f32 %v1165_v25, %v3589_v37  ;;  %v1400_v8 = vmul.f32 %v1398_v60, %v3584_v34  ;;  %v833_v25 = vld [vmem:[%s4821_s5 + $0x18] sm:$0xff] }
  0xc7   :  { %v1406_v14 = vrot.slane %v1400_v8, 2 }
  0xc9   :  { %1717 = vrot.lane.b32.xlu1 %v1714_v61, %s3412_s26  ;;  %1715 = vrot.lane.b32.xlu0 %v1712_v62, %s3412_s26  ;;  %v1401_v62 = vmul.f32 %v1398_v60, %v3589_v37 }
  0xcb   :  { %v1407_v2 = vrot.slane %v1401_v62, 2 }
  0xcd   :  { %1719 = vrot.lane.b32.xlu1 %v1713_v57, %s3412_s26  ;;  %1733 = vrot.lane.b32.xlu0 %v3523_v10, %s3410_s29  ;;  %v931_v10 = vld [vmem:[%s4825_s9 + $0x10] sm:$0xff]  ;;  %v746_v57 = vrot.slane %v740_v44, 4  ;;  %v1410_v6 = vsel %vm324_vm1, %v1407_v2, %v1409_v3  ;;  %v1408_v31 = vsel %vm324_vm1, %v1406_v14, %v1407_v2 }
  0xce   :  { %v3725_v21 = vpack.c.bf16 %v932_v15, %v931_v10 }
  0xcf   :  { %v747_v61 = vsel %vm580_vm2, %v745_v56, %v746_v57 }
  0xd0   :  { %3272 = vmatprep.subr.bf16.mxu1 %v3725_v21 }
  0xd1   :  { %167 = vrot.lane.b32.xlu1 %v162_v5, %s3412_s26  ;;  %165 = vrot.lane.b32.xlu0 %v161_v59, %s3412_s26  ;;  %v748_v59 = vrot.slane %v741_v54, 4 }
  0xd2   :  { %3274 = vmatpush3.bf16.msra.mxu1 %v3725_v21 }
  0xd3   :  { %3276 = vmatprep.subr.bf16.mxu1 %v3740_v33  ;;  %v749_v5 = vsel %vm580_vm2, %v746_v57, %v748_v59  ;;  %v296_v59 = vmul.f32 %v3656_v29, %v3557_v17 }
  0xd5   :  { %239 = vrot.lane.b32.xlu1 %v234_v12, %s3413_s25  ;;  %237 = vrot.lane.b32.xlu0 %v233_v11, %s3413_s25  ;;  %v3786_v11 = vpop.permute.xlu0 %1481  ;;  %v3790_v12 = vpop.permute.xlu1 %1295  ;;  %v302_v16 = vrot.slane %v296_v59, 1 }
  0xd6   :  { %3278 = vmatpush3.bf16.msra.mxu1 %v3740_v33  ;;  %v1484_v10 = vmul.f32 %v3786_v11, %v3584_v34  ;;  %v3797_v15 = vmul.f32 %v3786_v11, %v3589_v37 }
  0xd7   :  { %3280 = vmatprep.subr.bf16.mxu1 %v3758_v47 }
  0xd8   :  { %v1490_v38 = vrot.slane %v1484_v10, 2  ;;  %v1491_v39 = vrot.slane %v3797_v15, 2  ;;  %v301_v10 = vrot.slane %v295_v63, 1  ;;  %v3957_v15 = vld [vmem:[%s4824_s8] ss:$0 sm:$0xff] }
  0xd9   :  { %412 = vrot.lane.b32.xlu1 %v409_v26, %s3412_s26  ;;  %410 = vrot.lane.b32.xlu0 %v407_v30, %s3412_s26  ;;  %v3809_v22 = vpop.permute.xlu0 %1649  ;;  %v3816_v26 = vpack.c.bf16 %v833_v25, %v832_v20  ;;  %v3824_v30 = vpop.permute.xlu1 %1547 }
  0xda   :  { %3282 = vmatpush3.bf16.msra.mxu1 %v3758_v47  ;;  %v1652_v32 = vmul.f32 %v3809_v22, %v3584_v34  ;;  %v3832_v35 = vmul.f32 %v3809_v22, %v3589_v37  ;;  %v1492_v42 = vsel %vm324_vm1, %v1490_v38, %v1491_v39  ;;  %v303_v38 = vsel %vm262_vm0, %v301_v10, %v302_v16 }
  0xdb   :  { %3300 = vmatprep.subr.bf16.mxu1 %v3709_v9  ;;  %3256 = vmatprep.subr.bf16.mxu0 %v3816_v26 }
  0xdc   :  { %v1658_v43 = vrot.slane %v1652_v32, 4  ;;  %v1659_v44 = vrot.slane %v3832_v35, 4  ;;  %3258 = vmatpush3.bf16.msra.mxu0 %v3816_v26  ;;  %v552_v32 = vmul.f32 %v3691_v1, %v3557_v17  ;;  %v94_v35 = vmul.f32 %v3957_v15, %v3557_v17 }
  0xdd   :  { %496 = vrot.lane.b32.xlu1 %v493_v45, %s3413_s25  ;;  %494 = vrot.lane.b32.xlu0 %v491_v49, %s3413_s25 }
  0xde   :  { %3260 = vmatprep.subr.bf16.mxu0 %v3838_v40  ;;  %v1660_v49 = vsel %vm580_vm2, %v1658_v43, %v1659_v44 }
  0xe0   :  { %3262 = vmatpush3.bf16.msra.mxu0 %v3838_v40 }
  0xe1   :  { %668 = vrot.lane.b32.xlu1 %v665_v52, %s3412_s26  ;;  %666 = vrot.lane.b32.xlu0 %v663_v53, %s3412_s26 }
  0xe5   :  { %1173 = vrot.lane.b32.xlu1 %v1168_v58, %s3412_s26  ;;  %750 = vrot.lane.b32.xlu0 %v747_v61, %s3413_s25 }
  0xe9   :  { %1245 = vrot.lane.b32.xlu1 %v1240_v0, %s3413_s25  ;;  %752 = vrot.lane.b32.xlu0 %v749_v5, %s3413_s25  ;;  %v297_v0 = vmul.f32 %v3656_v29, %v3566_v23  ;;  %v86_v5 = vmul.f32 %v3681_v55, %v3557_v17 }
  0xeb   :  { %v304_v19 = vrot.slane %v297_v0, 1 }
  0xed   :  { %1413 = vrot.lane.b32.xlu1 %v1410_v6, %s3412_s26  ;;  %1171 = vrot.lane.b32.xlu0 %v1167_v7, %s3412_s26  ;;  %v85_v6 = vmul.f32 %v3681_v55, %v3559_v18  ;;  %v87_v7 = vmul.f32 %v3681_v55, %v3566_v23  ;;  %v553_v55 = vmul.f32 %v3691_v1, %v3566_v23 }
  0xf1   :  { %1243 = vrot.lane.b32.xlu0 %v1239_v13, %s3413_s25 }
  0xf5   :  { %1411 = vrot.lane.b32.xlu0 %v1408_v31, %s3412_s26  ;;  %v551_v31 = vmul.f32 %v3691_v1, %v3559_v18  ;;  %v837_v1 = vld [vmem:[%s4821_s5 + $0x38] sm:$0xff] }
  0xf7   :  { %v141_v41 = vpop.permute.xlu0 %140  ;;  %v143_v45 = vpop.permute.xlu1 %142 }
  0xf8   :  { %v150_v8 = vadd.f32 %v143_v45, %v86_v5  ;;  %v149_v13 = vadd.f32 %v141_v41, %v85_v6  ;;  %v836_v5 = vld [vmem:[%s4821_s5 + $0x30] sm:$0xff] }
  0xf9   :  { %1495 = vrot.lane.b32.xlu0 %v1492_v42, %s3413_s25  ;;  %v305_v42 = vsel %vm262_vm0, %v302_v16, %v304_v19 }
  0xfb   :  { %v145_v46 = vpop.permute.xlu0 %144  ;;  %v213_v50 = vpop.permute.xlu1 %212 }
  0xfc   :  { %v151_v14 = vadd.f32 %v145_v46, %v87_v7  ;;  %v221_v25 = vadd.f32 %v213_v50, %v149_v13  ;;  %v557_v50 = vrot.slane %v551_v31, 2  ;;  %v1091_v31 = vmul.f32 %v3778_v4, %v3584_v34 }
  0xfd   :  { %1663 = vrot.lane.b32.xlu0 %v1660_v49, %s3412_s26 }
  0xfe   :  { %v309_v46 = vadd.f32 %v303_v38, %v221_v25 }
  0xff   :  { %v215_v48 = vpop.permute.xlu0 %214 }
 0x100   :  { %v222_v27 = vadd.f32 %v215_v48, %v150_v8  ;;  %v558_v48 = vrot.slane %v552_v32, 2  ;;  %v3900_v8 = vpack.c.bf16 %v837_v1, %v836_v5  ;;  %v1092_v32 = vmul.f32 %v3778_v4, %v3589_v37 }
 0x102   :  { %v310_v49 = vadd.f32 %v305_v42, %v222_v27  ;;  %v559_v16 = vsel %vm324_vm1, %v557_v50, %v558_v48  ;;  %3264 = vmatprep.subr.bf16.mxu0 %v3900_v8 }
 0x103   :  { %v3852_v51 = vpop.permute.xlu1 %1146  ;;  %v217_v52 = vpop.permute.xlu0 %216  ;;  %3266 = vmatpush3.bf16.msra.mxu0 %v3900_v8 }
 0x104   :  { %v223_v28 = vadd.f32 %v217_v52, %v151_v14  ;;  %v560_v52 = vrot.slane %v553_v55, 2  ;;  %3284 = vmatprep.subr.bf16.mxu0 %v3811_v24 }
 0x106   :  { %v311_v45 = vadd.f32 %v304_v19, %v223_v28  ;;  %v1298_v19 = vmul.f32 %v3790_v12, %v3584_v34  ;;  %v1299_v28 = vmul.f32 %v3790_v12, %v3589_v37 }
 0x107   :  { %v3854_v53 = vpop.permute.xlu1 %1150  ;;  %v3856_v56 = vpop.permute.xlu0 %1148 }
 0x10b   :  { %v3858_v57 = vpop.permute.xlu1 %1220  ;;  %v3860_v60 = vpop.permute.xlu0 %1218 }
 0x10f   :  { %v3862_v54 = vpop.permute.xlu1 %1222  ;;  %v383_v58 = vpop.permute.xlu0 %382 }
 0x110   :  { %v389_v63 = vadd.f32 %v383_v58, %v311_v45  ;;  %v561_v58 = vsel %vm324_vm1, %v558_v48, %v560_v52  ;;  %v1156_v45 = vadd.f32 %v3856_v56, %v1092_v32  ;;  %v1305_v48 = vrot.slane %v1299_v28, 1 }
 0x111   :  { %v1550_v56 = vmul.f32 %v3824_v30, %v3584_v34 }
 0x113   :  { %v3864_v61 = vpop.permute.xlu1 %1383  ;;  %v467_v62 = vpop.permute.xlu0 %466  ;;  %v1556_v28 = vrot.slane %v1550_v56, 2 }
 0x114   :  { %v473_v13 = vadd.f32 %v467_v62, %v389_v63  ;;  %v1300_v62 = vmul.f32 %v3790_v12, %v3587_v36  ;;  %v1228_v63 = vadd.f32 %v3858_v57, %v1156_v45  ;;  %v1552_v57 = vmul.f32 %v3824_v30, %v3587_v36 }
 0x116   :  { %v567_v42 = vadd.f32 %v560_v52, %v473_v13 }
 0x117   :  { %v3872_v2 = vpop.permute.xlu1 %1467  ;;  %v3874_v3 = vpop.permute.xlu0 %638 }
 0x118   :  { %v645_v52 = vadd.f32 %v3874_v3, %v567_v42 }
 0x11b   :  { %v3882_v29 = vpop.permute.xlu1 %1635  ;;  %v3884_v20 = vpop.permute.xlu0 %722 }
 0x11f   :  { %v379_v41 = vpop.permute.xlu1 %378  ;;  %v381_v43 = vpop.permute.xlu0 %380 }
 0x120   :  { %v387_v59 = vadd.f32 %v379_v41, %v309_v46  ;;  %v388_v0 = vadd.f32 %v381_v43, %v310_v49  ;;  %v1093_v41 = vmul.f32 %v3778_v4, %v3587_v36  ;;  %v1155_v43 = vadd.f32 %v3852_v51, %v1091_v31 }
 0x121   :  { %v1304_v46 = vrot.slane %v1298_v19, 1 }
 0x122   :  { %v1157_v12 = vadd.f32 %v3854_v53, %v1093_v41  ;;  %v1551_v53 = vmul.f32 %v3824_v30, %v3589_v37 }
 0x123   :  { %v463_v6 = vpop.permute.xlu1 %462  ;;  %v465_v7 = vpop.permute.xlu0 %464 }
 0x124   :  { %v471_v14 = vadd.f32 %v463_v6, %v387_v59  ;;  %v472_v10 = vadd.f32 %v465_v7, %v388_v0  ;;  %v1227_v59 = vadd.f32 %v3860_v60, %v1155_v43  ;;  %v1307_v0 = vrot.slane %v1300_v62, 1 }
 0x125   :  { %v1229_v4 = vadd.f32 %v3862_v54, %v1157_v12  ;;  %v729_v60 = vadd.f32 %v3884_v20, %v645_v52  ;;  %v1486_v54 = vmul.f32 %v3786_v11, %v3587_v36  ;;  %v1557_v30 = vrot.slane %v1551_v53, 2 }
 0x126   :  { %v565_v25 = vadd.f32 %v559_v16, %v471_v14  ;;  %v566_v27 = vadd.f32 %v561_v58, %v472_v10  ;;  %v1308_v3 = vsel %vm262_vm0, %v1305_v48, %v1307_v0  ;;  %v1306_v10 = vsel %vm262_vm0, %v1304_v46, %v1305_v48 }
 0x127   :  { %v635_v55 = vpop.permute.xlu1 %634  ;;  %v637_v38 = vpop.permute.xlu0 %636  ;;  %v1314_v58 = vadd.f32 %v1307_v0, %v1229_v4  ;;  %v1313_v19 = vadd.f32 %v1308_v3, %v1228_v63  ;;  %v1559_v62 = vrot.slane %v1552_v57, 2  ;;  %v844_v20 = vrot.slane %v729_v60, 1 }
 0x128   :  { %v643_v49 = vadd.f32 %v635_v55, %v565_v25  ;;  %v644_v50 = vadd.f32 %v637_v38, %v566_v27  ;;  %v1312_v25 = vadd.f32 %v1306_v10, %v1227_v59  ;;  %v1654_v11 = vmul.f32 %v3809_v22, %v3587_v36 }
 0x129   :  { %v1493_v41 = vrot.slane %v1486_v54, 2  ;;  %v1390_v42 = vadd.f32 %v3864_v61, %v1314_v58  ;;  %v1560_v12 = vsel %vm324_vm1, %v1557_v30, %v1559_v62 }
 0x12a   :  { %v1661_v0 = vrot.slane %v1654_v11, 4 }
 0x12b   :  { %v721_v5 = vpop.permute.xlu1 %720  ;;  %v719_v1 = vpop.permute.xlu0 %718  ;;  %v1494_v61 = vsel %vm324_vm1, %v1491_v39, %v1493_v41  ;;  %v3962_v39 = vld [vmem:[%s4824_s8 + $0x4] ss:$0 sm:$0xff] }
 0x12c   :  { %v728_v51 = vadd.f32 %v721_v5, %v644_v50  ;;  %v727_v6 = vadd.f32 %v719_v1, %v643_v49  ;;  %v1558_v49 = vsel %vm324_vm1, %v1556_v28, %v1557_v30  ;;  %v1474_v50 = vadd.f32 %v3872_v2, %v1390_v42 }
 0x12d   :  { %v1662_v2 = vsel %vm580_vm2, %v1659_v44, %v1661_v0  ;;  %v319_v54 = vmul.f32 %v3962_v39, %v3557_v17  ;;  %v320_v3 = vmul.f32 %v3962_v39, %v3566_v23 }
 0x12e   :  { %v842_v7 = vrot.slane %v728_v51, 1  ;;  %v841_v13 = vrot.slane %v727_v6, 1  ;;  %v1566_v5 = vadd.f32 %v1559_v62, %v1474_v50 }
 0x12f   :  { %v1382_v14 = vpop.permute.xlu1 %1381  ;;  %v1380_v16 = vpop.permute.xlu0 %1379 }
 0x130   :  { %v843_v27 = vsel %vm262_vm0, %v841_v13, %v842_v7  ;;  %v1389_v31 = vadd.f32 %v1382_v14, %v1313_v19  ;;  %v1388_v32 = vadd.f32 %v1380_v16, %v1312_v25  ;;  %v845_v46 = vsel %vm262_vm0, %v842_v7, %v844_v20 }
 0x131   :  { %846 = vrot.lane.b32.xlu1 %v843_v27, %s3411_s23  ;;  %v1642_v53 = vadd.f32 %v3882_v29, %v1566_v5  ;;  %v93_v13 = vmul.f32 %v3957_v15, %v3559_v18  ;;  %v318_v14 = vmul.f32 %v3962_v39, %v3559_v18 }
 0x133   :  { %v1466_v55 = vpop.permute.xlu1 %1465  ;;  %v1464_v38 = vpop.permute.xlu0 %1463  ;;  %v325_v11 = vrot.slane %v318_v14, 2 }
 0x134   :  { %v1473_v43 = vadd.f32 %v1466_v55, %v1389_v31  ;;  %v1472_v45 = vadd.f32 %v1464_v38, %v1388_v32  ;;  %v326_v31 = vrot.slane %v319_v54, 2  ;;  %v328_v32 = vrot.slane %v320_v3, 2 }
 0x135   :  { %848 = vrot.lane.b32.xlu1 %v845_v46, %s3411_s23  ;;  %v1322_v54 = vmul.f32 %v3962_v39, %v3587_v36 }
 0x136   :  { %v1565_v48 = vadd.f32 %v1560_v12, %v1473_v43  ;;  %v1564_v63 = vadd.f32 %v1558_v49, %v1472_v45  ;;  %v3986_v43 = vld [vmem:[%s4824_s8 + $0x8] ss:$0 sm:$0xff]  ;;  %v329_v12 = vsel %vm324_vm1, %v326_v31, %v328_v32  ;;  %v327_v49 = vsel %vm324_vm1, %v325_v11, %v326_v31 }
 0x137   :  { %v1634_v22 = vpop.permute.xlu1 %1633  ;;  %v1632_v59 = vpop.permute.xlu0 %1631  ;;  %v575_v50 = vmul.f32 %v3986_v43, %v3557_v17  ;;  %v1320_v31 = vmul.f32 %v3962_v39, %v3584_v34 }
 0x138   :  { %v1641_v1 = vadd.f32 %v1634_v22, %v1565_v48  ;;  %v1640_v4 = vadd.f32 %v1632_v59, %v1564_v63  ;;  %v574_v48 = vmul.f32 %v3986_v43, %v3559_v18 }
 0x139   :  { %1497 = vrot.lane.b32.xlu1 %v1494_v61, %s3413_s25  ;;  %v576_v61 = vmul.f32 %v3986_v43, %v3566_v23 }
 0x13b   :  { %v1718_v52 = vpop.permute.xlu1 %1717  ;;  %v1716_v51 = vpop.permute.xlu0 %1715 }
 0x13c   :  { %v1725_v6 = vadd.f32 %v1718_v52, %v1641_v1  ;;  %v1724_v56 = vadd.f32 %v1716_v51, %v1640_v4  ;;  %v582_v52 = vrot.slane %v575_v50, 4  ;;  %v581_v51 = vrot.slane %v574_v48, 4 }
 0x13d   :  { %1665 = vrot.lane.b32.xlu1 %v1662_v2, %s3412_s26  ;;  %v1572_v48 = vmul.f32 %v3986_v43, %v3584_v34 }
 0x13e   :  { %v1834_v57 = vrot.slane %v1725_v6, 1  ;;  %v1833_v60 = vrot.slane %v1724_v56, 1  ;;  %v584_v56 = vrot.slane %v576_v61, 4  ;;  %v1574_v61 = vmul.f32 %v3986_v43, %v3587_v36 }
 0x13f   :  { %v1720_v44 = vpop.permute.xlu1 %1719  ;;  %v1734_v7 = vpop.permute.xlu0 %1733 }
 0x140   :  { %v1726_v29 = vadd.f32 %v1720_v44, %v1642_v53  ;;  %v1736_v10 = vmul.f32 %v1734_v7, %v3584_v34  ;;  %v1737_v16 = vmul.f32 %v1734_v7, %v3589_v37  ;;  %v1738_v58 = vmul.f32 %v1734_v7, %v3587_v36 }
 0x141   :  { %v1835_v19 = vsel %vm262_vm0, %v1833_v60, %v1834_v57  ;;  %v583_v53 = vsel %vm580_vm2, %v581_v51, %v582_v52 }
 0x142   :  { %v1836_v25 = vrot.slane %v1726_v29, 1  ;;  %1838 = vrot.lane.b32.xlu1 %v1835_v19, %s3411_s23  ;;  %v1742_v27 = vrot.slane %v1736_v10, 4  ;;  %v1743_v28 = vrot.slane %v1737_v16, 4  ;;  %v1745_v20 = vrot.slane %v1738_v58, 4 }
 0x143   :  { %v168_v30 = vpop.permute.xlu1 %167  ;;  %v166_v62 = vpop.permute.xlu0 %165  ;;  %v1100_v29 = vmul.f32 %v3957_v15, %v3589_v37  ;;  %v1329_v19 = vrot.slane %v1322_v54, 2  ;;  %v2068_v54 = vld [vmem:[%s4826_s10 + $0x28] sm:$0xff] }
 0x144   :  { %v172_v55 = vadd.f32 %v168_v30, %v94_v35  ;;  %v171_v38 = vadd.f32 %v166_v62, %v93_v13  ;;  %v1744_v41 = vsel %vm580_vm2, %v1742_v27, %v1743_v28  ;;  %v1837_v42 = vsel %vm262_vm0, %v1834_v57, %v1836_v25 }
 0x145   :  { %1747 = vrot.lane.b32.xlu0 %v1744_v41, %s3413_s25  ;;  %v1746_v59 = vsel %vm580_vm2, %v1743_v28, %v1745_v20  ;;  %v585_v35 = vsel %vm580_vm2, %v582_v52, %v584_v56  ;;  %v1321_v13 = vmul.f32 %v3962_v39, %v3589_v37 }
 0x146   :  { %1840 = vrot.lane.b32.xlu1 %v1837_v42, %s3411_s23  ;;  %v1326_v42 = vrot.slane %v1320_v31, 2 }
 0x147   :  { %v240_v45 = vpop.permute.xlu1 %239  ;;  %v238_v46 = vpop.permute.xlu0 %237  ;;  %v1327_v58 = vrot.slane %v1321_v13, 2  ;;  %v2067_v13 = vld [vmem:[%s4826_s10 + $0x20] sm:$0xff] }
 0x148   :  { %v244_v63 = vadd.f32 %v240_v45, %v172_v55  ;;  %v243_v22 = vadd.f32 %v238_v46, %v171_v38  ;;  %v1099_v38 = vmul.f32 %v3957_v15, %v3584_v34 }
 0x149   :  { %1749 = vrot.lane.b32.xlu0 %v1746_v59, %s3413_s25  ;;  %v1330_v20 = vsel %vm324_vm1, %v1327_v58, %v1329_v19 }
 0x14a   :  { %v333_v0 = vadd.f32 %v329_v12, %v244_v63  ;;  %v332_v5 = vadd.f32 %v327_v49, %v243_v22  ;;  %v1328_v12 = vsel %vm324_vm1, %v1326_v42, %v1327_v58 }
 0x14b   :  { %v413_v1 = vpop.permute.xlu1 %412  ;;  %v411_v4 = vpop.permute.xlu0 %410 }
 0x14c   :  { %v417_v6 = vadd.f32 %v413_v1, %v333_v0  ;;  %v416_v17 = vadd.f32 %v411_v4, %v332_v5  ;;  %v1581_v5 = vrot.slane %v1574_v61, 4 }
 0x14f   :  { %v497_v2 = vpop.permute.xlu1 %496  ;;  %v495_v18 = vpop.permute.xlu0 %494 }
 0x150   :  { %v501_v57 = vadd.f32 %v497_v2, %v417_v6  ;;  %v500_v60 = vadd.f32 %v495_v18, %v416_v17 }
 0x152   :  { %v588_v44 = vadd.f32 %v583_v53, %v500_v60  ;;  %v589_v3 = vadd.f32 %v585_v35, %v501_v57  ;;  %v2063_v57 = vld [vmem:[%s4826_s10] sm:$0xff]  ;;  %v4830_v35 = vmov 0.0|0.0  }
 0x153   :  { %v669_v7 = vpop.permute.xlu1 %668  ;;  %v667_v23 = vpop.permute.xlu0 %666 }
 0x154   :  { %v672_v14 = vadd.f32 %v667_v23, %v588_v44  ;;  %v673_v25 = vadd.f32 %v669_v7, %v589_v3  ;;  %v2065_v44 = vld [vmem:[%s4826_s10 + $0x10] sm:$0xff]  ;;  %v2066_v7 = vld [vmem:[%s4826_s10 + $0x18] sm:$0xff]  ;;  %v3322_v3 = vpack.c.bf16 %v2068_v54, %v2067_v13 }
 0x155   :  { %v3319_v23 = vpack.c.bf16 %v2066_v7, %v2065_v44 }
 0x157   :  { %v1174_v10 = vpop.permute.xlu1 %1173  ;;  %v751_v16 = vpop.permute.xlu0 %750 }
 0x158   :  { %v1178_v27 = vadd.f32 %v1174_v10, %v1100_v29  ;;  %v756_v28 = vadd.f32 %v751_v16, %v672_v14  ;;  %v2069_v14 = vld [vmem:[%s4826_s10 + $0x30] sm:$0xff]  ;;  %v2070_v29 = vld [vmem:[%s4826_s10 + $0x38] sm:$0xff]  ;;  %v3416_v16 = vmov 0.0  }
 0x159   :  { %v3325_v10 = vpack.c.bf16 %v2070_v29, %v2069_v14  ;;  %2155 = vst.msk [vmem:[#allocation6 + $0x8] sm:$0xff] %vm2153_vm8, %v3416_v16  ;;  %2154 = vst.msk [vmem:[#allocation6] sm:$0xff] %vm2153_vm8, %v3416_v16 }
 0x15a   :  { %3134 = vmatprep.mubr.msk.f32.mxu1 %vm826_vm3, %v756_v28  ;;  %2157 = vst.msk [vmem:[#allocation6 + $0x10] sm:$0x3] %vm2156_vm9, %v3416_v16 }
 0x15b   :  { %v1246_v30 = vpop.permute.xlu1 %1245  ;;  %v753_v62 = vpop.permute.xlu0 %752 }
 0x15c   :  { %v1250_v32 = vadd.f32 %v1246_v30, %v1178_v27  ;;  %v757_v11 = vadd.f32 %v753_v62, %v673_v25 }
 0x15e   :  { %3135 = vmatmul.mubr.msk.f32.vlgmr.msra.gmra.mrb[0].mxu1 %vm826_vm3, %v757_v11  ;;  %v1334_v55 = vadd.f32 %v1330_v20, %v1250_v32 }
 0x15f   :  { %v1172_v41 = vpop.permute.xlu0 %1171  ;;  %3302 = vmatpush3.bf16.msra.mxu1 %v3709_v9  ;;  %v1414_v15 = vpop.permute.xlu1 %1413 }
 0x160   :  { %3304 = vmatprep.subr.bf16.mxu1 %v3725_v21  ;;  %v1177_v45 = vadd.f32 %v1172_v41, %v1099_v38 }
 0x163   :  { %v1244_v46 = vpop.permute.xlu0 %1243  ;;  %3306 = vmatpush3.bf16.msra.mxu1 %v3725_v21  ;;  %v1573_v21 = vmul.f32 %v3986_v43, %v3589_v37 }
 0x164   :  { %v1249_v39 = vadd.f32 %v1244_v46, %v1177_v45  ;;  %3308 = vmatprep.subr.bf16.mxu1 %v3740_v33 }
 0x165   :  { %v1579_v22 = vrot.slane %v1573_v21, 4 }
 0x166   :  { %v1333_v49 = vadd.f32 %v1328_v12, %v1249_v39 }
 0x167   :  { %3310 = vmatpush3.bf16.msra.mxu1 %v3740_v33  ;;  %v1412_v50 = vpop.permute.xlu0 %1411  ;;  %v1582_v36 = vsel %vm580_vm2, %v1579_v22, %v1581_v5 }
 0x168   :  { %3312 = vmatprep.subr.bf16.mxu1 %v3758_v47  ;;  %v1417_v0 = vadd.f32 %v1412_v50, %v1333_v49 }
 0x16b   :  { %3314 = vmatpush3.bf16.msra.mxu1 %v3758_v47  ;;  %v1496_v33 = vpop.permute.xlu0 %1495  ;;  %v1578_v47 = vrot.slane %v1572_v48, 4 }
 0x16c   :  { %v1501_v34 = vadd.f32 %v1496_v33, %v1417_v0 }
 0x16d   :  { %v1580_v37 = vsel %vm580_vm2, %v1578_v47, %v1579_v22 }
 0x16e   :  { %v1585_v4 = vadd.f32 %v1580_v37, %v1501_v34 }
 0x16f   :  { %v1664_v51 = vpop.permute.xlu0 %1663 }
 0x1a3   :  { %v847_v9 = vpop.permute.xlu1 %846 }
 0x1a4   :  { %3115 = vmatprep.mubr.msk.f32.mxu0 %vm826_vm3, %v847_v9 }
 0x1a7   :  { %v849_v63 = vpop.permute.xlu1 %848 }
 0x1a8   :  { %3116 = vmatmul.mubr.msk.f32.vlgmr.msra.gmra.mrb[0].mxu0 %vm826_vm3, %v849_v63 }
 0x1a9   :  { %3286 = vmatpush3.bf16.msra.mxu0 %v3811_v24  ;;  %v1418_v24 = vadd.f32 %v1414_v15, %v1334_v55 }
 0x1aa   :  { %3288 = vmatprep.subr.bf16.mxu0 %v3816_v26 }
 0x1ab   :  { %v1498_v59 = vpop.permute.xlu1 %1497 }
 0x1ac   :  { %v1502_v52 = vadd.f32 %v1498_v59, %v1418_v24 }
 0x1ad   :  { %3290 = vmatpush3.bf16.msra.mxu0 %v3816_v26  ;;  %v1669_v26 = vadd.f32 %v1664_v51, %v1585_v4 }
 0x1ae   :  { %3292 = vmatprep.subr.bf16.mxu0 %v3838_v40  ;;  %v1586_v6 = vadd.f32 %v1582_v36, %v1502_v52 }
 0x1af   :  { %v1666_v1 = vpop.permute.xlu1 %1665 }
 0x1b1   :  { %3294 = vmatpush3.bf16.msra.mxu0 %v3838_v40  ;;  %v1670_v40 = vadd.f32 %v1666_v1, %v1586_v6 }
 0x1b2   :  { %3296 = vmatprep.subr.bf16.mxu0 %v3900_v8 }
 0x1b4   :  { %v1839_v43 = vpop.permute.xlu1 %1838 }
 0x1b5   :  { %3153 = vmatprep.mubr.msk.f32.mxu0 %vm826_vm3, %v1839_v43  ;;  %3298 = vmatpush3.bf16.msra.mxu0 %v3900_v8  ;;  %v2064_v8 = vld [vmem:[%s4826_s10 + $0x8] sm:$0xff] }
 0x1b6   :  { %v3316_v60 = vpack.c.bf16 %v2064_v8, %v2063_v57  ;;  %3315 = vmatprep.subr.bf16.mxu0 %v4830_v35 }
 0x1b7   :  { %v1748_v17 = vpop.permute.xlu0 %1747 }
 0x1b8   :  { %v1753_v56 = vadd.f32 %v1748_v17, %v1669_v26  ;;  %v1841_v2 = vpop.permute.xlu1 %1840 }
 0x1b9   :  { %3154 = vmatmul.mubr.msk.f32.vlgmr.msra.gmra.mrb[2].mxu0 %vm826_vm3, %v1841_v2 }
 0x1ba   :  { %3172 = vmatprep.mubr.msk.f32.mxu1 %vm826_vm3, %v1753_v56  ;;  %3317 = vmatpush3.bf16.msra.mxu0 %v3316_v60 }
 0x1bb   :  { %v1750_v18 = vpop.permute.xlu0 %1749  ;;  %3318 = vmatprep.subr.bf16.mxu0 %v4830_v35  ;;  %3191 = vmatprep.mubr.msk.f32.mxu0 %vm3415_vm4, %v3416_v16 }
 0x1bc   :  { %v1754_v53 = vadd.f32 %v1750_v18, %v1670_v40 }
 0x1be   :  { %3173 = vmatmul.mubr.msk.f32.vlgmr.msra.gmra.mrb[2].mxu1 %vm826_vm3, %v1754_v53  ;;  %3320 = vmatpush3.bf16.msra.mxu0 %v3319_v23 }
 0x1bf   :  { %3321 = vmatprep.subr.bf16.mxu0 %v4830_v35 }
 0x1c2   :  { %3323 = vmatpush3.bf16.msra.mxu0 %v3322_v3 }
 0x1c3   :  { %3324 = vmatprep.subr.bf16.mxu0 %v4830_v35 }
 0x1c6   :  { %3326 = vmatpush3.bf16.msra.mxu0 %v3325_v10 }
 0x231   :  { %v3136_v58 = vpop.f32.mrb[0].mxu1 }
 0x232   :  { %1021 = vst.msk [vmem:[#allocation3 + $0x8] sm:$0xff] %vm826_vm3, %v3136_v58  ;;  %v1043_v19 = vsel %vm826_vm3, %v3136_v58, 0.0  ;;  %v1052_v25 = vmul.f32 %v3136_v58, %v3136_v58  ;;  %v1009_v27 = vpop.f32.mrb[1].mxu1 }
 0x233   :  { %1020 = vst.msk [vmem:[#allocation3] sm:$0xff] %vm826_vm3, %v1009_v27  ;;  %v1042_v28 = vsel %vm826_vm3, %v1009_v27, 0.0  ;;  %v1051_v30 = vmul.f32 %v1009_v27, %v1009_v27 }
 0x234   :  { %v1054_v62 = vsel %vm826_vm3, %v1052_v25, 0.0  ;;  %v1044_v20 = vadd.f32 %v1043_v19, %v1042_v28 }
 0x235   :  { %v1053_v31 = vsel %vm826_vm3, %v1051_v30, 0.0 }
 0x236   :  { %v1055_v32 = vadd.f32 %v1054_v62, %v1053_v31  ;;  %v1045_v48 = vrot.slane %v1044_v20, 4 }
 0x238   :  { %v1056_v59 = vrot.slane %v1055_v32, 4  ;;  %v1046_v1 = vadd.f32 %v1045_v48, %v1044_v20 }
 0x23a   :  { %v1057_v43 = vadd.f32 %v1056_v59, %v1055_v32  ;;  %v1047_v57 = vrot.slane %v1046_v1, 2 }
 0x23c   :  { %v1058_v54 = vrot.slane %v1057_v43, 2  ;;  %v1048_v19 = vadd.f32 %v1047_v57, %v1046_v1  ;;  %v2838_v57 = vld [vmem:[#allocation3 + $0x8] sm:$0xff] }
 0x23e   :  { %v1059_v20 = vadd.f32 %v1058_v54, %v1057_v43 }
 0x27b   :  { %v3117_v11 = vpop.f32.mrb[0].mxu0 }
 0x27c   :  { %1019 = vst.msk [vmem:[#allocation2 + $0x8] sm:$0xff] %vm826_vm3, %v3117_v11  ;;  %v1023_v55 = vsel %vm826_vm3, %v3117_v11, 0.0  ;;  %v1032_v38 = vmul.f32 %v3117_v11, %v3117_v11  ;;  %v920_v41 = vpop.f32.mrb[1].mxu0 }
 0x27d   :  { %1018 = vst.msk [vmem:[#allocation2] sm:$0xff] %vm826_vm3, %v920_v41  ;;  %v1022_v42 = vsel %vm826_vm3, %v920_v41, 0.0  ;;  %v1031_v45 = vmul.f32 %v920_v41, %v920_v41  ;;  %v1049_v41 = vrot.slane %v1048_v19, 1 }
 0x27e   :  { %v1034_v46 = vsel %vm826_vm3, %v1032_v38, 0.0  ;;  %v1024_v12 = vadd.f32 %v1023_v55, %v1022_v42 }
 0x27f   :  { %v1033_v39 = vsel %vm826_vm3, %v1031_v45, 0.0  ;;  %v1050_v48 = vadd.f32 %v1049_v41, %v1048_v19 }
 0x280   :  { %v1035_v49 = vadd.f32 %v1034_v46, %v1033_v39  ;;  %v1025_v15 = vrot.slane %v1024_v12, 4 }
 0x282   :  { %v1036_v9 = vrot.slane %v1035_v49, 4  ;;  %v1026_v50 = vadd.f32 %v1025_v15, %v1024_v12 }
 0x284   :  { %v1037_v63 = vadd.f32 %v1036_v9, %v1035_v49  ;;  %v1027_v61 = vrot.slane %v1026_v50, 2  ;;  %v1060_v49 = vrot.slane %v1059_v20, 1 }
 0x286   :  { %v1038_v4 = vrot.slane %v1037_v63, 2  ;;  %v1028_v26 = vadd.f32 %v1027_v61, %v1026_v50 }
 0x288   :  { %v1039_v44 = vadd.f32 %v1038_v4, %v1037_v63  ;;  %v1029_v29 = vrot.slane %v1028_v26, 1 }
 0x28a   :  { %v1040_v28 = vrot.slane %v1039_v44, 1  ;;  %v1030_v11 = vadd.f32 %v1029_v29, %v1028_v26 }
 0x28c   :  { %v3155_v21 = vpop.f32.mrb[2].mxu0  ;;  %v1041_v46 = vadd.f32 %v1040_v28, %v1039_v44 }
 0x28d   :  { %2012 = vst.msk [vmem:[#allocation2 + $0x18] sm:$0xff] %vm826_vm3, %v3155_v21  ;;  %v2017_v33 = vsel %vm826_vm3, %v3155_v21, 0.0  ;;  %v2026_v47 = vmul.f32 %v3155_v21, %v3155_v21  ;;  %v1912_v22 = vpop.f32.mrb[3].mxu0 }
 0x28e   :  { %2011 = vst.msk [vmem:[#allocation2 + $0x10] sm:$0xff] %vm826_vm3, %v1912_v22  ;;  %v2016_v0 = vsel %vm826_vm3, %v1912_v22, 0.0  ;;  %v2025_v34 = vmul.f32 %v1912_v22, %v1912_v22 }
 0x28f   :  { %v2028_v37 = vsel %vm826_vm3, %v2026_v47, 0.0  ;;  %v2018_v5 = vadd.f32 %v2017_v33, %v2016_v0  ;;  %v1061_v47 = vadd.f32 %v1060_v49, %v1059_v20  ;;  %v3003_v49 = vld [vmem:[%s4822_s6 + $0x2] ss:$0 sm:$0xff] }
 0x290   :  { %v2027_v24 = vsel %vm826_vm3, %v2025_v34, 0.0 }
 0x291   :  { %v2019_v52 = vrot.slane %v2018_v5, 4  ;;  %v2029_v51 = vadd.f32 %v2028_v37, %v2027_v24  ;;  %v3174_v36 = vpop.f32.mrb[2].mxu1  ;;  %v2160_v37 = vlaneseq }
 0x292   :  { %2015 = vst.msk [vmem:[#allocation3 + $0x18] sm:$0xff] %vm826_vm3, %v3174_v36  ;;  %v2037_v6 = vsel %vm826_vm3, %v3174_v36, 0.0  ;;  %v2046_v17 = vmul.f32 %v3174_v36, %v3174_v36  ;;  %v2001_v56 = vpop.f32.mrb[3].mxu1 }
 0x293   :  { %v2020_v2 = vadd.f32 %v2019_v52, %v2018_v5  ;;  %v2030_v40 = vrot.slane %v2029_v51, 4  ;;  %2014 = vst.msk [vmem:[#allocation3 + $0x10] sm:$0xff] %vm826_vm3, %v2001_v56  ;;  %v2036_v18 = vsel %vm826_vm3, %v2001_v56, 0.0  ;;  %v2045_v53 = vmul.f32 %v2001_v56, %v2001_v56 }
 0x294   :  { %v2048_v8 = vsel %vm826_vm3, %v2046_v17, 0.0  ;;  %v2038_v60 = vadd.f32 %v2037_v6, %v2036_v18  ;;  %v4105_v5 = vshrl.u32 %v2160_v37, 7 }
 0x295   :  { %v2021_v7 = vrot.slane %v2020_v2, 2  ;;  %v2031_v23 = vadd.f32 %v2030_v40, %v2029_v51  ;;  %v2047_v13 = vsel %vm826_vm3, %v2045_v53, 0.0  ;;  %v2837_v53 = vld [vmem:[#allocation3] sm:$0xff]  ;;  %v2455_v20 = vld [vmem:[#allocation2 + $0x10] sm:$0xff] }
 0x296   :  { %v2039_v3 = vrot.slane %v2038_v60, 4  ;;  %v2049_v14 = vadd.f32 %v2048_v8, %v2047_v13  ;;  %v2841_v1 = vsub.s32 2, %v4105_v5  ;;  %v4829_v56 = vsub.s32 0, %v4105_v5 }
 0x297   :  { %v2022_v10 = vadd.f32 %v2021_v7, %v2020_v2  ;;  %v2032_v58 = vrot.slane %v2031_v23, 2  ;;  %v2847_v2 = vsub.s32 3, %v4105_v5  ;;  %v4828_v40 = vsub.s32 1, %v4105_v5 }
 0x298   :  { %v2040_v25 = vadd.f32 %v2039_v3, %v2038_v60  ;;  %v2050_v27 = vrot.slane %v2049_v14, 4 }
 0x299   :  { %v2023_v30 = vrot.slane %v2022_v10, 1  ;;  %v2033_v62 = vadd.f32 %v2032_v58, %v2031_v23  ;;  %v2880_v23 = vld [vmem:[#allocation3 + $0x18] sm:$0xff] }
 0x29a   :  { %v2041_v31 = vrot.slane %v2040_v25, 2  ;;  %v2051_v32 = vadd.f32 %v2050_v27, %v2049_v14  ;;  %v2879_v7 = vld [vmem:[#allocation3 + $0x10] sm:$0xff]  ;;  %v2159_v14 = vld [vmem:[#allocation2 + $0x8] sm:$0xff] }
 0x29b   :  { %v2024_v55 = vadd.f32 %v2023_v30, %v2022_v10  ;;  %v2034_v38 = vrot.slane %v2033_v62, 1  ;;  %v2158_v10 = vld [vmem:[#allocation2] sm:$0xff] }
 0x29c   :  { %v2042_v42 = vadd.f32 %v2041_v31, %v2040_v25  ;;  %v2052_v45 = vrot.slane %v2051_v32, 2 }
 0x29d   :  { %v2035_v12 = vadd.f32 %v2034_v38, %v2033_v62  ;;  %v2056_v39 = vadd.f32 %v2024_v55, %v1030_v11  ;;  %v2456_v62 = vld [vmem:[#allocation2 + $0x18] sm:$0xff] }
 0x29e   :  { %v2043_v15 = vrot.slane %v2042_v42, 1  ;;  %v2053_v9 = vadd.f32 %v2052_v45, %v2051_v32 }
 0x29f   :  { %v2057_v50 = vadd.f32 %v2035_v12, %v1041_v46 }
 0x2a0   :  { %v2044_v21 = vadd.f32 %v2043_v15, %v2042_v42  ;;  %v2054_v63 = vrot.slane %v2053_v9, 1  ;;  %v3007_v15 = vld [vmem:[%s4822_s6 + $0x5] ss:$0 sm:$0xff] }
 0x2a1   :  { %v2060_v33 = vsel %vm66_vm5, %v2056_v39, %v2057_v50  ;;  %v3002_v39 = vld [vmem:[%s4822_s6 + $0x1] ss:$0 sm:$0xff]  ;;  %v3013_v50 = vld [vmem:[%s4822_s6 + $0x9] ss:$0 sm:$0xff] }
 0x2a2   :  { %v2055_v22 = vadd.f32 %v2054_v63, %v2053_v9  ;;  %v2058_v59 = vadd.f32 %v2044_v21, %v1050_v48  ;;  %v3009_v9 = vld [vmem:[%s4822_s6 + $0x6] ss:$0 sm:$0xff]  ;;  %v3015_v48 = vld [vmem:[%s4822_s6 + $0xa] ss:$0 sm:$0xff] }
 0x2a4   :  { %v2059_v61 = vadd.f32 %v2055_v22, %v1061_v47  ;;  %v2061_v0 = vsel %vm249_vm6, %v2060_v33, %v2058_v59 }
 0x2a6   :  { %v2062_v34 = vsel %vm506_vm7, %v2061_v0, %v2059_v61 }
 0x2a7   :  { %3192 = vmatmul.mubr.msk.f32.vlgmr.msra.gmra.mrb[4].mxu0 %vm826_vm3, %v2062_v34 }
 0x37a   :  { %v2140_v24 = vpop.f32.mrb[4].mxu0 }
 0x37b   :  { %v2144_v4 = vmul.f32 0.001953125, %v2140_v24  ;;  %v3193_v52 = vpop.f32.mrb[5].mxu0 }
 0x37d   :  { %v2145_v51 = vmul.f32 %v2144_v4, %v2144_v4  ;;  %v2842_v36 = vrot.slane %v2144_v4, %v2841_v1  ;;  %v2163_v18 = vrot.slane %v2144_v4, %v4829_v56 }
 0x37f   :  { %v2147_v43 = vrot.slane %v2145_v51, 7  ;;  %v2843_v60 = vsub.f32 %v2837_v53, %v2842_v36  ;;  %v2844_v44 = vsub.f32 %v2838_v57, %v2842_v36  ;;  %v2881_v54 = vsub.f32 %v2879_v7, %v2842_v36 }
 0x380   :  { %v2882_v3 = vsub.f32 %v2880_v23, %v2842_v36  ;;  %v2165_v58 = vsub.f32 %v2159_v14, %v2163_v18  ;;  %v2164_v19 = vsub.f32 %v2158_v10, %v2163_v18  ;;  %v2458_v11 = vsub.f32 %v2456_v62, %v2163_v18  ;;  %v2347_v10 = vld [vmem:[%s4823_s7 + $0x18] sm:$0xff] }
 0x381   :  { %v2149_v26 = vsub.f32 %v2144_v4, %v2147_v43  ;;  %v2457_v55 = vsub.f32 %v2455_v20, %v2163_v18 }
 0x383   :  { %v2150_v6 = vmax.f32 %v2149_v26, 0.0 }
 0x385   :  { %v2151_v17 = vadd.f32 1e-05, %v2150_v6 }
 0x387   :  { %3382 = vrsqrt.f32 %v2151_v17 }
 0x391   :  { %v3383_v8 = vpop.eup %3382 }
 0x392   :  { %v2848_v13 = vrot.slane %v3383_v8, %v2847_v2  ;;  %v2169_v29 = vrot.slane %v3383_v8, %v4828_v40 }
 0x394   :  { %v4115_v25 = vmul.f32 %v2848_v13, %v2843_v60  ;;  %v4117_v27 = vmul.f32 %v2848_v13, %v2844_v44  ;;  %v4119_v28 = vmul.f32 %v2881_v54, %v2848_v13  ;;  %v4121_v30 = vmul.f32 %v2882_v3, %v2848_v13  ;;  %v2344_v60 = vld [vmem:[%s4823_s7] sm:$0xff]  ;;  %v2345_v44 = vld [vmem:[%s4823_s7 + $0x8] sm:$0xff] }
 0x395   :  { %v2171_v31 = vmul.f32 %v2169_v29, %v2165_v58  ;;  %v2170_v32 = vmul.f32 %v2169_v29, %v2164_v19  ;;  %v2460_v42 = vmul.f32 %v2458_v11, %v2169_v29  ;;  %v2459_v45 = vmul.f32 %v2457_v55, %v2169_v29  ;;  %v2346_v29 = vld [vmem:[%s4823_s7 + $0x10] sm:$0xff] }
 0x396   :  { %v3327_v54 = vpack.c.bf16 %v2345_v44, %v2344_v60  ;;  %v3331_v19 = vpack.c.bf16 %v2347_v10, %v2346_v29  ;;  %v245_v44 = vld [vmem:[%s4818_s2 + $0x2] sm:$0xff] }
 0x397   :  { %v2173_v38 = vmax.f32 %v2171_v31, 0.0  ;;  %v2172_v41 = vmax.f32 %v2170_v32, 0.0  ;;  %v2462_v46 = vmax.f32 %v2460_v42, 0.0  ;;  %v2461_v12 = vmax.f32 %v2459_v45, 0.0  ;;  %v2348_v31 = vld [vmem:[%s4823_s7 + $0x20] sm:$0xff]  ;;  %v2349_v32 = vld [vmem:[%s4823_s7 + $0x28] sm:$0xff] }
 0x398   :  { %3328 = vmatprep.subr.bf16.mxu1 %v3327_v54  ;;  %3344 = vmatprep.subr.bf16.mxu0 %v3327_v54  ;;  %v3335_v55 = vpack.c.bf16 %v2349_v32, %v2348_v31  ;;  %v2350_v45 = vld [vmem:[%s4823_s7 + $0x30] sm:$0xff] }
 0x399   :  { %2178 = vrot.lane.b32.xlu1 %v2173_v38, %s3409_s20  ;;  %2176 = vrot.lane.b32.xlu0 %v2172_v41, %s3409_s20 }
 0x39a   :  { %3330 = vmatpush3.bf16.msra.mxu1 %v3327_v54  ;;  %3346 = vmatpush3.bf16.msra.mxu0 %v3327_v54  ;;  %v250_v54 = vrot.slane %v245_v44, 6 }
 0x39b   :  { %3332 = vmatprep.subr.bf16.mxu1 %v3331_v19  ;;  %3348 = vmatprep.subr.bf16.mxu0 %v3331_v19 }
 0x39d   :  { %2467 = vrot.lane.b32.xlu1 %v2462_v46, %s3409_s20  ;;  %2465 = vrot.lane.b32.xlu0 %v2461_v12, %s3409_s20  ;;  %v2351_v46 = vld [vmem:[%s4823_s7 + $0x38] sm:$0xff]  ;;  %s2907_s7 = sld [smem:[#allocation7 + $0x1]] }
 0x39e   :  { %3334 = vmatpush3.bf16.msra.mxu1 %v3331_v19  ;;  %3350 = vmatpush3.bf16.msra.mxu0 %v3331_v19 }
 0x39f   :  { %3336 = vmatprep.subr.bf16.mxu1 %v3335_v55  ;;  %3352 = vmatprep.subr.bf16.mxu0 %v3335_v55 }
 0x3a1   :  { %2488 = vrot.lane.b32.xlu1 %v3002_v39, %s3409_s20  ;;  %2200 = vrot.lane.b32.xlu0 %v3002_v39, %s3409_s20  ;;  %v3339_v39 = vpack.c.bf16 %v2351_v46, %v2350_v45 }
 0x3a2   :  { %3338 = vmatpush3.bf16.msra.mxu1 %v3335_v55  ;;  %3354 = vmatpush3.bf16.msra.mxu0 %v3335_v55  ;;  %v4335_v55 = vld [vmem:[%s4817_s1 + $0x18] sm:$0xff] }
 0x3a3   :  { %3340 = vmatprep.subr.bf16.mxu1 %v3339_v39  ;;  %3356 = vmatprep.subr.bf16.mxu0 %v3339_v39 }
 0x3a5   :  { %2509 = vrot.lane.b32.xlu1 %v3003_v49, %s3407_s24  ;;  %2221 = vrot.lane.b32.xlu0 %v3003_v49, %s3407_s24 }
 0x3a6   :  { %3342 = vmatpush3.bf16.msra.mxu1 %v3339_v39  ;;  %3358 = vmatpush3.bf16.msra.mxu0 %v3339_v39 }
 0x3a7   :  { %3359 = vmatprep.subr.bf16.mxu1 %v4830_v35 }
 0x3a9   :  { %2541 = vrot.lane.b32.xlu1 %v3007_v15, %s3409_s20  ;;  %2254 = vrot.lane.b32.xlu0 %v3007_v15, %s3409_s20 }
 0x3ad   :  { %2562 = vrot.lane.b32.xlu1 %v3009_v9, %s3407_s24  ;;  %2275 = vrot.lane.b32.xlu0 %v3009_v9, %s3407_s24 }
 0x3b1   :  { %2594 = vrot.lane.b32.xlu1 %v3013_v50, %s3409_s20  ;;  %2308 = vrot.lane.b32.xlu0 %v3013_v50, %s3409_s20 }
 0x3b5   :  { %2615 = vrot.lane.b32.xlu1 %v3015_v48, %s3407_s24  ;;  %2329 = vrot.lane.b32.xlu0 %v3015_v48, %s3407_s24 }
 0x40b   :  { %v2179_v21 = vpop.permute.xlu1 %2178  ;;  %v2177_v63 = vpop.permute.xlu0 %2176 }
 0x40c   :  { %2184 = vst.msk [vmem:[#allocation6 + $0x9] sm:$0xff] %vm2182_vm10, %v2179_v21  ;;  %2183 = vst.msk [vmem:[#allocation6 + $0x1] sm:$0xff] %vm2182_vm10, %v2177_v63  ;;  %v62_v21 = vld [vmem:[%s4818_s2 + $0x1] sm:$0xff] }
 0x40f   :  { %v2466_v33 = vpop.permute.xlu0 %2465  ;;  %v2468_v0 = vpop.permute.xlu1 %2467 }
 0x413   :  { %v4159_v47 = vld [vmem:[#allocation6] sm:$0xff]  ;;  %v4161_v22 = vld [vmem:[#allocation6 + $0x9] sm:$0xff]  ;;  %v2201_v61 = vpop.permute.xlu0 %2200  ;;  %v2489_v51 = vpop.permute.xlu1 %2488 }
 0x414   :  { %v4163_v59 = vld [vmem:[#allocation6 + $0xa] sm:$0xff]  ;;  %v4167_v37 = vld [vmem:[#allocation6 + $0x2] sm:$0xff]  ;;  %v2203_v24 = vmul.f32 %v2201_v61, %v4159_v47 }
 0x415   :  { %v4165_v34 = vld [vmem:[#allocation6 + $0x8] sm:$0xff] }
 0x416   :  { %v4169_v1 = vld [vmem:[#allocation6 + $0x1] sm:$0xff]  ;;  %2472 = vst.msk [vmem:[#allocation6 + $0x9] sm:$0xff] %vm2182_vm10, %v2468_v0  ;;  %2207 = vrot.lane.b32.xlu0 %v2203_v24, %s3411_s23  ;;  %v2204_v4 = vmul.f32 %v2201_v61, %v4165_v34  ;;  %v67_v0 = vrot.slane %v62_v21, 7  ;;  %v63_v24 = vld [vmem:[%s4818_s2 + $0x9] sm:$0xff] }
 0x417   :  { %2471 = vst.msk [vmem:[#allocation6 + $0x1] sm:$0xff] %vm2182_vm10, %v2466_v33  ;;  %v2222_v52 = vpop.permute.xlu0 %2221  ;;  %v2510_v53 = vpop.permute.xlu1 %2509 }
 0x418   :  { %v2224_v43 = vmul.f32 %v2222_v52, %v4159_v47  ;;  %v2225_v17 = vmul.f32 %v2222_v52, %v4165_v34  ;;  %v4367_v46 = vadd.f32 %v4335_v55, %v67_v0 }
 0x41a   :  { %2209 = vrot.lane.b32.xlu0 %v2204_v4, %s3411_s23 }
 0x41b   :  { %v2255_v18 = vpop.permute.xlu0 %2254  ;;  %v2542_v3 = vpop.permute.xlu1 %2541 }
 0x41c   :  { %v2257_v57 = vmul.f32 %v2255_v18, %v4169_v1  ;;  %v2258_v7 = vmul.f32 %v2255_v18, %v4161_v22 }
 0x41d   :  { %v4213_v20 = vld [vmem:[#allocation6 + $0x9] sm:$0xff] }
 0x41e   :  { %v4177_v36 = vld [vmem:[#allocation6] sm:$0xff]  ;;  %v4181_v6 = vld [vmem:[#allocation6 + $0x8] sm:$0xff]  ;;  %2228 = vrot.lane.b32.xlu0 %v2224_v43, %s3412_s26  ;;  %v2545_v38 = vmul.f32 %v2542_v3, %v4213_v20 }
 0x41f   :  { %v2491_v26 = vmul.f32 %v2489_v51, %v4177_v36  ;;  %v2492_v2 = vmul.f32 %v2489_v51, %v4181_v6  ;;  %v2512_v8 = vmul.f32 %v2510_v53, %v4177_v36  ;;  %v2513_v23 = vmul.f32 %v2510_v53, %v4181_v6  ;;  %v2276_v13 = vpop.permute.xlu0 %2275  ;;  %v4201_v14 = vld [vmem:[#allocation6 + $0x1] sm:$0xff]  ;;  %v2563_v42 = vpop.permute.xlu1 %2562  ;;  %v4254_v4 = vld [vmem:[#allocation6 + $0xa] sm:$0xff] }
 0x420   :  { %v2278_v58 = vmul.f32 %v2276_v13, %v4169_v1  ;;  %v2544_v62 = vmul.f32 %v2542_v3, %v4201_v14  ;;  %v2279_v11 = vmul.f32 %v2276_v13, %v4161_v22  ;;  %v2565_v49 = vmul.f32 %v2563_v42, %v4201_v14  ;;  %v4245_v63 = vld [vmem:[#allocation6 + $0x2] sm:$0xff]  ;;  %v4274_v53 = vld [vmem:[%s4817_s1 + $0x10] sm:$0xf] }
 0x421   :  { %2495 = vrot.lane.b32.xlu1 %v2491_v26, %s3411_s23  ;;  %v2566_v9 = vmul.f32 %v2563_v42, %v4213_v20  ;;  %v4262_v26 = vld [vmem:[%s4817_s1] sm:$0xff] }
 0x422   :  { %2230 = vrot.lane.b32.xlu0 %v2225_v17, %s3412_s26  ;;  %v4265_v17 = vadd.f32 %v4262_v26, %v67_v0  ;;  %v256_v10 = vadd.f32 %v4262_v26, %v250_v54  ;;  %v4355_v42 = vld [vmem:[%s4817_s1 + $0x20] sm:$0xff]  ;;  %v274_v39 = vrot.slane %v4262_v26, 1 }
 0x423   :  { %v2309_v41 = vpop.permute.xlu0 %2308  ;;  %v2595_v48 = vpop.permute.xlu1 %2594 }
 0x424   :  { %v2311_v12 = vmul.f32 %v2309_v41, %v4167_v37  ;;  %v2312_v15 = vmul.f32 %v2309_v41, %v4163_v59  ;;  %v2597_v61 = vmul.f32 %v2595_v48, %v4245_v63  ;;  %v2598_v51 = vmul.f32 %v2595_v48, %v4254_v4  ;;  %v4348_v41 = vld [vmem:[%s4817_s1 + $0x28] sm:$0xf] }
 0x425   :  { %2497 = vrot.lane.b32.xlu1 %v2492_v2, %s3411_s23  ;;  %v68_v2 = vrot.slane %v63_v24, 7  ;;  %v263_v19 = vrot.slane %v256_v10, 1  ;;  %v4398_v48 = vrot.slane %v4348_v41, 1 }
 0x426   :  { %2261 = vrot.lane.b32.xlu0 %v2257_v57, %s3411_s23 }
 0x427   :  { %v2330_v50 = vpop.permute.xlu0 %2329  ;;  %v2616_v43 = vpop.permute.xlu1 %2615  ;;  %v4277_v57 = vadd.f32 %v4274_v53, %v68_v2 }
 0x428   :  { %v2332_v33 = vmul.f32 %v2330_v50, %v4167_v37  ;;  %v2333_v52 = vmul.f32 %v2330_v50, %v4163_v59  ;;  %v2618_v18 = vmul.f32 %v2616_v43, %v4245_v63  ;;  %v2619_v60 = vmul.f32 %v2616_v43, %v4254_v4 }
 0x429   :  { %2516 = vrot.lane.b32.xlu1 %v2512_v8, %s3412_s26  ;;  %v69_v8 = vsel %vm66_vm5, %v67_v0, %v68_v2  ;;  %v1279_v50 = vrot.slane %v4355_v42, 1  ;;  %v1261_v0 = vadd.f32 %v4335_v55, %v250_v54 }
 0x42a   :  { %2263 = vrot.lane.b32.xlu0 %v2258_v7, %s3411_s23  ;;  %v246_v7 = vld [vmem:[%s4818_s2 + $0xa] sm:$0xff]  ;;  %v4358_v45 = vadd.f32 %v4355_v42, %v69_v8 }
 0x42b   :  { %v4299_v3 = vrot.slane %v246_v7, 6  ;;  %v4406_v21 = vsel %vm262_vm0, %v1279_v50, %v4398_v48 }
 0x42d   :  { %2518 = vrot.lane.b32.xlu1 %v2513_v23, %s3412_s26  ;;  %v4294_v23 = vld [vmem:[%s4817_s1 + $0x8] sm:$0xff]  ;;  %v252_v29 = vsel %vm249_vm6, %v250_v54, %v4299_v3  ;;  %v258_v32 = vadd.f32 %v4274_v53, %v4299_v3 }
 0x42e   :  { %2282 = vrot.lane.b32.xlu0 %v2278_v58, %s3412_s26  ;;  %v4297_v13 = vadd.f32 %v4294_v23, %v69_v8  ;;  %v257_v58 = vadd.f32 %v4294_v23, %v252_v29  ;;  %v1262_v24 = vadd.f32 %v4355_v42, %v252_v29  ;;  %v1263_v8 = vadd.f32 %v4348_v41, %v4299_v3  ;;  %v2988_v29 = vld [vmem:[%s4822_s6 + $0x4] ss:$0 sm:$0xff] }
 0x430   :  { %v1268_v43 = vrot.slane %v1262_v24, 1  ;;  %v4441_v54 = vrot.slane %v1263_v8, 1 }
 0x431   :  { %2548 = vrot.lane.b32.xlu1 %v2544_v62, %s3411_s23  ;;  %v264_v62 = vrot.slane %v257_v58, 1 }
 0x432   :  { %2284 = vrot.lane.b32.xlu0 %v2279_v11, %s3412_s26  ;;  %v4330_v11 = vrot.slane %v258_v32, 1 }
 0x433   :  { %v4322_v31 = vsel %vm262_vm0, %v263_v19, %v264_v62 }
 0x435   :  { %2550 = vrot.lane.b32.xlu1 %v2545_v38, %s3411_s23  ;;  %v4343_v38 = vsel %vm262_vm0, %v264_v62, %v4330_v11 }
 0x436   :  { %2315 = vrot.lane.b32.xlu0 %v2311_v12, %s3411_s23  ;;  %v4374_v12 = vadd.f32 %v4348_v41, %v68_v2 }
 0x439   :  { %2569 = vrot.lane.b32.xlu1 %v2565_v49, %s3412_s26  ;;  %v275_v49 = vrot.slane %v4294_v23, 1 }
 0x43a   :  { %2317 = vrot.lane.b32.xlu0 %v2312_v15, %s3411_s23 }
 0x43b   :  { %v4387_v15 = vsel %vm262_vm0, %v274_v39, %v275_v49 }
 0x43d   :  { %2571 = vrot.lane.b32.xlu1 %v2566_v9, %s3412_s26  ;;  %v4392_v9 = vrot.slane %v4274_v53, 1 }
 0x43e   :  { %2336 = vrot.lane.b32.xlu0 %v2332_v33, %s3412_s26 }
 0x43f   :  { %v4410_v33 = vsel %vm262_vm0, %v275_v49, %v4392_v9 }
 0x441   :  { %2601 = vrot.lane.b32.xlu1 %v2597_v61, %s3411_s23  ;;  %v1278_v61 = vrot.slane %v4335_v55, 1 }
 0x442   :  { %2338 = vrot.lane.b32.xlu0 %v2333_v52, %s3412_s26 }
 0x443   :  { %v4420_v52 = vsel %vm262_vm0, %v1278_v61, %v1279_v50  ;;  %v4456_v50 = vsel %vm262_vm0, %v1268_v43, %v4441_v54 }
 0x445   :  { %2603 = vrot.lane.b32.xlu1 %v2598_v51, %s3411_s23  ;;  %v1267_v51 = vrot.slane %v1261_v0, 1 }
 0x446   :  { %98 = vrot.lane.b32.xlu0 %v4265_v17, %s3411_s23 }
 0x449   :  { %2622 = vrot.lane.b32.xlu1 %v2618_v18, %s3412_s26  ;;  %v2984_v18 = vld [vmem:[%s4822_s6] ss:$0 sm:$0xff] }
 0x44a   :  { %102 = vrot.lane.b32.xlu0 %v4277_v57, %s3411_s23  ;;  %v2192_v7 = vmul.f32 %v2984_v18, %v4159_v47  ;;  %v2193_v58 = vmul.f32 %v2984_v18, %v4165_v34  ;;  %v2244_v47 = vmul.f32 %v2988_v29, %v4169_v1  ;;  %v2245_v34 = vmul.f32 %v2988_v29, %v4161_v22 }
 0x44b   :  { %v2480_v24 = vmul.f32 %v2984_v18, %v4177_v36  ;;  %v2531_v22 = vmul.f32 %v2988_v29, %v4201_v14  ;;  %v2532_v14 = vmul.f32 %v2988_v29, %v4213_v20 }
 0x44d   :  { %2624 = vrot.lane.b32.xlu1 %v2619_v60, %s3412_s26  ;;  %v4436_v60 = vsel %vm262_vm0, %v1267_v51, %v1268_v43 }
 0x44e   :  { %115 = vrot.lane.b32.xlu0 %v4294_v23, %s3411_s23 }
 0x451   :  { %100 = vrot.lane.b32.xlu1 %v4297_v13, %s3411_s23 }
 0x452   :  { %173 = vrot.lane.b32.xlu0 %v4265_v17, %s3412_s26 }
 0x455   :  { %113 = vrot.lane.b32.xlu1 %v4262_v26, %s3411_s23 }
 0x456   :  { %177 = vrot.lane.b32.xlu0 %v4277_v57, %s3412_s26 }
 0x459   :  { %117 = vrot.lane.b32.xlu1 %v4274_v53, %s3411_s23 }
 0x45a   :  { %187 = vrot.lane.b32.xlu0 %v4294_v23, %s3412_s26 }
 0x45d   :  { %175 = vrot.lane.b32.xlu1 %v4297_v13, %s3412_s26 }
 0x45e   :  { %334 = vrot.lane.b32.xlu0 %v4322_v31, %s3411_s23 }
 0x461   :  { %185 = vrot.lane.b32.xlu1 %v4262_v26, %s3412_s26 }
 0x462   :  { %1119 = vrot.lane.b32.xlu0 %v4335_v55, %s3411_s23 }
 0x465   :  { %189 = vrot.lane.b32.xlu1 %v4274_v53, %s3412_s26 }
 0x466   :  { %1123 = vrot.lane.b32.xlu0 %v4348_v41, %s3411_s23 }
 0x469   :  { %336 = vrot.lane.b32.xlu1 %v4343_v38, %s3411_s23 }
 0x46a   :  { %1106 = vrot.lane.b32.xlu0 %v4358_v45, %s3411_s23 }
 0x46d   :  { %1121 = vrot.lane.b32.xlu1 %v4355_v42, %s3411_s23 }
 0x46e   :  { %1191 = vrot.lane.b32.xlu0 %v4335_v55, %s3412_s26 }
 0x471   :  { %1104 = vrot.lane.b32.xlu1 %v4367_v46, %s3411_s23 }
 0x472   :  { %1195 = vrot.lane.b32.xlu0 %v4348_v41, %s3412_s26 }
 0x475   :  { %1108 = vrot.lane.b32.xlu1 %v4374_v12, %s3411_s23 }
 0x476   :  { %1181 = vrot.lane.b32.xlu0 %v4358_v45, %s3412_s26 }
 0x479   :  { %1193 = vrot.lane.b32.xlu1 %v4355_v42, %s3412_s26 }
 0x47a   :  { %346 = vrot.lane.b32.xlu0 %v4387_v15, %s3411_s23 }
 0x47d   :  { %1179 = vrot.lane.b32.xlu1 %v4367_v46, %s3412_s26 }
 0x47e   :  { %350 = vrot.lane.b32.xlu0 %v4392_v9, %s3411_s23 }
 0x481   :  { %1183 = vrot.lane.b32.xlu1 %v4374_v12, %s3412_s26 }
 0x482   :  { %1349 = vrot.lane.b32.xlu0 %v4406_v21, %s3411_s23 }
 0x485   :  { %348 = vrot.lane.b32.xlu1 %v4410_v33, %s3411_s23 }
 0x486   :  { %338 = vrot.lane.b32.xlu0 %v4330_v11, %s3411_s23 }
 0x488   :  { %v2208_v2 = vpop.permute.xlu0 %2207 }
 0x489   :  { %1347 = vrot.lane.b32.xlu1 %v4420_v52, %s3411_s23  ;;  %v2213_v10 = vadd.f32 %v2208_v2, %v2192_v7 }
 0x48a   :  { %432 = vrot.lane.b32.xlu0 %v4410_v33, %s3412_s26 }
 0x48c   :  { %v2210_v44 = vpop.permute.xlu0 %2209 }
 0x48d   :  { %1351 = vrot.lane.b32.xlu1 %v4398_v48, %s3411_s23  ;;  %v2214_v32 = vadd.f32 %v2210_v44, %v2193_v58  ;;  %v2481_v44 = vmul.f32 %v2984_v18, %v4181_v6  ;;  %v502_v58 = vld [vmem:[%s4818_s2 + $0x3] sm:$0xff]  ;;  %v503_v6 = vld [vmem:[%s4818_s2 + $0xb] sm:$0xff] }
 0x48e   :  { %1335 = vrot.lane.b32.xlu0 %v4436_v60, %s3411_s23 }
 0x490   :  { %v2229_v3 = vpop.permute.xlu0 %2228 }
 0x491   :  { %430 = vrot.lane.b32.xlu1 %v4387_v15, %s3412_s26  ;;  %v2234_v62 = vadd.f32 %v2229_v3, %v2213_v10 }
 0x492   :  { %1339 = vrot.lane.b32.xlu0 %v4441_v54, %s3411_s23 }
 0x493   :  { %v2496_v19 = vpop.permute.xlu1 %2495  ;;  %v2246_v39 = vadd.f32 %v2244_v47, %v2234_v62  ;;  %v530_v47 = vrot.slane %v4262_v26, 2 }
 0x494   :  { %v2231_v49 = vpop.permute.xlu0 %2230  ;;  %v2501_v51 = vadd.f32 %v2496_v19, %v2480_v24  ;;  %v2994_v19 = vld [vmem:[%s4822_s6 + $0x8] ss:$0 sm:$0xff] }
 0x495   :  { %434 = vrot.lane.b32.xlu1 %v4392_v9, %s3412_s26  ;;  %v2235_v0 = vadd.f32 %v2231_v49, %v2214_v32  ;;  %v531_v32 = vrot.slane %v4294_v23, 2  ;;  %v2298_v20 = vmul.f32 %v2994_v19, %v4167_v37  ;;  %v4502_v37 = vrot.slane %v4274_v53, 2 }
 0x496   :  { %1433 = vrot.lane.b32.xlu0 %v4406_v21, %s3412_s26 }
 0x497   :  { %v2498_v61 = vpop.permute.xlu1 %2497  ;;  %v2247_v1 = vadd.f32 %v2245_v34, %v2235_v0  ;;  %v507_v0 = vrot.slane %v502_v58, 5  ;;  %v4486_v34 = vrot.slane %v503_v6, 5 }
 0x498   :  { %v2262_v2 = vpop.permute.xlu0 %2261  ;;  %v2502_v36 = vadd.f32 %v2498_v61, %v2481_v44 }
 0x499   :  { %1337 = vrot.lane.b32.xlu1 %v4456_v50, %s3411_s23  ;;  %v2267_v62 = vadd.f32 %v2262_v2, %v2246_v39  ;;  %v4494_v2 = vsel %vm324_vm1, %v530_v47, %v531_v32  ;;  %v509_v44 = vsel %vm506_vm7, %v507_v0, %v4486_v34  ;;  %v513_v58 = vadd.f32 %v4262_v26, %v507_v0 }
 0x49a   :  { %418 = vrot.lane.b32.xlu0 %v4322_v31, %s3412_s26  ;;  %v514_v6 = vadd.f32 %v4294_v23, %v509_v44  ;;  %v2584_v47 = vmul.f32 %v2994_v19, %v4245_v63 }
 0x49b   :  { %v2517_v8 = vpop.permute.xlu1 %2516 }
 0x49c   :  { %v2522_v43 = vadd.f32 %v2517_v8, %v2501_v51  ;;  %v2264_v7 = vpop.permute.xlu0 %2263 }
 0x49d   :  { %1431 = vrot.lane.b32.xlu1 %v4420_v52, %s3412_s26  ;;  %v2268_v29 = vadd.f32 %v2264_v7, %v2247_v1  ;;  %v1531_v1 = vrot.slane %v4355_v42, 2 }
 0x49e   :  { %v2533_v10 = vadd.f32 %v2531_v22, %v2522_v43  ;;  %422 = vrot.lane.b32.xlu0 %v4330_v11, %s3412_s26 }
 0x49f   :  { %v2519_v3 = vpop.permute.xlu1 %2518 }
 0x4a0   :  { %v2523_v18 = vadd.f32 %v2519_v3, %v2502_v36  ;;  %v2283_v49 = vpop.permute.xlu0 %2282  ;;  %v2299_v36 = vmul.f32 %v2994_v19, %v4163_v59  ;;  %v4508_v3 = vrot.slane %v4348_v41, 2 }
 0x4a1   :  { %1435 = vrot.lane.b32.xlu1 %v4398_v48, %s3412_s26  ;;  %v2288_v51 = vadd.f32 %v2283_v49, %v2267_v62 }
 0x4a2   :  { %v2534_v61 = vadd.f32 %v2532_v14, %v2523_v18  ;;  %1421 = vrot.lane.b32.xlu0 %v4456_v50, %s3412_s26  ;;  %v4519_v49 = vsel %vm324_vm1, %v1531_v1, %v4508_v3 }
 0x4a3   :  { %v2549_v24 = vpop.permute.xlu1 %2548  ;;  %v2300_v39 = vadd.f32 %v2298_v20, %v2288_v51  ;;  %v519_v51 = vrot.slane %v513_v58, 2  ;;  %v520_v20 = vrot.slane %v514_v6, 2  ;;  %v515_v58 = vadd.f32 %v4274_v53, %v4486_v34 }
 0x4a4   :  { %v2285_v8 = vpop.permute.xlu0 %2284  ;;  %v2554_v59 = vadd.f32 %v2549_v24, %v2533_v10  ;;  %v4523_v10 = vsel %vm324_vm1, %v531_v32, %v4502_v37 }
 0x4a5   :  { %420 = vrot.lane.b32.xlu1 %v4343_v38, %s3412_s26  ;;  %v2289_v22 = vadd.f32 %v2285_v8, %v2268_v29  ;;  %v4534_v32 = vsel %vm324_vm1, %v519_v51, %v520_v20 }
 0x4a6   :  { %602 = vrot.lane.b32.xlu0 %v4494_v2, %s3411_s23 }
 0x4a7   :  { %v2551_v43 = vpop.permute.xlu1 %2550  ;;  %v2301_v7 = vadd.f32 %v2299_v36, %v2289_v22  ;;  %v1530_v22 = vrot.slane %v4335_v55, 2 }
 0x4a8   :  { %v2316_v18 = vpop.permute.xlu0 %2315  ;;  %v2555_v29 = vadd.f32 %v2551_v43, %v2534_v61 }
 0x4a9   :  { %1419 = vrot.lane.b32.xlu1 %v4436_v60, %s3412_s26  ;;  %v2321_v6 = vadd.f32 %v2316_v18, %v2300_v39  ;;  %v4537_v43 = vsel %vm324_vm1, %v1530_v22, %v1531_v1  ;;  %v1513_v39 = vadd.f32 %v4335_v55, %v507_v0  ;;  %v1514_v18 = vadd.f32 %v4355_v42, %v509_v44 }
 0x4aa   :  { %606 = vrot.lane.b32.xlu0 %v4502_v37, %s3411_s23 }
 0x4ab   :  { %v2570_v14 = vpop.permute.xlu1 %2569 }
 0x4ac   :  { %v2575_v62 = vadd.f32 %v2570_v14, %v2554_v59  ;;  %v2318_v8 = vpop.permute.xlu0 %2317  ;;  %v2585_v59 = vmul.f32 %v2994_v19, %v4254_v4  ;;  %v4541_v4 = vrot.slane %v515_v58, 2 }
 0x4ad   :  { %1423 = vrot.lane.b32.xlu1 %v4441_v54, %s3412_s26  ;;  %v2322_v19 = vadd.f32 %v2318_v8, %v2301_v7  ;;  %v1519_v7 = vrot.slane %v1513_v39, 2  ;;  %v1520_v8 = vrot.slane %v1514_v18, 2 }
 0x4ae   :  { %v2586_v24 = vadd.f32 %v2584_v47, %v2575_v62  ;;  %1601 = vrot.lane.b32.xlu0 %v4519_v49, %s3411_s23 }
 0x4af   :  { %v2572_v36 = vpop.permute.xlu1 %2571 }
 0x4b0   :  { %v2576_v63 = vadd.f32 %v2572_v36, %v2555_v29  ;;  %v2337_v61 = vpop.permute.xlu0 %2336  ;;  %v4555_v36 = vsel %vm324_vm1, %v520_v20, %v4541_v4 }
 0x4b1   :  { %604 = vrot.lane.b32.xlu1 %v4523_v10, %s3411_s23  ;;  %v2342_v47 = vadd.f32 %v2337_v61, %v2321_v6 }
 0x4b2   :  { %v2587_v14 = vadd.f32 %v2585_v59, %v2576_v63  ;;  %590 = vrot.lane.b32.xlu0 %v4534_v32, %s3411_s23  ;;  %v1515_v59 = vadd.f32 %v4348_v41, %v4486_v34 }
 0x4b3   :  { %v2602_v62 = vpop.permute.xlu1 %2601  ;;  %3210 = vmatprep.mubr.msk.f32.mxu1 %vm826_vm3, %v2342_v47 }
 0x4b4   :  { %v2339_v1 = vpop.permute.xlu0 %2338  ;;  %v2607_v22 = vadd.f32 %v2602_v62, %v2586_v24  ;;  %v4566_v24 = vsel %vm324_vm1, %v1519_v7, %v1520_v8  ;;  %v4571_v61 = vrot.slane %v1515_v59, 2 }
 0x4b5   :  { %1599 = vrot.lane.b32.xlu1 %v4537_v43, %s3411_s23  ;;  %v2343_v29 = vadd.f32 %v2339_v1, %v2322_v19 }
 0x4b6   :  { %594 = vrot.lane.b32.xlu0 %v4541_v4, %s3411_s23 }
 0x4b7   :  { %v2604_v51 = vpop.permute.xlu1 %2603  ;;  %3211 = vmatmul.mubr.msk.f32.vlgmr.msra.gmra.mrb[4].mxu1 %vm826_vm3, %v2343_v29  ;;  %v763_v29 = vld [vmem:[%s4819_s3 + $0x8] sm:$0xff] }
 0x4b8   :  { %v99_v0 = vpop.permute.xlu0 %98  ;;  %3248 = vmatprep.mubr.msk.f32.mxu1 %vm3415_vm4, %v3416_v16  ;;  %v2608_v20 = vadd.f32 %v2604_v51, %v2587_v14  ;;  %v4583_v14 = vsel %vm324_vm1, %v1520_v8, %v4571_v61  ;;  %v762_v51 = vld [vmem:[%s4819_s3] sm:$0xff] }
 0x4b9   :  { %1603 = vrot.lane.b32.xlu1 %v4508_v3, %s3411_s23  ;;  %v107_v62 = vmax.f32 %v4265_v17, %v99_v0  ;;  %v766_v0 = vrot.slane %v762_v51, 7 }
 0x4ba   :  { %688 = vrot.lane.b32.xlu0 %v4523_v10, %s3412_s26 }
 0x4bb   :  { %v2623_v44 = vpop.permute.xlu1 %2622 }
 0x4bc   :  { %v2628_v63 = vadd.f32 %v2623_v44, %v2607_v22  ;;  %v103_v58 = vpop.permute.xlu0 %102  ;;  %v767_v44 = vrot.slane %v763_v29, 7 }
 0x4bd   :  { %592 = vrot.lane.b32.xlu1 %v4555_v36, %s3411_s23  ;;  %v109_v39 = vmax.f32 %v4277_v57, %v103_v58 }
 0x4be   :  { %3229 = vmatprep.mubr.msk.f32.mxu0 %vm826_vm3, %v2628_v63  ;;  %1587 = vrot.lane.b32.xlu0 %v4566_v24, %s3411_s23 }
 0x4bf   :  { %v2625_v6 = vpop.permute.xlu1 %2624 }
 0x4c0   :  { %v2629_v16 = vadd.f32 %v2625_v6, %v2608_v20  ;;  %v116_v34 = vpop.permute.xlu0 %115 }
 0x4c1   :  { %686 = vrot.lane.b32.xlu1 %v4494_v2, %s3412_s26  ;;  %v123_v7 = vadd.f32 %v4294_v23, %v116_v34 }
 0x4c2   :  { %3230 = vmatmul.mubr.msk.f32.vlgmr.msra.gmra.mrb[6].mxu0 %vm826_vm3, %v2629_v16  ;;  %1591 = vrot.lane.b32.xlu0 %v4571_v61, %s3411_s23 }
 0x4c3   :  { %v101_v47 = vpop.permute.xlu1 %100 }
 0x4c4   :  { %v174_v19 = vpop.permute.xlu0 %173  ;;  %v108_v22 = vmax.f32 %v4297_v13, %v101_v47  ;;  %v768_v13 = vsel %vm66_vm5, %v766_v0, %v767_v44 }
 0x4c5   :  { %690 = vrot.lane.b32.xlu1 %v4502_v37, %s3412_s26  ;;  %v182_v1 = vmax.f32 %v107_v62, %v174_v19 }
 0x4c6   :  { %1685 = vrot.lane.b32.xlu0 %v4519_v49, %s3412_s26 }
 0x4c7   :  { %v114_v18 = vpop.permute.xlu1 %113  ;;  %v271_v58 = vmax.f32 %v182_v1, %v4322_v31 }
 0x4c8   :  { %v178_v17 = vpop.permute.xlu0 %177  ;;  %v122_v6 = vadd.f32 %v4262_v26, %v114_v18  ;;  %v788_v18 = vstv %s2909_s0 }
 0x4c9   :  { %1589 = vrot.lane.b32.xlu1 %v4583_v14, %s3411_s23  ;;  %v4597_v8 = vmax.f32 %v109_v39, %v178_v17  ;;  %v789_v29 = vmul.f32 %v4262_v26, %v788_v18  ;;  %v791_v26 = vmul.f32 %v4274_v53, %v788_v18 }
 0x4ca   :  { %674 = vrot.lane.b32.xlu0 %v4534_v32, %s3412_s26 }
 0x4cb   :  { %v118_v57 = vpop.permute.xlu1 %117 }
 0x4cc   :  { %v188_v63 = vpop.permute.xlu0 %187  ;;  %v124_v19 = vadd.f32 %v4274_v53, %v118_v57 }
 0x4cd   :  { %1683 = vrot.lane.b32.xlu1 %v4537_v43, %s3412_s26  ;;  %v4604_v20 = vadd.f32 %v188_v63, %v123_v7  ;;  %v790_v7 = vmul.f32 %v4294_v23, %v788_v18 }
 0x4ce   :  { %678 = vrot.lane.b32.xlu0 %v4541_v4, %s3412_s26 }
 0x4cf   :  { %v176_v59 = vpop.permute.xlu1 %175 }
 0x4d0   :  { %v183_v16 = vmax.f32 %v108_v22, %v176_v59  ;;  %v335_v34 = vpop.permute.xlu0 %334  ;;  %v795_v59 = vrot.slane %v789_v29, 1 }
 0x4d1   :  { %1687 = vrot.lane.b32.xlu1 %v4508_v3, %s3412_s26  ;;  %v4613_v47 = vmax.f32 %v271_v58, %v335_v34  ;;  %v1784_v34 = vmul.f32 %v4355_v42, %v788_v18 }
 0x4d2   :  { %771 = vrot.lane.b32.xlu0 %v768_v13, %s3409_s20  ;;  %v272_v51 = vmax.f32 %v183_v16, %v4343_v38  ;;  %v796_v38 = vrot.slane %v790_v7, 1 }
 0x4d3   :  { %v186_v62 = vpop.permute.xlu1 %185  ;;  %v1790_v53 = vrot.slane %v1784_v34, 1 }
 0x4d4   :  { %v194_v39 = vadd.f32 %v186_v62, %v122_v6  ;;  %v1120_v31 = vpop.permute.xlu0 %1119  ;;  %v797_v23 = vsel %vm262_vm0, %v795_v59, %v796_v38  ;;  %v1785_v62 = vmul.f32 %v4348_v41, %v788_v18 }
 0x4d5   :  { %676 = vrot.lane.b32.xlu1 %v4555_v36, %s3412_s26  ;;  %v1128_v6 = vadd.f32 %v4335_v55, %v1120_v31  ;;  %v798_v31 = vrot.slane %v791_v26, 1 }
 0x4d6   :  { %1671 = vrot.lane.b32.xlu0 %v4566_v24, %s3412_s26 }
 0x4d7   :  { %v190_v1 = vpop.permute.xlu1 %189 }
 0x4d8   :  { %v196_v17 = vadd.f32 %v190_v1, %v124_v19  ;;  %v1124_v57 = vpop.permute.xlu0 %1123 }
 0x4d9   :  { %769 = vrot.lane.b32.xlu1 %v766_v0, %s3409_s20  ;;  %v1130_v1 = vadd.f32 %v4348_v41, %v1124_v57  ;;  %v799_v57 = vsel %vm262_vm0, %v796_v38, %v798_v31 }
 0x4da   :  { %1675 = vrot.lane.b32.xlu0 %v4571_v61, %s3412_s26  ;;  %v284_v38 = vadd.f32 %v4392_v9, %v196_v17 }
 0x4db   :  { %v337_v22 = vpop.permute.xlu1 %336 }
 0x4dc   :  { %v4625_v63 = vmax.f32 %v272_v51, %v337_v22  ;;  %v1107_v58 = vpop.permute.xlu0 %1106  ;;  %v1783_v22 = vmul.f32 %v4335_v55, %v788_v18  ;;  %v282_v55 = vadd.f32 %v4387_v15, %v194_v39 }
 0x4dd   :  { %773 = vrot.lane.b32.xlu1 %v767_v44, %s3409_s20  ;;  %v1114_v59 = vmax.f32 %v4358_v45, %v1107_v58 }
 0x4de   :  { %1767 = vrot.lane.b32.xlu0 %v768_v13, %s3409_s20  ;;  %v1792_v13 = vrot.slane %v1785_v62, 1 }
 0x4df   :  { %v1122_v16 = vpop.permute.xlu1 %1121 }
 0x4e0   :  { %v1192_v19 = vpop.permute.xlu0 %1191  ;;  %v1129_v35 = vadd.f32 %v4355_v42, %v1122_v16  ;;  %v1793_v41 = vsel %vm262_vm0, %v1790_v53, %v1792_v13 }
 0x4e1   :  { %1673 = vrot.lane.b32.xlu1 %v4583_v14, %s3412_s26  ;;  %v1200_v29 = vadd.f32 %v1192_v19, %v1128_v6  ;;  %v1789_v6 = vrot.slane %v1783_v22, 1 }
 0x4e2   :  { %800 = vrot.lane.b32.xlu0 %v797_v23, %s3411_s23 }
 0x4e3   :  { %v1105_v51 = vpop.permute.xlu1 %1104  ;;  %v1791_v42 = vsel %vm262_vm0, %v1789_v6, %v1790_v53  ;;  %v1286_v9 = vadd.f32 %v4420_v52, %v1200_v29 }
 0x4e4   :  { %v1196_v7 = vpop.permute.xlu0 %1195  ;;  %v1113_v45 = vmax.f32 %v4367_v46, %v1105_v51 }
 0x4e5   :  { %1765 = vrot.lane.b32.xlu1 %v766_v0, %s3409_s20  ;;  %v1202_v56 = vadd.f32 %v1196_v7, %v1130_v1  ;;  %v283_v1 = vadd.f32 %v4410_v33, %v4604_v20 }
 0x4e6   :  { %804 = vrot.lane.b32.xlu0 %v798_v31, %s3411_s23 }
 0x4e7   :  { %v1109_v40 = vpop.permute.xlu1 %1108 }
 0x4e8   :  { %v1182_v0 = vpop.permute.xlu0 %1181  ;;  %v1115_v34 = vmax.f32 %v4374_v12, %v1109_v40  ;;  %v273_v40 = vmax.f32 %v4597_v8, %v4330_v11 }
 0x4e9   :  { %1769 = vrot.lane.b32.xlu1 %v767_v44, %s3409_s20  ;;  %v1189_v23 = vmax.f32 %v1114_v59, %v1182_v0  ;;  %v1288_v59 = vadd.f32 %v4398_v48, %v1202_v56 }
 0x4ea   :  { %1796 = vrot.lane.b32.xlu0 %v1793_v41, %s3411_s23 }
 0x4eb   :  { %v1194_v26 = vpop.permute.xlu1 %1193  ;;  %v1276_v56 = vmax.f32 %v1189_v23, %v4456_v50  ;;  %v2745_v50 = vld [vmem:[%s4826_s10] sm:$0xff]  ;;  %v2746_v23 = vld [vmem:[%s4826_s10 + $0x8] sm:$0xff] }
 0x4ec   :  { %v1201_v18 = vadd.f32 %v1194_v26, %v1129_v35  ;;  %v347_v44 = vpop.permute.xlu0 %346 }
 0x4ed   :  { %802 = vrot.lane.b32.xlu1 %v799_v57, %s3411_s23  ;;  %v355_v16 = vadd.f32 %v347_v44, %v282_v55 }
 0x4ee   :  { %v1287_v35 = vadd.f32 %v4406_v21, %v1201_v18 }
 0x4ef   :  { %v1180_v58 = vpop.permute.xlu1 %1179 }
 0x4f0   :  { %v1188_v62 = vmax.f32 %v1113_v45, %v1180_v58  ;;  %v351_v15 = vpop.permute.xlu0 %350 }
 0x4f1   :  { %1794 = vrot.lane.b32.xlu1 %v1791_v42, %s3411_s23  ;;  %v357_v46 = vadd.f32 %v351_v15, %v284_v38 }
 0x4f3   :  { %v1184_v39 = vpop.permute.xlu1 %1183 }
 0x4f4   :  { %v1190_v19 = vmax.f32 %v1115_v34, %v1184_v39  ;;  %v1350_v51 = vpop.permute.xlu0 %1349 }
 0x4f5   :  { %1798 = vrot.lane.b32.xlu1 %v1792_v13, %s3411_s23  ;;  %v1357_v53 = vadd.f32 %v1350_v51, %v1287_v35  ;;  %v1275_v13 = vmax.f32 %v1188_v62, %v4436_v60  ;;  %v3360_v35 = vpack.c.bf16 %v2746_v23, %v2745_v50  ;;  %v4832_v51 = vmov 0.0|0.0  }
 0x4f6   :  { %v1277_v11 = vmax.f32 %v1190_v19, %v4441_v54 }
 0x4f7   :  { %v349_v31 = vpop.permute.xlu1 %348  ;;  %3361 = vmatpush3.bf16.msra.mxu1 %v3360_v35 }
 0x4f8   :  { %v356_v12 = vadd.f32 %v349_v31, %v283_v1  ;;  %v339_v17 = vpop.permute.xlu0 %338  ;;  %3362 = vmatprep.subr.bf16.mxu1 %v4832_v51  ;;  %v2747_v31 = vld [vmem:[%s4826_s10 + $0x10] sm:$0xff] }
 0x4f9   :  { %v4663_v22 = vmax.f32 %v273_v40, %v339_v17  ;;  %v2749_v17 = vld [vmem:[%s4826_s10 + $0x20] sm:$0xff] }
 0x4fb   :  { %v1348_v7 = vpop.permute.xlu1 %1347 }
 0x4fc   :  { %v1356_v21 = vadd.f32 %v1348_v7, %v1286_v9  ;;  %v433_v41 = vpop.permute.xlu0 %432  ;;  %v2750_v7 = vld [vmem:[%s4826_s10 + $0x28] sm:$0xff] }
 0x4fd   :  { %v440_v20 = vadd.f32 %v433_v41, %v356_v12  ;;  %v2751_v41 = vld [vmem:[%s4826_s10 + $0x30] sm:$0xff] }
 0x4ff   :  { %v1352_v33 = vpop.permute.xlu1 %1351 }
 0x500   :  { %v1358_v57 = vadd.f32 %v1352_v33, %v1288_v59  ;;  %v1336_v0 = vpop.permute.xlu0 %1335  ;;  %v2752_v33 = vld [vmem:[%s4826_s10 + $0x38] sm:$0xff] }
 0x501   :  { %v4667_v26 = vmax.f32 %v1275_v13, %v1336_v0 }
 0x503   :  { %v431_v6 = vpop.permute.xlu1 %430 }
 0x504   :  { %v4670_v52 = vadd.f32 %v431_v6, %v355_v16  ;;  %v1340_v8 = vpop.permute.xlu0 %1339 }
 0x505   :  { %v4672_v55 = vmax.f32 %v1277_v11, %v1340_v8 }
 0x507   :  { %v435_v29 = vpop.permute.xlu1 %434 }
 0x508   :  { %v4674_v45 = vadd.f32 %v435_v29, %v357_v46  ;;  %v1434_v48 = vpop.permute.xlu0 %1433 }
 0x509   :  { %v4677_v60 = vadd.f32 %v1434_v48, %v1357_v53  ;;  %v2748_v53 = vld [vmem:[%s4826_s10 + $0x18] sm:$0xff]  ;;  %s2908_s10 = sld [smem:[#allocation7 + $0x2]] }
 0x50a   :  { %v3363_v40 = vpack.c.bf16 %v2748_v53, %v2747_v31 }
 0x50b   :  { %v1338_v18 = vpop.permute.xlu1 %1337 }
 0x50c   :  { %v4679_v42 = vmax.f32 %v1276_v56, %v1338_v18  ;;  %v419_v44 = vpop.permute.xlu0 %418  ;;  %3364 = vmatpush3.bf16.msra.mxu1 %v3363_v40 }
 0x50d   :  { %3365 = vmatprep.subr.bf16.mxu1 %v4832_v51  ;;  %v427_v23 = vmax.f32 %v4613_v47, %v419_v44  ;;  %v540_v47 = vadd.f32 %v4502_v37, %v4674_v45  ;;  %v1539_v37 = vadd.f32 %v4519_v49, %v4677_v60 }
 0x50f   :  { %v1432_v58 = vpop.permute.xlu1 %1431 }
 0x510   :  { %v4681_v38 = vadd.f32 %v1432_v58, %v1356_v21  ;;  %v423_v54 = vpop.permute.xlu0 %422  ;;  %v3366_v21 = vpack.c.bf16 %v2750_v7, %v2749_v17  ;;  %v538_v17 = vadd.f32 %v4494_v2, %v4670_v52  ;;  %v527_v7 = vmax.f32 %v427_v23, %v4534_v32 }
 0x511   :  { %v429_v40 = vmax.f32 %v4663_v22, %v423_v54  ;;  %v4743_v2 = vstv %s2908_s10 }
 0x512   :  { %3367 = vmatpush3.bf16.msra.mxu1 %v3366_v21 }
 0x513   :  { %v1436_v16 = vpop.permute.xlu1 %1435  ;;  %3368 = vmatprep.subr.bf16.mxu1 %v4832_v51 }
 0x514   :  { %v4683_v34 = vadd.f32 %v1436_v16, %v1358_v57  ;;  %v4685_v62 = vpop.permute.xlu0 %1421  ;;  %v3369_v57 = vpack.c.bf16 %v2752_v33, %v2751_v41  ;;  %v539_v16 = vadd.f32 %v4523_v10, %v440_v20  ;;  %v529_v41 = vmax.f32 %v429_v40, %v4541_v4 }
 0x515   :  { %v1429_v22 = vmax.f32 %v4679_v42, %v4685_v62  ;;  %v758_v4 = vstv %s2907_s7  ;;  %v1538_v42 = vadd.f32 %v4537_v43, %v4681_v38 }
 0x516   :  { %3370 = vmatpush3.bf16.msra.mxu1 %v3369_v57  ;;  %v1540_v43 = vadd.f32 %v4508_v3, %v4683_v34 }
 0x517   :  { %v421_v15 = vpop.permute.xlu1 %420  ;;  %v1528_v62 = vmax.f32 %v1429_v22, %v4583_v14 }
 0x518   :  { %v603_v39 = vpop.permute.xlu0 %602  ;;  %v428_v35 = vmax.f32 %v4625_v63, %v421_v15 }
 0x519   :  { %v611_v44 = vadd.f32 %v603_v39, %v538_v17 }
 0x51a   :  { %v528_v21 = vmax.f32 %v428_v35, %v4555_v36 }
 0x51b   :  { %v4687_v46 = vpop.permute.xlu1 %1419 }
 0x51c   :  { %v607_v19 = vpop.permute.xlu0 %606  ;;  %v1428_v36 = vmax.f32 %v4667_v26, %v4687_v46 }
 0x51d   :  { %v613_v52 = vadd.f32 %v607_v19, %v540_v47 }
 0x51e   :  { %v1527_v19 = vmax.f32 %v1428_v36, %v4566_v24 }
 0x51f   :  { %v4695_v1 = vpop.permute.xlu1 %1423 }
 0x520   :  { %v4704_v12 = vpop.permute.xlu0 %1601  ;;  %v1430_v46 = vmax.f32 %v4672_v55, %v4695_v1 }
 0x521   :  { %v1609_v49 = vadd.f32 %v4704_v12, %v1539_v37 }
 0x522   :  { %v1529_v1 = vmax.f32 %v1430_v46, %v4571_v61 }
 0x523   :  { %v605_v9 = vpop.permute.xlu1 %604 }
 0x524   :  { %v591_v59 = vpop.permute.xlu0 %590  ;;  %v612_v31 = vadd.f32 %v605_v9, %v539_v16 }
 0x525   :  { %v599_v15 = vmax.f32 %v527_v7, %v591_v59 }
 0x527   :  { %v4719_v13 = vpop.permute.xlu1 %1599 }
 0x528   :  { %v595_v0 = vpop.permute.xlu0 %594 }
 0x529   :  { %v601_v39 = vmax.f32 %v529_v41, %v595_v0 }
 0x52b   :  { %v4722_v6 = vpop.permute.xlu1 %1603 }
 0x52c   :  { %v689_v11 = vpop.permute.xlu0 %688  ;;  %v1610_v3 = vadd.f32 %v4722_v6, %v1540_v43 }
 0x52d   :  { %v696_v20 = vadd.f32 %v689_v11, %v612_v31 }
 0x52f   :  { %v593_v8 = vpop.permute.xlu1 %592 }
 0x530   :  { %v4724_v29 = vpop.permute.xlu0 %1587  ;;  %v600_v9 = vmax.f32 %v528_v21, %v593_v8 }
 0x531   :  { %v1596_v55 = vmax.f32 %v1527_v19, %v4724_v29 }
 0x533   :  { %v687_v56 = vpop.permute.xlu1 %686 }
 0x534   :  { %v4726_v48 = vpop.permute.xlu0 %1591  ;;  %v695_v59 = vadd.f32 %v687_v56, %v611_v44 }
 0x535   :  { %v1598_v34 = vmax.f32 %v1529_v1, %v4726_v48 }
 0x537   :  { %v691_v18 = vpop.permute.xlu1 %690 }
 0x538   :  { %v1686_v58 = vpop.permute.xlu0 %1685  ;;  %v697_v60 = vadd.f32 %v691_v18, %v613_v52 }
 0x539   :  { %v1693_v12 = vadd.f32 %v1686_v58, %v1609_v49 }
 0x53b   :  { %v4729_v50 = vpop.permute.xlu1 %1589 }
 0x53c   :  { %v675_v51 = vpop.permute.xlu0 %674  ;;  %v1597_v24 = vmax.f32 %v1528_v62, %v4729_v50 }
 0x53d   :  { %v683_v33 = vmax.f32 %v599_v15, %v675_v51  ;;  %v1608_v51 = vadd.f32 %v4719_v13, %v1538_v42 }
 0x53f   :  { %v1684_v53 = vpop.permute.xlu1 %1683  ;;  %v759_v56 = vmul.f32 %v758_v4, %v683_v33 }
 0x540   :  { %v679_v10 = vpop.permute.xlu0 %678  ;;  %v1692_v47 = vadd.f32 %v1684_v53, %v1608_v51 }
 0x541   :  { %v685_v16 = vmax.f32 %v601_v39, %v679_v10 }
 0x543   :  { %v1688_v63 = vpop.permute.xlu1 %1687  ;;  %v761_v31 = vmul.f32 %v758_v4, %v685_v16 }
 0x544   :  { %v772_v32 = vpop.permute.xlu0 %771  ;;  %v1694_v15 = vadd.f32 %v1688_v63, %v1610_v3 }
 0x545   :  { %v779_v54 = vmul.f32 %v772_v32, %v696_v20 }
 0x547   :  { %v677_v45 = vpop.permute.xlu1 %676  ;;  %v783_v11 = vmul.f32 %v4743_v2, %v779_v54 }
 0x548   :  { %v684_v57 = vmax.f32 %v600_v9, %v677_v45  ;;  %v1672_v26 = vpop.permute.xlu0 %1671 }
 0x549   :  { %v1680_v29 = vmax.f32 %v1596_v55, %v1672_v26 }
 0x54a   :  { %v760_v8 = vmul.f32 %v758_v4, %v684_v57 }
 0x54b   :  { %v770_v0 = vpop.permute.xlu1 %769  ;;  %v1755_v22 = vmul.f32 %v1680_v29, %v758_v4 }
 0x54c   :  { %v778_v23 = vmul.f32 %v770_v0, %v695_v59  ;;  %v786_v35 = vadd.f32 %v783_v11, %v760_v8  ;;  %v1676_v38 = vpop.permute.xlu0 %1675 }
 0x54d   :  { %v1682_v32 = vmax.f32 %v1598_v34, %v1676_v38 }
 0x54e   :  { %v782_v14 = vmul.f32 %v4743_v2, %v778_v23 }
 0x54f   :  { %v774_v18 = vpop.permute.xlu1 %773  ;;  %v1757_v45 = vmul.f32 %v1682_v32, %v758_v4 }
 0x550   :  { %v780_v40 = vmul.f32 %v774_v18, %v697_v60  ;;  %v785_v17 = vadd.f32 %v782_v14, %v759_v56  ;;  %v1768_v21 = vpop.permute.xlu0 %1767 }
 0x551   :  { %v1775_v13 = vmul.f32 %v1768_v21, %v1693_v12 }
 0x552   :  { %v784_v7 = vmul.f32 %v4743_v2, %v780_v40 }
 0x553   :  { %v1674_v10 = vpop.permute.xlu1 %1673  ;;  %v1778_v58 = vmul.f32 %v1775_v13, %v4743_v2 }
 0x554   :  { %v1681_v20 = vmax.f32 %v1597_v24, %v1674_v10  ;;  %v787_v61 = vadd.f32 %v784_v7, %v761_v31  ;;  %v801_v50 = vpop.permute.xlu0 %800 }
 0x555   :  { %v809_v41 = vadd.f32 %v801_v50, %v785_v17 }
 0x556   :  { %v1756_v44 = vmul.f32 %v1681_v20, %v758_v4 }
 0x557   :  { %v1766_v9 = vpop.permute.xlu1 %1765  ;;  %815 = vrot.lane.b32.xlu0 %v809_v41, %s3411_s23 }
 0x558   :  { %v1774_v36 = vmul.f32 %v1766_v9, %v1692_v47  ;;  %v1781_v52 = vadd.f32 %v1778_v58, %v1756_v44  ;;  %v805_v48 = vpop.permute.xlu0 %804 }
 0x559   :  { %v811_v37 = vadd.f32 %v805_v48, %v787_v61 }
 0x55a   :  { %v1777_v6 = vmul.f32 %v1774_v36, %v4743_v2 }
 0x55b   :  { %v1770_v53 = vpop.permute.xlu1 %1769  ;;  %819 = vrot.lane.b32.xlu0 %v811_v37, %s3411_s23 }
 0x55c   :  { %v1776_v54 = vmul.f32 %v1770_v53, %v1694_v15  ;;  %v1780_v39 = vadd.f32 %v1777_v6, %v1755_v22  ;;  %v1797_v59 = vpop.permute.xlu0 %1796 }
 0x55d   :  { %v1804_v57 = vadd.f32 %v1797_v59, %v1781_v52 }
 0x55e   :  { %v1779_v63 = vmul.f32 %v1776_v54, %v4743_v2 }
 0x55f   :  { %v803_v33 = vpop.permute.xlu1 %802  ;;  %1811 = vrot.lane.b32.xlu0 %v1804_v57, %s3411_s23 }
 0x560   :  { %v810_v11 = vadd.f32 %v803_v33, %v786_v35  ;;  %v1782_v42 = vadd.f32 %v1779_v63, %v1757_v45 }
 0x562   :  { %817 = vrot.lane.b32.xlu1 %v810_v11, %s3411_s23 }
 0x563   :  { %v1795_v62 = vpop.permute.xlu1 %1794 }
 0x564   :  { %v1803_v8 = vadd.f32 %v1795_v62, %v1780_v39 }
 0x566   :  { %1809 = vrot.lane.b32.xlu1 %v1803_v8, %s3411_s23 }
 0x567   :  { %v1799_v4 = vpop.permute.xlu1 %1798 }
 0x568   :  { %v1805_v26 = vadd.f32 %v1799_v4, %v1782_v42 }
 0x56a   :  { %1813 = vrot.lane.b32.xlu1 %v1805_v26, %s3411_s23  ;;  %s2911_s23 = sld [smem:[#allocation7 + $0x5]] }
 0x58a   :  { %v3212_v46 = vpop.f32.mrb[4].mxu1 }
 0x58b   :  { %2434 = vst.msk [vmem:[#allocation4 + $0x8] sm:$0xff] %vm826_vm3, %v3212_v46  ;;  %v2436_v2 = vsel %vm826_vm3, %v3212_v46, 0.0  ;;  %v2445_v49 = vmul.f32 %v3212_v46, %v3212_v46  ;;  %v2424_v60 = vpop.f32.mrb[5].mxu1 }
 0x58c   :  { %2433 = vst.msk [vmem:[#allocation4] sm:$0xff] %vm826_vm3, %v2424_v60  ;;  %v2435_v19 = vsel %vm826_vm3, %v2424_v60, 0.0  ;;  %v2444_v0 = vmul.f32 %v2424_v60, %v2424_v60 }
 0x58d   :  { %v2447_v56 = vsel %vm826_vm3, %v2445_v49, 0.0  ;;  %v2437_v16 = vadd.f32 %v2436_v2, %v2435_v19  ;;  %v4833_v49 = vsub.s32 0, %v4105_v5  ;;  %v2851_v19 = vstv %s2911_s23 }
 0x58e   :  { %v2446_v23 = vsel %vm826_vm3, %v2444_v0, 0.0 }
 0x58f   :  { %v2438_v35 = vrot.slane %v2437_v16, 4  ;;  %v2448_v43 = vadd.f32 %v2447_v56, %v2446_v23  ;;  %v2852_v23 = vmul.f32 %v2851_v19, %v4115_v25  ;;  %v2870_v25 = vstv %s2910_s16 }
 0x591   :  { %v2449_v14 = vrot.slane %v2448_v43, 4  ;;  %v2439_v38 = vadd.f32 %v2438_v35, %v2437_v16 }
 0x592   :  { %v2857_v56 = vld [vmem:[#allocation4 + $0x8] sm:$0xff] }
 0x593   :  { %v2450_v55 = vadd.f32 %v2449_v14, %v2448_v43  ;;  %v2440_v40 = vrot.slane %v2439_v38, 2  ;;  %v2856_v0 = vld [vmem:[#allocation4] sm:$0xff] }
 0x595   :  { %v3231_v51 = vpop.f32.mrb[6].mxu0  ;;  %v2451_v3 = vrot.slane %v2450_v55, 2  ;;  %v2441_v13 = vadd.f32 %v2440_v40, %v2439_v38 }
 0x596   :  { %2721 = vst.msk [vmem:[#allocation4 + $0x18] sm:$0xff] %vm826_vm3, %v3231_v51  ;;  %v2723_v1 = vsel %vm826_vm3, %v3231_v51, 0.0  ;;  %v2732_v12 = vmul.f32 %v3231_v51, %v3231_v51  ;;  %v2710_v18 = vpop.f32.mrb[7].mxu0 }
 0x597   :  { %2720 = vst.msk [vmem:[#allocation4 + $0x10] sm:$0xff] %vm826_vm3, %v2710_v18  ;;  %v2722_v24 = vsel %vm826_vm3, %v2710_v18, 0.0  ;;  %v2731_v31 = vmul.f32 %v2710_v18, %v2710_v18  ;;  %v2452_v20 = vadd.f32 %v2451_v3, %v2450_v55  ;;  %v2442_v44 = vrot.slane %v2441_v13, 1 }
 0x598   :  { %v2734_v17 = vsel %vm826_vm3, %v2732_v12, 0.0  ;;  %v2724_v7 = vadd.f32 %v2723_v1, %v2722_v24  ;;  %v4834_v1 = vsub.s32 1, %v4105_v5 }
 0x599   :  { %v2733_v21 = vsel %vm826_vm3, %v2731_v31, 0.0  ;;  %v2453_v9 = vrot.slane %v2452_v20, 1  ;;  %v2443_v32 = vadd.f32 %v2442_v44, %v2441_v13 }
 0x59a   :  { %v2725_v34 = vrot.slane %v2724_v7, 4  ;;  %v2735_v10 = vadd.f32 %v2734_v17, %v2733_v21  ;;  %v2853_v17 = vmul.f32 %v2851_v19, %v4117_v27  ;;  %v2886_v21 = vmul.f32 %v4121_v30, %v2851_v19 }
 0x59b   :  { %v2454_v48 = vadd.f32 %v2453_v9, %v2452_v20 }
 0x59c   :  { %v2726_v47 = vadd.f32 %v2725_v34, %v2724_v7  ;;  %v2736_v29 = vrot.slane %v2735_v10, 4  ;;  %v2885_v7 = vmul.f32 %v4119_v28, %v2851_v19 }
 0x59d   :  { %v2890_v38 = vld [vmem:[#allocation4 + $0x18] sm:$0xff] }
 0x59e   :  { %v2727_v61 = vrot.slane %v2726_v47, 2  ;;  %v2737_v58 = vadd.f32 %v2736_v29, %v2735_v10  ;;  %v2889_v14 = vld [vmem:[#allocation4 + $0x10] sm:$0xff] }
 0x5a0   :  { %v2728_v50 = vadd.f32 %v2727_v61, %v2726_v47  ;;  %v2738_v15 = vrot.slane %v2737_v58, 2 }
 0x5a2   :  { %v2729_v41 = vrot.slane %v2728_v50, 1  ;;  %v2739_v22 = vadd.f32 %v2738_v15, %v2737_v58 }
 0x5a4   :  { %v2730_v36 = vadd.f32 %v2729_v41, %v2728_v50  ;;  %v2740_v52 = vrot.slane %v2739_v22, 1 }
 0x5a6   :  { %v2741_v6 = vadd.f32 %v2740_v52, %v2739_v22  ;;  %v2742_v53 = vadd.f32 %v2730_v36, %v2443_v32 }
 0x5a8   :  { %v2743_v37 = vadd.f32 %v2741_v6, %v2454_v48 }
 0x5aa   :  { %v2744_v45 = vsel %vm66_vm5, %v2742_v53, %v2743_v37 }
 0x5ab   :  { %3249 = vmatmul.mubr.msk.f32.vlgmr.msra.gmra.mrb[6].mxu1 %vm826_vm3, %v2744_v45 }
 0x5c9   :  { %v816_v54 = vpop.permute.xlu0 %815 }
 0x5ca   :  { %825 = vst.msk [vmem:[#allocation5 - $0x1] sm:$0xfe] %vm824_vm11, %v816_v54 }
 0x5cd   :  { %v820_v39 = vpop.permute.xlu0 %819 }
 0x5ce   :  { %829 = vst.msk [vmem:[#allocation5 + $0xf] sm:$0x1] %vm828_vm12, %v820_v39 }
 0x5d1   :  { %v1812_v63 = vpop.permute.xlu0 %1811 }
 0x5d2   :  { %1820 = vst.msk [vmem:[#allocation5 + $0x17] sm:$0xff] %vm826_vm3, %v1812_v63 }
 0x5d4   :  { %v818_v59 = vpop.permute.xlu1 %817 }
 0x5d5   :  { %827 = vst.msk [vmem:[#allocation5 + $0x7] sm:$0xff] %vm826_vm3, %v818_v59 }
 0x5d8   :  { %v1810_v33 = vpop.permute.xlu1 %1809 }
 0x5d9   :  { %1819 = vst.msk [vmem:[#allocation5 + $0xf] sm:$0xfe] %vm824_vm11, %v1810_v33 }
 0x5dc   :  { %v1814_v57 = vpop.permute.xlu1 %1813  ;;  %v2835_v35 = vld [vmem:[#allocation5] sm:$0xff]  ;;  %v2836_v51 = vld [vmem:[#allocation5 + $0x8] sm:$0xff] }
 0x5dd   :  { %1821 = vst.msk [vmem:[#allocation5 + $0x1f] sm:$0x1] %vm828_vm12, %v1814_v57  ;;  %v2854_v47 = vadd.f32 %v2852_v23, %v2835_v35  ;;  %v2855_v29 = vadd.f32 %v2853_v17, %v2836_v51 }
 0x5e0   :  { %v2877_v18 = vld [vmem:[#allocation5 + $0x10] sm:$0xff] }
 0x5e1   :  { %v2887_v20 = vadd.f32 %v2885_v7, %v2877_v18 }
 0x5e4   :  { %v2878_v24 = vld [vmem:[#allocation5 + $0x18] sm:$0xff] }
 0x5e5   :  { %v2888_v5 = vadd.f32 %v2886_v21, %v2878_v24 }
 0x67e   :  { %v2822_v11 = vpop.f32.mrb[6].mxu1 }
 0x67f   :  { %v2826_v42 = vmul.f32 0.001953125, %v2822_v11  ;;  %v3250_v62 = vpop.f32.mrb[7].mxu1 }
 0x681   :  { %v2827_v8 = vmul.f32 %v2826_v42, %v2826_v42  ;;  %v2861_v60 = vrot.slane %v2826_v42, %v4833_v49 }
 0x683   :  { %v2829_v4 = vrot.slane %v2827_v8, 7  ;;  %v2862_v43 = vsub.f32 %v2856_v0, %v2861_v60  ;;  %v2863_v55 = vsub.f32 %v2857_v56, %v2861_v60  ;;  %v2891_v31 = vsub.f32 %v2889_v14, %v2861_v60 }
 0x684   :  { %v2892_v40 = vsub.f32 %v2890_v38, %v2861_v60 }
 0x685   :  { %v2831_v26 = vsub.f32 %v2826_v42, %v2829_v4 }
 0x687   :  { %v2832_v46 = vmax.f32 %v2831_v26, 0.0 }
 0x689   :  { %v2833_v2 = vadd.f32 1e-05, %v2832_v46 }
 0x68b   :  { %3384 = vrsqrt.f32 %v2833_v2 }
 0x695   :  { %v3385_v16 = vpop.eup %3384 }
 0x696   :  { %v2867_v12 = vrot.slane %v3385_v16, %v4834_v1 }
 0x698   :  { %v2868_v3 = vmul.f32 %v2867_v12, %v2862_v43  ;;  %v2869_v34 = vmul.f32 %v2867_v12, %v2863_v55  ;;  %v2893_v10 = vmul.f32 %v2891_v31, %v2867_v12  ;;  %v2894_v13 = vmul.f32 %v2892_v40, %v2867_v12 }
 0x69a   :  { %v2871_v61 = vmul.f32 %v2870_v25, %v2868_v3  ;;  %v2872_v58 = vmul.f32 %v2870_v25, %v2869_v34  ;;  %v2895_v44 = vmul.f32 %v2893_v10, %v2870_v25  ;;  %v2896_v50 = vmul.f32 %v2894_v13, %v2870_v25 }
 0x69c   :  { %v2873_v15 = vadd.f32 %v2871_v61, %v2854_v47  ;;  %v2874_v9 = vadd.f32 %v2872_v58, %v2855_v29  ;;  %v2897_v27 = vadd.f32 %v2895_v44, %v2887_v20  ;;  %v2898_v41 = vadd.f32 %v2896_v50, %v2888_v5 }
 0x69e   :  { %2875 = vst.msk [vmem:[%s4827_s11] sm:$0xff] %vm826_vm3, %v2873_v15  ;;  %2876 = vst.msk [vmem:[%s4827_s11 + $0x8] sm:$0xff] %vm826_vm3, %v2874_v9 }
 0x69f   :  { %3019 = vst.msk [vmem:[%s4827_s11 + $0x10] sm:$0xff] %vm826_vm3, %v2897_v27  ;;  %3020 = vst.msk [vmem:[%s4827_s11 + $0x18] sm:$0xff] %vm826_vm3, %v2898_v41 }
 0x6a0   :  { %2906 = vsyncpa [#allocation8], 1 }

</bundles_post_ra>
